<compile_context>
chip_gen: v7x
topology: tpu7x:2x2x1
jax: 0.10.0
libtpu: 0.0.40
codegen_flags: <defaults>
</compile_context>

<pallas_src>
import functools

import jax
import jax.numpy as jnp
from jax.experimental import pallas as pl
from jax.experimental.pallas import tpu as pltpu


def _leaky(v, neg_slope):
    return jnp.where(v >= 0, v, v * neg_slope)


def _matmul(w, x, use_mxu):
    """(Co, K) @ (K, M) -> (Co, M), f32 accumulation.

    MXU path for realistic channel widths; unrolled VPU broadcast-FMAs when the
    contraction is tiny (padding the MXU would waste it).
    """
    if use_mxu:
        return jnp.dot(w, x, preferred_element_type=jnp.float32)
    acc = w[:, 0:1] * x[0:1, :]
    for k in range(1, x.shape[0]):
        acc = acc + w[:, k:k + 1] * x[k:k + 1, :]
    return acc


def _res_bottleneck_kernel(x_ref, mask_ref, w1_ref, b1_ref, w2_ref, b2_ref,
                           w3_ref, b3_ref, o_ref, *, W, neg_slope, use_mxu):
    # x_ref   : (TILE_N, C_in, M)   M = padded H*W (multiple of 128 lanes)
    # mask_ref: (9, M) f32 boundary masks, one per 3x3 tap
    # w1_ref  : (C_mid, C_in)   block-diagonal dense, b1: (C_mid, 1)
    # w2_ref  : (9, C_mid, C_mid) block-diagonal,     b2: (C_mid, 1)
    # w3_ref  : (C_out, C_mid)  block-diagonal,       b3: (C_out, 1)
    tile_n, _, M = x_ref.shape

    # Hoist weight/bias loads out of the per-image loop (loaded once per step).
    w1 = w1_ref[...]
    b1 = b1_ref[...]
    b2 = b2_ref[...]
    w3 = w3_ref[...]
    b3 = b3_ref[...]

    for n in range(tile_n):  # static unroll over the images in this block
        xg = x_ref[n].astype(jnp.float32)                         # (C_in, M)

        # ---- conv1: 1x1 + bias + LeakyReLU (full-channel, block-diag W) ----
        y1 = _leaky(_matmul(w1, xg, use_mxu) + b1, neg_slope)     # (C_mid, M)

        # ---- conv2: 3x3, padding=1, as 9 taps. Center tap needs no roll and
        # no mask; the other 8 are one XLU roll + one vmul by the precomputed
        # boundary mask + one channel contraction each. ----------------------
        acc2 = _matmul(w2_ref[4], y1, use_mxu) + b2
        for t in (0, 1, 2, 3, 5, 6, 7, 8):
            dy = t // 3 - 1
            dx = t % 3 - 1
            delta = dy * W + dx
            # nb[m] = y1[m + delta] (circular; wraps killed by the mask)
            nb = pltpu.roll(y1, shift=(-delta) % M, axis=1) * mask_ref[t:t + 1, :]
            acc2 = acc2 + _matmul(w2_ref[t], nb, use_mxu)
        y2 = _leaky(acc2, neg_slope)                               # (C_mid, M)

        # ---- conv3: 1x1 + bias + LeakyReLU, residual, one unmasked store ----
        y3 = _leaky(_matmul(w3, y2, use_mxu) + b3, neg_slope)      # (C_out, M)
        o_ref[n] = (y3 + xg).astype(o_ref.dtype)


def _block_diag(w_grouped, groups):
    """(Co, Kg) grouped weight -> (Co, Kg*groups) block-diagonal dense weight."""
    Co, Kg = w_grouped.shape
    co_g = Co // groups
    full = jnp.zeros((Co, Kg * groups), w_grouped.dtype)
    for g in range(groups):
        full = full.at[g * co_g:(g + 1) * co_g, g * Kg:(g + 1) * Kg].set(
            w_grouped[g * co_g:(g + 1) * co_g, :])
    return full


def res_bottleneck_forward(x, w1, b1, w2, b2, w3, b3, *, groups,
                           negative_slope=0.01):
    """Forward of ResBottleneck.

    x  : (N, C_in, H, W)
    w1 : (C_mid, C_in/groups, 1, 1),  b1: (C_mid,)
    w2 : (C_mid, C_mid/groups, 3, 3), b2: (C_mid,)
    w3 : (C_out, C_mid/groups, 1, 1), b3: (C_out,)
    """
    N, C_in, H, W = x.shape
    C_mid = w1.shape[0]
    C_out = w3.shape[0]
    assert C_out == C_in, "residual add requires outplanes == inplanes"
    assert C_in % groups == 0 and C_mid % groups == 0 and C_out % groups == 0
    HW = H * W
    HW_pad = ((HW + 127) // 128) * 128   # lane-dense last dim -> unmasked vst

    # Free reshape (NCHW is channels-major per image); zero-pad flattened
    # spatial axis up to a 128 multiple. Valid positions never read padded
    # neighbors (the tap masks forbid it), and padded outputs are cropped.
    x_flat = x.reshape(N, C_in, HW)
    if HW_pad != HW:
        x_flat = jnp.pad(x_flat, ((0, 0), (0, 0), (0, HW_pad - HW)))

    f32 = jnp.float32
    # Tiny host-side re-packs: block-diagonal dense weights (kills the in-kernel
    # group loop), tap-major 3x3 weights, column biases.
    w1_full = _block_diag(w1.reshape(C_mid, C_in // groups).astype(f32), groups)
    w3_full = _block_diag(w3.reshape(C_out, C_mid // groups).astype(f32), groups)
    w2_t = jnp.transpose(w2, (2, 3, 0, 1)).reshape(9, C_mid, C_mid // groups)
    w2_full = jnp.stack(
        [_block_diag(w2_t[t].astype(f32), groups) for t in range(9)], axis=0)
    b1_2d = b1.reshape(C_mid, 1).astype(f32)
    b2_2d = b2.reshape(C_mid, 1).astype(f32)
    b3_2d = b3.reshape(C_out, 1).astype(f32)

    # Precomputed boundary masks for the 9 taps of the padded 3x3 conv:
    # masks[t, m] = 1 iff flattened position m has an in-image neighbor at
    # (row+dy, col+dx). Replaces per-tap compares/ANDs/selects with one vmul.
    col = jnp.tile(jnp.arange(W, dtype=jnp.int32), H)
    row = jnp.repeat(jnp.arange(H, dtype=jnp.int32), W)
    masks = []
    for t in range(9):
        dy, dx = t // 3 - 1, t % 3 - 1
        ok = jnp.ones((HW,), jnp.bool_)
        if dy == -1:
            ok = ok & (row >= 1)
        elif dy == 1:
            ok = ok & (row <= H - 2)
        if dx == -1:
            ok = ok & (col >= 1)
        elif dx == 1:
            ok = ok & (col <= W - 2)
        masks.append(ok)
    masks = jnp.stack(masks, axis=0).astype(f32)                   # (9, HW)
    if HW_pad != HW:
        masks = jnp.pad(masks, ((0, 0), (0, HW_pad - HW)))

    # Images per grid step: biggest divisor of N whose working set stays small,
    # to amortize the ~0.35us per-step overhead at tiny batch/spatial sizes.
    per_image_bytes = ((C_in + C_out) * 4 + 6 * C_mid * 4) * HW_pad
    tile_n = 1
    for d in range(N, 0, -1):
        if N % d == 0 and d * per_image_bytes <= (4 << 20):
            tile_n = d
            break

    # MXU once the channel contraction is wide enough; VPU FMAs otherwise.
    use_mxu = min(C_in, C_mid) >= 32

    # Explicit VMEM budget: double-buffered in/out blocks + resident weights,
    # masks, f32 intermediates, plus slack (clamped well under v7x's 64 MiB).
    weight_bytes = (w1_full.size + w2_full.size + w3_full.size
                    + b1_2d.size + b2_2d.size + b3_2d.size + masks.size) * 4
    block_bytes = tile_n * (C_in + C_out) * HW_pad * 4
    interm_bytes = 6 * C_mid * HW_pad * 4
    vmem_limit = int(min(max(2 * block_bytes + weight_bytes + interm_bytes
                             + (2 << 20), 8 << 20), 48 << 20))

    kernel = functools.partial(_res_bottleneck_kernel, W=W,
                               neg_slope=negative_slope, use_mxu=use_mxu)

    out_flat = pl.pallas_call(
        kernel,
        out_shape=jax.ShapeDtypeStruct((N, C_out, HW_pad), x.dtype),
        grid_spec=pltpu.PrefetchScalarGridSpec(
            num_scalar_prefetch=0,
            grid=(N // tile_n,),
            in_specs=[
                pl.BlockSpec((tile_n, C_in, HW_pad), lambda n: (n, 0, 0)),
                pl.BlockSpec((9, HW_pad), lambda n: (0, 0)),
                pl.BlockSpec((C_mid, C_in), lambda n: (0, 0)),
                pl.BlockSpec((C_mid, 1), lambda n: (0, 0)),
                pl.BlockSpec((9, C_mid, C_mid), lambda n: (0, 0, 0)),
                pl.BlockSpec((C_mid, 1), lambda n: (0, 0)),
                pl.BlockSpec((C_out, C_mid), lambda n: (0, 0)),
                pl.BlockSpec((C_out, 1), lambda n: (0, 0)),
            ],
            out_specs=pl.BlockSpec((tile_n, C_out, HW_pad), lambda n: (n, 0, 0)),
        ),
        compiler_params=pltpu.CompilerParams(
            dimension_semantics=("parallel",),
            vmem_limit_bytes=vmem_limit,
        ),
    )(x_flat, masks, w1_full, b1_2d, w2_full, b2_2d, w3_full, b3_2d)

    return out_flat[:, :, :HW].reshape(N, C_out, H, W)


def _ref_forward(x, w1, b1, w2, b2, w3, b3, groups, neg=0.01):
    def conv(inp, w, b, pad):
        y = jax.lax.conv_general_dilated(
            inp, w, window_strides=(1, 1),
            padding=[(pad, pad), (pad, pad)],
            dimension_numbers=("NCHW", "OIHW", "NCHW"),
            feature_group_count=groups)
        return y + b[None, :, None, None]

    lrelu = lambda v: jnp.where(v >= 0, v, neg * v)
    out = lrelu(conv(x, w1, b1, 0))
    out = lrelu(conv(out, w2, b2, 1))
    out = lrelu(conv(out, w3, b3, 0))
    return out + x


if __name__ == "__main__":
    key = jax.random.PRNGKey(0)
    N, inplanes, outplanes, groups, H, W = 2, 8, 8, 2, 16, 16
    C_mid = inplanes // 2

    ks = jax.random.split(key, 7)
    x = jax.random.normal(ks[0], (N, inplanes, H, W), dtype=jnp.float32)
    w1 = jax.random.normal(ks[1], (C_mid, inplanes // groups, 1, 1), jnp.float32) * 0.2
    b1 = jax.random.normal(ks[2], (C_mid,), jnp.float32) * 0.05
    w2 = jax.random.normal(ks[3], (C_mid, C_mid // groups, 3, 3), jnp.float32) * 0.2
    b2 = jax.random.normal(ks[4], (C_mid,), jnp.float32) * 0.05
    w3 = jax.random.normal(ks[5], (outplanes, C_mid // groups, 1, 1), jnp.float32) * 0.2
    b3 = jax.random.normal(ks[6], (outplanes,), jnp.float32) * 0.05

    out = jax.block_until_ready(
        res_bottleneck_forward(x, w1, b1, w2, b2, w3, b3, groups=groups))
    assert out.shape == (N, outplanes, H, W), out.shape

    ref = _ref_forward(x, w1, b1, w2, b2, w3, b3, groups)
    max_err = float(jnp.max(jnp.abs(out - ref)))
    assert jnp.allclose(out, ref, atol=1e-4, rtol=1e-4), max_err

    print("KERNEL_OK")
</pallas_src>

<mosaic_0001>
module attributes {stable_mosaic.version = 11 : i64} {
  func.func @_res_bottleneck_kernel(%arg0: i32, %arg1: memref<2x8x256xf32, #tpu.memory_space<vmem>>, %arg2: memref<9x256xf32, #tpu.memory_space<vmem>>, %arg3: memref<4x8xf32, #tpu.memory_space<vmem>>, %arg4: memref<4x1xf32, #tpu.memory_space<vmem>>, %arg5: memref<9x4x4xf32, #tpu.memory_space<vmem>>, %arg6: memref<4x1xf32, #tpu.memory_space<vmem>>, %arg7: memref<8x4xf32, #tpu.memory_space<vmem>>, %arg8: memref<8x1xf32, #tpu.memory_space<vmem>>, %arg9: memref<2x8x256xf32, #tpu.memory_space<vmem>>) attributes {dimension_semantics = [#tpu.dimension_semantics<parallel>], iteration_bounds = array<i64: 1>, scalar_prefetch = 0 : i64, scratch_operands = 0 : i64, tpu.core_type = #tpu.core_type<tc>, window_params = [{transform_indices = @transform_0, window_bounds = array<i64: 2, 8, 256>}, {pipeline_mode = #tpu.pipeline_mode<synchronous>, transform_indices = @transform_1, window_bounds = array<i64: 9, 256>}, {pipeline_mode = #tpu.pipeline_mode<synchronous>, transform_indices = @transform_2, window_bounds = array<i64: 4, 8>}, {pipeline_mode = #tpu.pipeline_mode<synchronous>, transform_indices = @transform_3, window_bounds = array<i64: 4, 1>}, {pipeline_mode = #tpu.pipeline_mode<synchronous>, transform_indices = @transform_4, window_bounds = array<i64: 9, 4, 4>}, {pipeline_mode = #tpu.pipeline_mode<synchronous>, transform_indices = @transform_5, window_bounds = array<i64: 4, 1>}, {pipeline_mode = #tpu.pipeline_mode<synchronous>, transform_indices = @transform_6, window_bounds = array<i64: 8, 4>}, {pipeline_mode = #tpu.pipeline_mode<synchronous>, transform_indices = @transform_7, window_bounds = array<i64: 8, 1>}, {transform_indices = @transform_8, window_bounds = array<i64: 2, 8, 256>}]} {
    %c0 = arith.constant 0 : index
    %c0_0 = arith.constant 0 : index
    %0 = vector.load %arg3[%c0, %c0_0] : memref<4x8xf32, #tpu.memory_space<vmem>>, vector<4x8xf32>
    %c0_1 = arith.constant 0 : index
    %c0_2 = arith.constant 0 : index
    %1 = vector.load %arg4[%c0_1, %c0_2] : memref<4x1xf32, #tpu.memory_space<vmem>>, vector<4x1xf32>
    %c0_3 = arith.constant 0 : index
    %c0_4 = arith.constant 0 : index
    %2 = vector.load %arg6[%c0_3, %c0_4] : memref<4x1xf32, #tpu.memory_space<vmem>>, vector<4x1xf32>
    %c0_5 = arith.constant 0 : index
    %c0_6 = arith.constant 0 : index
    %3 = vector.load %arg7[%c0_5, %c0_6] : memref<8x4xf32, #tpu.memory_space<vmem>>, vector<8x4xf32>
    %c0_7 = arith.constant 0 : index
    %c0_8 = arith.constant 0 : index
    %4 = vector.load %arg8[%c0_7, %c0_8] : memref<8x1xf32, #tpu.memory_space<vmem>>, vector<8x1xf32>
    %c0_9 = arith.constant 0 : index
    %c0_10 = arith.constant 0 : index
    %c0_11 = arith.constant 0 : index
    %5 = vector.load %arg1[%c0_9, %c0_10, %c0_11] : memref<2x8x256xf32, #tpu.memory_space<vmem>>, vector<1x8x256xf32>
    %6 = vector.shape_cast %5 : vector<1x8x256xf32> to vector<8x256xf32>
    %7 = vector.extract_strided_slice %0 {offsets = [0, 0], sizes = [4, 1], strides = [1, 1]} : vector<4x8xf32> to vector<4x1xf32>
    %8 = vector.extract_strided_slice %6 {offsets = [0, 0], sizes = [1, 256], strides = [1, 1]} : vector<8x256xf32> to vector<1x256xf32>
    %9 = vector.broadcast %7 : vector<4x1xf32> to vector<4x256xf32>
    %10 = vector.broadcast %8 : vector<1x256xf32> to vector<4x256xf32>
    %11 = arith.mulf %9, %10 : vector<4x256xf32>
    %12 = vector.extract_strided_slice %0 {offsets = [0, 1], sizes = [4, 1], strides = [1, 1]} : vector<4x8xf32> to vector<4x1xf32>
    %13 = vector.extract_strided_slice %6 {offsets = [1, 0], sizes = [1, 256], strides = [1, 1]} : vector<8x256xf32> to vector<1x256xf32>
    %14 = vector.broadcast %12 : vector<4x1xf32> to vector<4x256xf32>
    %15 = vector.broadcast %13 : vector<1x256xf32> to vector<4x256xf32>
    %16 = arith.mulf %14, %15 : vector<4x256xf32>
    %17 = arith.addf %11, %16 : vector<4x256xf32>
    %18 = vector.extract_strided_slice %0 {offsets = [0, 2], sizes = [4, 1], strides = [1, 1]} : vector<4x8xf32> to vector<4x1xf32>
    %19 = vector.extract_strided_slice %6 {offsets = [2, 0], sizes = [1, 256], strides = [1, 1]} : vector<8x256xf32> to vector<1x256xf32>
    %20 = vector.broadcast %18 : vector<4x1xf32> to vector<4x256xf32>
    %21 = vector.broadcast %19 : vector<1x256xf32> to vector<4x256xf32>
    %22 = arith.mulf %20, %21 : vector<4x256xf32>
    %23 = arith.addf %17, %22 : vector<4x256xf32>
    %24 = vector.extract_strided_slice %0 {offsets = [0, 3], sizes = [4, 1], strides = [1, 1]} : vector<4x8xf32> to vector<4x1xf32>
    %25 = vector.extract_strided_slice %6 {offsets = [3, 0], sizes = [1, 256], strides = [1, 1]} : vector<8x256xf32> to vector<1x256xf32>
    %26 = vector.broadcast %24 : vector<4x1xf32> to vector<4x256xf32>
    %27 = vector.broadcast %25 : vector<1x256xf32> to vector<4x256xf32>
    %28 = arith.mulf %26, %27 : vector<4x256xf32>
    %29 = arith.addf %23, %28 : vector<4x256xf32>
    %30 = vector.extract_strided_slice %0 {offsets = [0, 4], sizes = [4, 1], strides = [1, 1]} : vector<4x8xf32> to vector<4x1xf32>
    %31 = vector.extract_strided_slice %6 {offsets = [4, 0], sizes = [1, 256], strides = [1, 1]} : vector<8x256xf32> to vector<1x256xf32>
    %32 = vector.broadcast %30 : vector<4x1xf32> to vector<4x256xf32>
    %33 = vector.broadcast %31 : vector<1x256xf32> to vector<4x256xf32>
    %34 = arith.mulf %32, %33 : vector<4x256xf32>
    %35 = arith.addf %29, %34 : vector<4x256xf32>
    %36 = vector.extract_strided_slice %0 {offsets = [0, 5], sizes = [4, 1], strides = [1, 1]} : vector<4x8xf32> to vector<4x1xf32>
    %37 = vector.extract_strided_slice %6 {offsets = [5, 0], sizes = [1, 256], strides = [1, 1]} : vector<8x256xf32> to vector<1x256xf32>
    %38 = vector.broadcast %36 : vector<4x1xf32> to vector<4x256xf32>
    %39 = vector.broadcast %37 : vector<1x256xf32> to vector<4x256xf32>
    %40 = arith.mulf %38, %39 : vector<4x256xf32>
    %41 = arith.addf %35, %40 : vector<4x256xf32>
    %42 = vector.extract_strided_slice %0 {offsets = [0, 6], sizes = [4, 1], strides = [1, 1]} : vector<4x8xf32> to vector<4x1xf32>
    %43 = vector.extract_strided_slice %6 {offsets = [6, 0], sizes = [1, 256], strides = [1, 1]} : vector<8x256xf32> to vector<1x256xf32>
    %44 = vector.broadcast %42 : vector<4x1xf32> to vector<4x256xf32>
    %45 = vector.broadcast %43 : vector<1x256xf32> to vector<4x256xf32>
    %46 = arith.mulf %44, %45 : vector<4x256xf32>
    %47 = arith.addf %41, %46 : vector<4x256xf32>
    %48 = vector.extract_strided_slice %0 {offsets = [0, 7], sizes = [4, 1], strides = [1, 1]} : vector<4x8xf32> to vector<4x1xf32>
    %49 = vector.extract_strided_slice %6 {offsets = [7, 0], sizes = [1, 256], strides = [1, 1]} : vector<8x256xf32> to vector<1x256xf32>
    %50 = vector.broadcast %48 : vector<4x1xf32> to vector<4x256xf32>
    %51 = vector.broadcast %49 : vector<1x256xf32> to vector<4x256xf32>
    %52 = arith.mulf %50, %51 : vector<4x256xf32>
    %53 = arith.addf %47, %52 : vector<4x256xf32>
    %54 = vector.broadcast %1 : vector<4x1xf32> to vector<4x256xf32>
    %55 = arith.addf %53, %54 : vector<4x256xf32>
    %cst = arith.constant 0.000000e+00 : f32
    %56 = vector.broadcast %cst : f32 to vector<4x256xf32>
    %57 = arith.cmpf oge, %55, %56 : vector<4x256xf32>
    %cst_12 = arith.constant 0.00999999977 : f32
    %58 = vector.broadcast %cst_12 : f32 to vector<4x256xf32>
    %59 = arith.mulf %55, %58 : vector<4x256xf32>
    %60 = arith.select %57, %55, %59 : vector<4x256xi1>, vector<4x256xf32>
    %c4 = arith.constant 4 : index
    %c0_13 = arith.constant 0 : index
    %c0_14 = arith.constant 0 : index
    %61 = vector.load %arg5[%c4, %c0_13, %c0_14] : memref<9x4x4xf32, #tpu.memory_space<vmem>>, vector<1x4x4xf32>
    %62 = vector.shape_cast %61 : vector<1x4x4xf32> to vector<4x4xf32>
    %63 = vector.extract_strided_slice %62 {offsets = [0, 0], sizes = [4, 1], strides = [1, 1]} : vector<4x4xf32> to vector<4x1xf32>
    %64 = vector.extract_strided_slice %60 {offsets = [0, 0], sizes = [1, 256], strides = [1, 1]} : vector<4x256xf32> to vector<1x256xf32>
    %65 = vector.broadcast %63 : vector<4x1xf32> to vector<4x256xf32>
    %66 = vector.broadcast %64 : vector<1x256xf32> to vector<4x256xf32>
    %67 = arith.mulf %65, %66 : vector<4x256xf32>
    %68 = vector.extract_strided_slice %62 {offsets = [0, 1], sizes = [4, 1], strides = [1, 1]} : vector<4x4xf32> to vector<4x1xf32>
    %69 = vector.extract_strided_slice %60 {offsets = [1, 0], sizes = [1, 256], strides = [1, 1]} : vector<4x256xf32> to vector<1x256xf32>
    %70 = vector.broadcast %68 : vector<4x1xf32> to vector<4x256xf32>
    %71 = vector.broadcast %69 : vector<1x256xf32> to vector<4x256xf32>
    %72 = arith.mulf %70, %71 : vector<4x256xf32>
    %73 = arith.addf %67, %72 : vector<4x256xf32>
    %74 = vector.extract_strided_slice %62 {offsets = [0, 2], sizes = [4, 1], strides = [1, 1]} : vector<4x4xf32> to vector<4x1xf32>
    %75 = vector.extract_strided_slice %60 {offsets = [2, 0], sizes = [1, 256], strides = [1, 1]} : vector<4x256xf32> to vector<1x256xf32>
    %76 = vector.broadcast %74 : vector<4x1xf32> to vector<4x256xf32>
    %77 = vector.broadcast %75 : vector<1x256xf32> to vector<4x256xf32>
    %78 = arith.mulf %76, %77 : vector<4x256xf32>
    %79 = arith.addf %73, %78 : vector<4x256xf32>
    %80 = vector.extract_strided_slice %62 {offsets = [0, 3], sizes = [4, 1], strides = [1, 1]} : vector<4x4xf32> to vector<4x1xf32>
    %81 = vector.extract_strided_slice %60 {offsets = [3, 0], sizes = [1, 256], strides = [1, 1]} : vector<4x256xf32> to vector<1x256xf32>
    %82 = vector.broadcast %80 : vector<4x1xf32> to vector<4x256xf32>
    %83 = vector.broadcast %81 : vector<1x256xf32> to vector<4x256xf32>
    %84 = arith.mulf %82, %83 : vector<4x256xf32>
    %85 = arith.addf %79, %84 : vector<4x256xf32>
    %86 = vector.broadcast %2 : vector<4x1xf32> to vector<4x256xf32>
    %87 = arith.addf %85, %86 : vector<4x256xf32>
    %c17_i32 = arith.constant 17 : i32
    %88 = tpu.dynamic_rotate %60 by %c17_i32 dim 1 : vector<4x256xf32>, i32 -> vector<4x256xf32>
    %c0_15 = arith.constant 0 : index
    %c0_16 = arith.constant 0 : index
    %89 = vector.load %arg2[%c0_15, %c0_16] : memref<9x256xf32, #tpu.memory_space<vmem>>, vector<1x256xf32>
    %90 = vector.broadcast %89 : vector<1x256xf32> to vector<4x256xf32>
    %91 = arith.mulf %88, %90 : vector<4x256xf32>
    %c0_17 = arith.constant 0 : index
    %c0_18 = arith.constant 0 : index
    %c0_19 = arith.constant 0 : index
    %92 = vector.load %arg5[%c0_17, %c0_18, %c0_19] : memref<9x4x4xf32, #tpu.memory_space<vmem>>, vector<1x4x4xf32>
    %93 = vector.shape_cast %92 : vector<1x4x4xf32> to vector<4x4xf32>
    %94 = vector.extract_strided_slice %93 {offsets = [0, 0], sizes = [4, 1], strides = [1, 1]} : vector<4x4xf32> to vector<4x1xf32>
    %95 = vector.extract_strided_slice %91 {offsets = [0, 0], sizes = [1, 256], strides = [1, 1]} : vector<4x256xf32> to vector<1x256xf32>
    %96 = vector.broadcast %94 : vector<4x1xf32> to vector<4x256xf32>
    %97 = vector.broadcast %95 : vector<1x256xf32> to vector<4x256xf32>
    %98 = arith.mulf %96, %97 : vector<4x256xf32>
    %99 = vector.extract_strided_slice %93 {offsets = [0, 1], sizes = [4, 1], strides = [1, 1]} : vector<4x4xf32> to vector<4x1xf32>
    %100 = vector.extract_strided_slice %91 {offsets = [1, 0], sizes = [1, 256], strides = [1, 1]} : vector<4x256xf32> to vector<1x256xf32>
    %101 = vector.broadcast %99 : vector<4x1xf32> to vector<4x256xf32>
    %102 = vector.broadcast %100 : vector<1x256xf32> to vector<4x256xf32>
    %103 = arith.mulf %101, %102 : vector<4x256xf32>
    %104 = arith.addf %98, %103 : vector<4x256xf32>
    %105 = vector.extract_strided_slice %93 {offsets = [0, 2], sizes = [4, 1], strides = [1, 1]} : vector<4x4xf32> to vector<4x1xf32>
    %106 = vector.extract_strided_slice %91 {offsets = [2, 0], sizes = [1, 256], strides = [1, 1]} : vector<4x256xf32> to vector<1x256xf32>
    %107 = vector.broadcast %105 : vector<4x1xf32> to vector<4x256xf32>
    %108 = vector.broadcast %106 : vector<1x256xf32> to vector<4x256xf32>
    %109 = arith.mulf %107, %108 : vector<4x256xf32>
    %110 = arith.addf %104, %109 : vector<4x256xf32>
    %111 = vector.extract_strided_slice %93 {offsets = [0, 3], sizes = [4, 1], strides = [1, 1]} : vector<4x4xf32> to vector<4x1xf32>
    %112 = vector.extract_strided_slice %91 {offsets = [3, 0], sizes = [1, 256], strides = [1, 1]} : vector<4x256xf32> to vector<1x256xf32>
    %113 = vector.broadcast %111 : vector<4x1xf32> to vector<4x256xf32>
    %114 = vector.broadcast %112 : vector<1x256xf32> to vector<4x256xf32>
    %115 = arith.mulf %113, %114 : vector<4x256xf32>
    %116 = arith.addf %110, %115 : vector<4x256xf32>
    %117 = arith.addf %87, %116 : vector<4x256xf32>
    %c16_i32 = arith.constant 16 : i32
    %118 = tpu.dynamic_rotate %60 by %c16_i32 dim 1 : vector<4x256xf32>, i32 -> vector<4x256xf32>
    %c1 = arith.constant 1 : index
    %c0_20 = arith.constant 0 : index
    %119 = vector.load %arg2[%c1, %c0_20] : memref<9x256xf32, #tpu.memory_space<vmem>>, vector<1x256xf32>
    %120 = vector.broadcast %119 : vector<1x256xf32> to vector<4x256xf32>
    %121 = arith.mulf %118, %120 : vector<4x256xf32>
    %c1_21 = arith.constant 1 : index
    %c0_22 = arith.constant 0 : index
    %c0_23 = arith.constant 0 : index
    %122 = vector.load %arg5[%c1_21, %c0_22, %c0_23] : memref<9x4x4xf32, #tpu.memory_space<vmem>>, vector<1x4x4xf32>
    %123 = vector.shape_cast %122 : vector<1x4x4xf32> to vector<4x4xf32>
    %124 = vector.extract_strided_slice %123 {offsets = [0, 0], sizes = [4, 1], strides = [1, 1]} : vector<4x4xf32> to vector<4x1xf32>
    %125 = vector.extract_strided_slice %121 {offsets = [0, 0], sizes = [1, 256], strides = [1, 1]} : vector<4x256xf32> to vector<1x256xf32>
    %126 = vector.broadcast %124 : vector<4x1xf32> to vector<4x256xf32>
    %127 = vector.broadcast %125 : vector<1x256xf32> to vector<4x256xf32>
    %128 = arith.mulf %126, %127 : vector<4x256xf32>
    %129 = vector.extract_strided_slice %123 {offsets = [0, 1], sizes = [4, 1], strides = [1, 1]} : vector<4x4xf32> to vector<4x1xf32>
    %130 = vector.extract_strided_slice %121 {offsets = [1, 0], sizes = [1, 256], strides = [1, 1]} : vector<4x256xf32> to vector<1x256xf32>
    %131 = vector.broadcast %129 : vector<4x1xf32> to vector<4x256xf32>
    %132 = vector.broadcast %130 : vector<1x256xf32> to vector<4x256xf32>
    %133 = arith.mulf %131, %132 : vector<4x256xf32>
    %134 = arith.addf %128, %133 : vector<4x256xf32>
    %135 = vector.extract_strided_slice %123 {offsets = [0, 2], sizes = [4, 1], strides = [1, 1]} : vector<4x4xf32> to vector<4x1xf32>
    %136 = vector.extract_strided_slice %121 {offsets = [2, 0], sizes = [1, 256], strides = [1, 1]} : vector<4x256xf32> to vector<1x256xf32>
    %137 = vector.broadcast %135 : vector<4x1xf32> to vector<4x256xf32>
    %138 = vector.broadcast %136 : vector<1x256xf32> to vector<4x256xf32>
    %139 = arith.mulf %137, %138 : vector<4x256xf32>
    %140 = arith.addf %134, %139 : vector<4x256xf32>
    %141 = vector.extract_strided_slice %123 {offsets = [0, 3], sizes = [4, 1], strides = [1, 1]} : vector<4x4xf32> to vector<4x1xf32>
    %142 = vector.extract_strided_slice %121 {offsets = [3, 0], sizes = [1, 256], strides = [1, 1]} : vector<4x256xf32> to vector<1x256xf32>
    %143 = vector.broadcast %141 : vector<4x1xf32> to vector<4x256xf32>
    %144 = vector.broadcast %142 : vector<1x256xf32> to vector<4x256xf32>
    %145 = arith.mulf %143, %144 : vector<4x256xf32>
    %146 = arith.addf %140, %145 : vector<4x256xf32>
    %147 = arith.addf %117, %146 : vector<4x256xf32>
    %c15_i32 = arith.constant 15 : i32
    %148 = tpu.dynamic_rotate %60 by %c15_i32 dim 1 : vector<4x256xf32>, i32 -> vector<4x256xf32>
    %c2 = arith.constant 2 : index
    %c0_24 = arith.constant 0 : index
    %149 = vector.load %arg2[%c2, %c0_24] : memref<9x256xf32, #tpu.memory_space<vmem>>, vector<1x256xf32>
    %150 = vector.broadcast %149 : vector<1x256xf32> to vector<4x256xf32>
    %151 = arith.mulf %148, %150 : vector<4x256xf32>
    %c2_25 = arith.constant 2 : index
    %c0_26 = arith.constant 0 : index
    %c0_27 = arith.constant 0 : index
    %152 = vector.load %arg5[%c2_25, %c0_26, %c0_27] : memref<9x4x4xf32, #tpu.memory_space<vmem>>, vector<1x4x4xf32>
    %153 = vector.shape_cast %152 : vector<1x4x4xf32> to vector<4x4xf32>
    %154 = vector.extract_strided_slice %153 {offsets = [0, 0], sizes = [4, 1], strides = [1, 1]} : vector<4x4xf32> to vector<4x1xf32>
    %155 = vector.extract_strided_slice %151 {offsets = [0, 0], sizes = [1, 256], strides = [1, 1]} : vector<4x256xf32> to vector<1x256xf32>
    %156 = vector.broadcast %154 : vector<4x1xf32> to vector<4x256xf32>
    %157 = vector.broadcast %155 : vector<1x256xf32> to vector<4x256xf32>
    %158 = arith.mulf %156, %157 : vector<4x256xf32>
    %159 = vector.extract_strided_slice %153 {offsets = [0, 1], sizes = [4, 1], strides = [1, 1]} : vector<4x4xf32> to vector<4x1xf32>
    %160 = vector.extract_strided_slice %151 {offsets = [1, 0], sizes = [1, 256], strides = [1, 1]} : vector<4x256xf32> to vector<1x256xf32>
    %161 = vector.broadcast %159 : vector<4x1xf32> to vector<4x256xf32>
    %162 = vector.broadcast %160 : vector<1x256xf32> to vector<4x256xf32>
    %163 = arith.mulf %161, %162 : vector<4x256xf32>
    %164 = arith.addf %158, %163 : vector<4x256xf32>
    %165 = vector.extract_strided_slice %153 {offsets = [0, 2], sizes = [4, 1], strides = [1, 1]} : vector<4x4xf32> to vector<4x1xf32>
    %166 = vector.extract_strided_slice %151 {offsets = [2, 0], sizes = [1, 256], strides = [1, 1]} : vector<4x256xf32> to vector<1x256xf32>
    %167 = vector.broadcast %165 : vector<4x1xf32> to vector<4x256xf32>
    %168 = vector.broadcast %166 : vector<1x256xf32> to vector<4x256xf32>
    %169 = arith.mulf %167, %168 : vector<4x256xf32>
    %170 = arith.addf %164, %169 : vector<4x256xf32>
    %171 = vector.extract_strided_slice %153 {offsets = [0, 3], sizes = [4, 1], strides = [1, 1]} : vector<4x4xf32> to vector<4x1xf32>
    %172 = vector.extract_strided_slice %151 {offsets = [3, 0], sizes = [1, 256], strides = [1, 1]} : vector<4x256xf32> to vector<1x256xf32>
    %173 = vector.broadcast %171 : vector<4x1xf32> to vector<4x256xf32>
    %174 = vector.broadcast %172 : vector<1x256xf32> to vector<4x256xf32>
    %175 = arith.mulf %173, %174 : vector<4x256xf32>
    %176 = arith.addf %170, %175 : vector<4x256xf32>
    %177 = arith.addf %147, %176 : vector<4x256xf32>
    %c1_i32 = arith.constant 1 : i32
    %178 = tpu.dynamic_rotate %60 by %c1_i32 dim 1 : vector<4x256xf32>, i32 -> vector<4x256xf32>
    %c3 = arith.constant 3 : index
    %c0_28 = arith.constant 0 : index
    %179 = vector.load %arg2[%c3, %c0_28] : memref<9x256xf32, #tpu.memory_space<vmem>>, vector<1x256xf32>
    %180 = vector.broadcast %179 : vector<1x256xf32> to vector<4x256xf32>
    %181 = arith.mulf %178, %180 : vector<4x256xf32>
    %c3_29 = arith.constant 3 : index
    %c0_30 = arith.constant 0 : index
    %c0_31 = arith.constant 0 : index
    %182 = vector.load %arg5[%c3_29, %c0_30, %c0_31] : memref<9x4x4xf32, #tpu.memory_space<vmem>>, vector<1x4x4xf32>
    %183 = vector.shape_cast %182 : vector<1x4x4xf32> to vector<4x4xf32>
    %184 = vector.extract_strided_slice %183 {offsets = [0, 0], sizes = [4, 1], strides = [1, 1]} : vector<4x4xf32> to vector<4x1xf32>
    %185 = vector.extract_strided_slice %181 {offsets = [0, 0], sizes = [1, 256], strides = [1, 1]} : vector<4x256xf32> to vector<1x256xf32>
    %186 = vector.broadcast %184 : vector<4x1xf32> to vector<4x256xf32>
    %187 = vector.broadcast %185 : vector<1x256xf32> to vector<4x256xf32>
    %188 = arith.mulf %186, %187 : vector<4x256xf32>
    %189 = vector.extract_strided_slice %183 {offsets = [0, 1], sizes = [4, 1], strides = [1, 1]} : vector<4x4xf32> to vector<4x1xf32>
    %190 = vector.extract_strided_slice %181 {offsets = [1, 0], sizes = [1, 256], strides = [1, 1]} : vector<4x256xf32> to vector<1x256xf32>
    %191 = vector.broadcast %189 : vector<4x1xf32> to vector<4x256xf32>
    %192 = vector.broadcast %190 : vector<1x256xf32> to vector<4x256xf32>
    %193 = arith.mulf %191, %192 : vector<4x256xf32>
    %194 = arith.addf %188, %193 : vector<4x256xf32>
    %195 = vector.extract_strided_slice %183 {offsets = [0, 2], sizes = [4, 1], strides = [1, 1]} : vector<4x4xf32> to vector<4x1xf32>
    %196 = vector.extract_strided_slice %181 {offsets = [2, 0], sizes = [1, 256], strides = [1, 1]} : vector<4x256xf32> to vector<1x256xf32>
    %197 = vector.broadcast %195 : vector<4x1xf32> to vector<4x256xf32>
    %198 = vector.broadcast %196 : vector<1x256xf32> to vector<4x256xf32>
    %199 = arith.mulf %197, %198 : vector<4x256xf32>
    %200 = arith.addf %194, %199 : vector<4x256xf32>
    %201 = vector.extract_strided_slice %183 {offsets = [0, 3], sizes = [4, 1], strides = [1, 1]} : vector<4x4xf32> to vector<4x1xf32>
    %202 = vector.extract_strided_slice %181 {offsets = [3, 0], sizes = [1, 256], strides = [1, 1]} : vector<4x256xf32> to vector<1x256xf32>
    %203 = vector.broadcast %201 : vector<4x1xf32> to vector<4x256xf32>
    %204 = vector.broadcast %202 : vector<1x256xf32> to vector<4x256xf32>
    %205 = arith.mulf %203, %204 : vector<4x256xf32>
    %206 = arith.addf %200, %205 : vector<4x256xf32>
    %207 = arith.addf %177, %206 : vector<4x256xf32>
    %c255_i32 = arith.constant 255 : i32
    %208 = tpu.dynamic_rotate %60 by %c255_i32 dim 1 : vector<4x256xf32>, i32 -> vector<4x256xf32>
    %c5 = arith.constant 5 : index
    %c0_32 = arith.constant 0 : index
    %209 = vector.load %arg2[%c5, %c0_32] : memref<9x256xf32, #tpu.memory_space<vmem>>, vector<1x256xf32>
    %210 = vector.broadcast %209 : vector<1x256xf32> to vector<4x256xf32>
    %211 = arith.mulf %208, %210 : vector<4x256xf32>
    %c5_33 = arith.constant 5 : index
    %c0_34 = arith.constant 0 : index
    %c0_35 = arith.constant 0 : index
    %212 = vector.load %arg5[%c5_33, %c0_34, %c0_35] : memref<9x4x4xf32, #tpu.memory_space<vmem>>, vector<1x4x4xf32>
    %213 = vector.shape_cast %212 : vector<1x4x4xf32> to vector<4x4xf32>
    %214 = vector.extract_strided_slice %213 {offsets = [0, 0], sizes = [4, 1], strides = [1, 1]} : vector<4x4xf32> to vector<4x1xf32>
    %215 = vector.extract_strided_slice %211 {offsets = [0, 0], sizes = [1, 256], strides = [1, 1]} : vector<4x256xf32> to vector<1x256xf32>
    %216 = vector.broadcast %214 : vector<4x1xf32> to vector<4x256xf32>
    %217 = vector.broadcast %215 : vector<1x256xf32> to vector<4x256xf32>
    %218 = arith.mulf %216, %217 : vector<4x256xf32>
    %219 = vector.extract_strided_slice %213 {offsets = [0, 1], sizes = [4, 1], strides = [1, 1]} : vector<4x4xf32> to vector<4x1xf32>
    %220 = vector.extract_strided_slice %211 {offsets = [1, 0], sizes = [1, 256], strides = [1, 1]} : vector<4x256xf32> to vector<1x256xf32>
    %221 = vector.broadcast %219 : vector<4x1xf32> to vector<4x256xf32>
    %222 = vector.broadcast %220 : vector<1x256xf32> to vector<4x256xf32>
    %223 = arith.mulf %221, %222 : vector<4x256xf32>
    %224 = arith.addf %218, %223 : vector<4x256xf32>
    %225 = vector.extract_strided_slice %213 {offsets = [0, 2], sizes = [4, 1], strides = [1, 1]} : vector<4x4xf32> to vector<4x1xf32>
    %226 = vector.extract_strided_slice %211 {offsets = [2, 0], sizes = [1, 256], strides = [1, 1]} : vector<4x256xf32> to vector<1x256xf32>
    %227 = vector.broadcast %225 : vector<4x1xf32> to vector<4x256xf32>
    %228 = vector.broadcast %226 : vector<1x256xf32> to vector<4x256xf32>
    %229 = arith.mulf %227, %228 : vector<4x256xf32>
    %230 = arith.addf %224, %229 : vector<4x256xf32>
    %231 = vector.extract_strided_slice %213 {offsets = [0, 3], sizes = [4, 1], strides = [1, 1]} : vector<4x4xf32> to vector<4x1xf32>
    %232 = vector.extract_strided_slice %211 {offsets = [3, 0], sizes = [1, 256], strides = [1, 1]} : vector<4x256xf32> to vector<1x256xf32>
    %233 = vector.broadcast %231 : vector<4x1xf32> to vector<4x256xf32>
    %234 = vector.broadcast %232 : vector<1x256xf32> to vector<4x256xf32>
    %235 = arith.mulf %233, %234 : vector<4x256xf32>
    %236 = arith.addf %230, %235 : vector<4x256xf32>
    %237 = arith.addf %207, %236 : vector<4x256xf32>
    %c241_i32 = arith.constant 241 : i32
    %238 = tpu.dynamic_rotate %60 by %c241_i32 dim 1 : vector<4x256xf32>, i32 -> vector<4x256xf32>
    %c6 = arith.constant 6 : index
    %c0_36 = arith.constant 0 : index
    %239 = vector.load %arg2[%c6, %c0_36] : memref<9x256xf32, #tpu.memory_space<vmem>>, vector<1x256xf32>
    %240 = vector.broadcast %239 : vector<1x256xf32> to vector<4x256xf32>
    %241 = arith.mulf %238, %240 : vector<4x256xf32>
    %c6_37 = arith.constant 6 : index
    %c0_38 = arith.constant 0 : index
    %c0_39 = arith.constant 0 : index
    %242 = vector.load %arg5[%c6_37, %c0_38, %c0_39] : memref<9x4x4xf32, #tpu.memory_space<vmem>>, vector<1x4x4xf32>
    %243 = vector.shape_cast %242 : vector<1x4x4xf32> to vector<4x4xf32>
    %244 = vector.extract_strided_slice %243 {offsets = [0, 0], sizes = [4, 1], strides = [1, 1]} : vector<4x4xf32> to vector<4x1xf32>
    %245 = vector.extract_strided_slice %241 {offsets = [0, 0], sizes = [1, 256], strides = [1, 1]} : vector<4x256xf32> to vector<1x256xf32>
    %246 = vector.broadcast %244 : vector<4x1xf32> to vector<4x256xf32>
    %247 = vector.broadcast %245 : vector<1x256xf32> to vector<4x256xf32>
    %248 = arith.mulf %246, %247 : vector<4x256xf32>
    %249 = vector.extract_strided_slice %243 {offsets = [0, 1], sizes = [4, 1], strides = [1, 1]} : vector<4x4xf32> to vector<4x1xf32>
    %250 = vector.extract_strided_slice %241 {offsets = [1, 0], sizes = [1, 256], strides = [1, 1]} : vector<4x256xf32> to vector<1x256xf32>
    %251 = vector.broadcast %249 : vector<4x1xf32> to vector<4x256xf32>
    %252 = vector.broadcast %250 : vector<1x256xf32> to vector<4x256xf32>
    %253 = arith.mulf %251, %252 : vector<4x256xf32>
    %254 = arith.addf %248, %253 : vector<4x256xf32>
    %255 = vector.extract_strided_slice %243 {offsets = [0, 2], sizes = [4, 1], strides = [1, 1]} : vector<4x4xf32> to vector<4x1xf32>
    %256 = vector.extract_strided_slice %241 {offsets = [2, 0], sizes = [1, 256], strides = [1, 1]} : vector<4x256xf32> to vector<1x256xf32>
    %257 = vector.broadcast %255 : vector<4x1xf32> to vector<4x256xf32>
    %258 = vector.broadcast %256 : vector<1x256xf32> to vector<4x256xf32>
    %259 = arith.mulf %257, %258 : vector<4x256xf32>
    %260 = arith.addf %254, %259 : vector<4x256xf32>
    %261 = vector.extract_strided_slice %243 {offsets = [0, 3], sizes = [4, 1], strides = [1, 1]} : vector<4x4xf32> to vector<4x1xf32>
    %262 = vector.extract_strided_slice %241 {offsets = [3, 0], sizes = [1, 256], strides = [1, 1]} : vector<4x256xf32> to vector<1x256xf32>
    %263 = vector.broadcast %261 : vector<4x1xf32> to vector<4x256xf32>
    %264 = vector.broadcast %262 : vector<1x256xf32> to vector<4x256xf32>
    %265 = arith.mulf %263, %264 : vector<4x256xf32>
    %266 = arith.addf %260, %265 : vector<4x256xf32>
    %267 = arith.addf %237, %266 : vector<4x256xf32>
    %c240_i32 = arith.constant 240 : i32
    %268 = tpu.dynamic_rotate %60 by %c240_i32 dim 1 : vector<4x256xf32>, i32 -> vector<4x256xf32>
    %c7 = arith.constant 7 : index
    %c0_40 = arith.constant 0 : index
    %269 = vector.load %arg2[%c7, %c0_40] : memref<9x256xf32, #tpu.memory_space<vmem>>, vector<1x256xf32>
    %270 = vector.broadcast %269 : vector<1x256xf32> to vector<4x256xf32>
    %271 = arith.mulf %268, %270 : vector<4x256xf32>
    %c7_41 = arith.constant 7 : index
    %c0_42 = arith.constant 0 : index
    %c0_43 = arith.constant 0 : index
    %272 = vector.load %arg5[%c7_41, %c0_42, %c0_43] : memref<9x4x4xf32, #tpu.memory_space<vmem>>, vector<1x4x4xf32>
    %273 = vector.shape_cast %272 : vector<1x4x4xf32> to vector<4x4xf32>
    %274 = vector.extract_strided_slice %273 {offsets = [0, 0], sizes = [4, 1], strides = [1, 1]} : vector<4x4xf32> to vector<4x1xf32>
    %275 = vector.extract_strided_slice %271 {offsets = [0, 0], sizes = [1, 256], strides = [1, 1]} : vector<4x256xf32> to vector<1x256xf32>
    %276 = vector.broadcast %274 : vector<4x1xf32> to vector<4x256xf32>
    %277 = vector.broadcast %275 : vector<1x256xf32> to vector<4x256xf32>
    %278 = arith.mulf %276, %277 : vector<4x256xf32>
    %279 = vector.extract_strided_slice %273 {offsets = [0, 1], sizes = [4, 1], strides = [1, 1]} : vector<4x4xf32> to vector<4x1xf32>
    %280 = vector.extract_strided_slice %271 {offsets = [1, 0], sizes = [1, 256], strides = [1, 1]} : vector<4x256xf32> to vector<1x256xf32>
    %281 = vector.broadcast %279 : vector<4x1xf32> to vector<4x256xf32>
    %282 = vector.broadcast %280 : vector<1x256xf32> to vector<4x256xf32>
    %283 = arith.mulf %281, %282 : vector<4x256xf32>
    %284 = arith.addf %278, %283 : vector<4x256xf32>
    %285 = vector.extract_strided_slice %273 {offsets = [0, 2], sizes = [4, 1], strides = [1, 1]} : vector<4x4xf32> to vector<4x1xf32>
    %286 = vector.extract_strided_slice %271 {offsets = [2, 0], sizes = [1, 256], strides = [1, 1]} : vector<4x256xf32> to vector<1x256xf32>
    %287 = vector.broadcast %285 : vector<4x1xf32> to vector<4x256xf32>
    %288 = vector.broadcast %286 : vector<1x256xf32> to vector<4x256xf32>
    %289 = arith.mulf %287, %288 : vector<4x256xf32>
    %290 = arith.addf %284, %289 : vector<4x256xf32>
    %291 = vector.extract_strided_slice %273 {offsets = [0, 3], sizes = [4, 1], strides = [1, 1]} : vector<4x4xf32> to vector<4x1xf32>
    %292 = vector.extract_strided_slice %271 {offsets = [3, 0], sizes = [1, 256], strides = [1, 1]} : vector<4x256xf32> to vector<1x256xf32>
    %293 = vector.broadcast %291 : vector<4x1xf32> to vector<4x256xf32>
    %294 = vector.broadcast %292 : vector<1x256xf32> to vector<4x256xf32>
    %295 = arith.mulf %293, %294 : vector<4x256xf32>
    %296 = arith.addf %290, %295 : vector<4x256xf32>
    %297 = arith.addf %267, %296 : vector<4x256xf32>
    %c239_i32 = arith.constant 239 : i32
    %298 = tpu.dynamic_rotate %60 by %c239_i32 dim 1 : vector<4x256xf32>, i32 -> vector<4x256xf32>
    %c8 = arith.constant 8 : index
    %c0_44 = arith.constant 0 : index
    %299 = vector.load %arg2[%c8, %c0_44] : memref<9x256xf32, #tpu.memory_space<vmem>>, vector<1x256xf32>
    %300 = vector.broadcast %299 : vector<1x256xf32> to vector<4x256xf32>
    %301 = arith.mulf %298, %300 : vector<4x256xf32>
    %c8_45 = arith.constant 8 : index
    %c0_46 = arith.constant 0 : index
    %c0_47 = arith.constant 0 : index
    %302 = vector.load %arg5[%c8_45, %c0_46, %c0_47] : memref<9x4x4xf32, #tpu.memory_space<vmem>>, vector<1x4x4xf32>
    %303 = vector.shape_cast %302 : vector<1x4x4xf32> to vector<4x4xf32>
    %304 = vector.extract_strided_slice %303 {offsets = [0, 0], sizes = [4, 1], strides = [1, 1]} : vector<4x4xf32> to vector<4x1xf32>
    %305 = vector.extract_strided_slice %301 {offsets = [0, 0], sizes = [1, 256], strides = [1, 1]} : vector<4x256xf32> to vector<1x256xf32>
    %306 = vector.broadcast %304 : vector<4x1xf32> to vector<4x256xf32>
    %307 = vector.broadcast %305 : vector<1x256xf32> to vector<4x256xf32>
    %308 = arith.mulf %306, %307 : vector<4x256xf32>
    %309 = vector.extract_strided_slice %303 {offsets = [0, 1], sizes = [4, 1], strides = [1, 1]} : vector<4x4xf32> to vector<4x1xf32>
    %310 = vector.extract_strided_slice %301 {offsets = [1, 0], sizes = [1, 256], strides = [1, 1]} : vector<4x256xf32> to vector<1x256xf32>
    %311 = vector.broadcast %309 : vector<4x1xf32> to vector<4x256xf32>
    %312 = vector.broadcast %310 : vector<1x256xf32> to vector<4x256xf32>
    %313 = arith.mulf %311, %312 : vector<4x256xf32>
    %314 = arith.addf %308, %313 : vector<4x256xf32>
    %315 = vector.extract_strided_slice %303 {offsets = [0, 2], sizes = [4, 1], strides = [1, 1]} : vector<4x4xf32> to vector<4x1xf32>
    %316 = vector.extract_strided_slice %301 {offsets = [2, 0], sizes = [1, 256], strides = [1, 1]} : vector<4x256xf32> to vector<1x256xf32>
    %317 = vector.broadcast %315 : vector<4x1xf32> to vector<4x256xf32>
    %318 = vector.broadcast %316 : vector<1x256xf32> to vector<4x256xf32>
    %319 = arith.mulf %317, %318 : vector<4x256xf32>
    %320 = arith.addf %314, %319 : vector<4x256xf32>
    %321 = vector.extract_strided_slice %303 {offsets = [0, 3], sizes = [4, 1], strides = [1, 1]} : vector<4x4xf32> to vector<4x1xf32>
    %322 = vector.extract_strided_slice %301 {offsets = [3, 0], sizes = [1, 256], strides = [1, 1]} : vector<4x256xf32> to vector<1x256xf32>
    %323 = vector.broadcast %321 : vector<4x1xf32> to vector<4x256xf32>
    %324 = vector.broadcast %322 : vector<1x256xf32> to vector<4x256xf32>
    %325 = arith.mulf %323, %324 : vector<4x256xf32>
    %326 = arith.addf %320, %325 : vector<4x256xf32>
    %327 = arith.addf %297, %326 : vector<4x256xf32>
    %cst_48 = arith.constant 0.000000e+00 : f32
    %328 = vector.broadcast %cst_48 : f32 to vector<4x256xf32>
    %329 = arith.cmpf oge, %327, %328 : vector<4x256xf32>
    %cst_49 = arith.constant 0.00999999977 : f32
    %330 = vector.broadcast %cst_49 : f32 to vector<4x256xf32>
    %331 = arith.mulf %327, %330 : vector<4x256xf32>
    %332 = arith.select %329, %327, %331 : vector<4x256xi1>, vector<4x256xf32>
    %333 = vector.extract_strided_slice %3 {offsets = [0, 0], sizes = [8, 1], strides = [1, 1]} : vector<8x4xf32> to vector<8x1xf32>
    %334 = vector.extract_strided_slice %332 {offsets = [0, 0], sizes = [1, 256], strides = [1, 1]} : vector<4x256xf32> to vector<1x256xf32>
    %335 = vector.broadcast %333 : vector<8x1xf32> to vector<8x256xf32>
    %336 = vector.broadcast %334 : vector<1x256xf32> to vector<8x256xf32>
    %337 = arith.mulf %335, %336 : vector<8x256xf32>
    %338 = vector.extract_strided_slice %3 {offsets = [0, 1], sizes = [8, 1], strides = [1, 1]} : vector<8x4xf32> to vector<8x1xf32>
    %339 = vector.extract_strided_slice %332 {offsets = [1, 0], sizes = [1, 256], strides = [1, 1]} : vector<4x256xf32> to vector<1x256xf32>
    %340 = vector.broadcast %338 : vector<8x1xf32> to vector<8x256xf32>
    %341 = vector.broadcast %339 : vector<1x256xf32> to vector<8x256xf32>
    %342 = arith.mulf %340, %341 : vector<8x256xf32>
    %343 = arith.addf %337, %342 : vector<8x256xf32>
    %344 = vector.extract_strided_slice %3 {offsets = [0, 2], sizes = [8, 1], strides = [1, 1]} : vector<8x4xf32> to vector<8x1xf32>
    %345 = vector.extract_strided_slice %332 {offsets = [2, 0], sizes = [1, 256], strides = [1, 1]} : vector<4x256xf32> to vector<1x256xf32>
    %346 = vector.broadcast %344 : vector<8x1xf32> to vector<8x256xf32>
    %347 = vector.broadcast %345 : vector<1x256xf32> to vector<8x256xf32>
    %348 = arith.mulf %346, %347 : vector<8x256xf32>
    %349 = arith.addf %343, %348 : vector<8x256xf32>
    %350 = vector.extract_strided_slice %3 {offsets = [0, 3], sizes = [8, 1], strides = [1, 1]} : vector<8x4xf32> to vector<8x1xf32>
    %351 = vector.extract_strided_slice %332 {offsets = [3, 0], sizes = [1, 256], strides = [1, 1]} : vector<4x256xf32> to vector<1x256xf32>
    %352 = vector.broadcast %350 : vector<8x1xf32> to vector<8x256xf32>
    %353 = vector.broadcast %351 : vector<1x256xf32> to vector<8x256xf32>
    %354 = arith.mulf %352, %353 : vector<8x256xf32>
    %355 = arith.addf %349, %354 : vector<8x256xf32>
    %356 = vector.broadcast %4 : vector<8x1xf32> to vector<8x256xf32>
    %357 = arith.addf %355, %356 : vector<8x256xf32>
    %cst_50 = arith.constant 0.000000e+00 : f32
    %358 = vector.broadcast %cst_50 : f32 to vector<8x256xf32>
    %359 = arith.cmpf oge, %357, %358 : vector<8x256xf32>
    %cst_51 = arith.constant 0.00999999977 : f32
    %360 = vector.broadcast %cst_51 : f32 to vector<8x256xf32>
    %361 = arith.mulf %357, %360 : vector<8x256xf32>
    %362 = arith.select %359, %357, %361 : vector<8x256xi1>, vector<8x256xf32>
    %363 = arith.addf %362, %6 : vector<8x256xf32>
    %c0_52 = arith.constant 0 : index
    %c0_53 = arith.constant 0 : index
    %c0_54 = arith.constant 0 : index
    %364 = vector.load %arg9[%c0_52, %c0_53, %c0_54] : memref<2x8x256xf32, #tpu.memory_space<vmem>>, vector<1x8x256xf32>
    %365 = vector.shape_cast %364 : vector<1x8x256xf32> to vector<8x256xf32>
    %366 = vector.shape_cast %363 : vector<8x256xf32> to vector<1x8x256xf32>
    tpu.vector_store %arg9[%c0_52, %c0_53, %c0_54], %366 {strides = array<i32>} : memref<2x8x256xf32, #tpu.memory_space<vmem>>, vector<1x8x256xf32>,
    %c1_55 = arith.constant 1 : index
    %c0_56 = arith.constant 0 : index
    %c0_57 = arith.constant 0 : index
    %367 = vector.load %arg1[%c1_55, %c0_56, %c0_57] : memref<2x8x256xf32, #tpu.memory_space<vmem>>, vector<1x8x256xf32>
    %368 = vector.shape_cast %367 : vector<1x8x256xf32> to vector<8x256xf32>
    %369 = vector.extract_strided_slice %0 {offsets = [0, 0], sizes = [4, 1], strides = [1, 1]} : vector<4x8xf32> to vector<4x1xf32>
    %370 = vector.extract_strided_slice %368 {offsets = [0, 0], sizes = [1, 256], strides = [1, 1]} : vector<8x256xf32> to vector<1x256xf32>
    %371 = vector.broadcast %369 : vector<4x1xf32> to vector<4x256xf32>
    %372 = vector.broadcast %370 : vector<1x256xf32> to vector<4x256xf32>
    %373 = arith.mulf %371, %372 : vector<4x256xf32>
    %374 = vector.extract_strided_slice %0 {offsets = [0, 1], sizes = [4, 1], strides = [1, 1]} : vector<4x8xf32> to vector<4x1xf32>
    %375 = vector.extract_strided_slice %368 {offsets = [1, 0], sizes = [1, 256], strides = [1, 1]} : vector<8x256xf32> to vector<1x256xf32>
    %376 = vector.broadcast %374 : vector<4x1xf32> to vector<4x256xf32>
    %377 = vector.broadcast %375 : vector<1x256xf32> to vector<4x256xf32>
    %378 = arith.mulf %376, %377 : vector<4x256xf32>
    %379 = arith.addf %373, %378 : vector<4x256xf32>
    %380 = vector.extract_strided_slice %0 {offsets = [0, 2], sizes = [4, 1], strides = [1, 1]} : vector<4x8xf32> to vector<4x1xf32>
    %381 = vector.extract_strided_slice %368 {offsets = [2, 0], sizes = [1, 256], strides = [1, 1]} : vector<8x256xf32> to vector<1x256xf32>
    %382 = vector.broadcast %380 : vector<4x1xf32> to vector<4x256xf32>
    %383 = vector.broadcast %381 : vector<1x256xf32> to vector<4x256xf32>
    %384 = arith.mulf %382, %383 : vector<4x256xf32>
    %385 = arith.addf %379, %384 : vector<4x256xf32>
    %386 = vector.extract_strided_slice %0 {offsets = [0, 3], sizes = [4, 1], strides = [1, 1]} : vector<4x8xf32> to vector<4x1xf32>
    %387 = vector.extract_strided_slice %368 {offsets = [3, 0], sizes = [1, 256], strides = [1, 1]} : vector<8x256xf32> to vector<1x256xf32>
    %388 = vector.broadcast %386 : vector<4x1xf32> to vector<4x256xf32>
    %389 = vector.broadcast %387 : vector<1x256xf32> to vector<4x256xf32>
    %390 = arith.mulf %388, %389 : vector<4x256xf32>
    %391 = arith.addf %385, %390 : vector<4x256xf32>
    %392 = vector.extract_strided_slice %0 {offsets = [0, 4], sizes = [4, 1], strides = [1, 1]} : vector<4x8xf32> to vector<4x1xf32>
    %393 = vector.extract_strided_slice %368 {offsets = [4, 0], sizes = [1, 256], strides = [1, 1]} : vector<8x256xf32> to vector<1x256xf32>
    %394 = vector.broadcast %392 : vector<4x1xf32> to vector<4x256xf32>
    %395 = vector.broadcast %393 : vector<1x256xf32> to vector<4x256xf32>
    %396 = arith.mulf %394, %395 : vector<4x256xf32>
    %397 = arith.addf %391, %396 : vector<4x256xf32>
    %398 = vector.extract_strided_slice %0 {offsets = [0, 5], sizes = [4, 1], strides = [1, 1]} : vector<4x8xf32> to vector<4x1xf32>
    %399 = vector.extract_strided_slice %368 {offsets = [5, 0], sizes = [1, 256], strides = [1, 1]} : vector<8x256xf32> to vector<1x256xf32>
    %400 = vector.broadcast %398 : vector<4x1xf32> to vector<4x256xf32>
    %401 = vector.broadcast %399 : vector<1x256xf32> to vector<4x256xf32>
    %402 = arith.mulf %400, %401 : vector<4x256xf32>
    %403 = arith.addf %397, %402 : vector<4x256xf32>
    %404 = vector.extract_strided_slice %0 {offsets = [0, 6], sizes = [4, 1], strides = [1, 1]} : vector<4x8xf32> to vector<4x1xf32>
    %405 = vector.extract_strided_slice %368 {offsets = [6, 0], sizes = [1, 256], strides = [1, 1]} : vector<8x256xf32> to vector<1x256xf32>
    %406 = vector.broadcast %404 : vector<4x1xf32> to vector<4x256xf32>
    %407 = vector.broadcast %405 : vector<1x256xf32> to vector<4x256xf32>
    %408 = arith.mulf %406, %407 : vector<4x256xf32>
    %409 = arith.addf %403, %408 : vector<4x256xf32>
    %410 = vector.extract_strided_slice %0 {offsets = [0, 7], sizes = [4, 1], strides = [1, 1]} : vector<4x8xf32> to vector<4x1xf32>
    %411 = vector.extract_strided_slice %368 {offsets = [7, 0], sizes = [1, 256], strides = [1, 1]} : vector<8x256xf32> to vector<1x256xf32>
    %412 = vector.broadcast %410 : vector<4x1xf32> to vector<4x256xf32>
    %413 = vector.broadcast %411 : vector<1x256xf32> to vector<4x256xf32>
    %414 = arith.mulf %412, %413 : vector<4x256xf32>
    %415 = arith.addf %409, %414 : vector<4x256xf32>
    %416 = vector.broadcast %1 : vector<4x1xf32> to vector<4x256xf32>
    %417 = arith.addf %415, %416 : vector<4x256xf32>
    %cst_58 = arith.constant 0.000000e+00 : f32
    %418 = vector.broadcast %cst_58 : f32 to vector<4x256xf32>
    %419 = arith.cmpf oge, %417, %418 : vector<4x256xf32>
    %cst_59 = arith.constant 0.00999999977 : f32
    %420 = vector.broadcast %cst_59 : f32 to vector<4x256xf32>
    %421 = arith.mulf %417, %420 : vector<4x256xf32>
    %422 = arith.select %419, %417, %421 : vector<4x256xi1>, vector<4x256xf32>
    %c4_60 = arith.constant 4 : index
    %c0_61 = arith.constant 0 : index
    %c0_62 = arith.constant 0 : index
    %423 = vector.load %arg5[%c4_60, %c0_61, %c0_62] : memref<9x4x4xf32, #tpu.memory_space<vmem>>, vector<1x4x4xf32>
    %424 = vector.shape_cast %423 : vector<1x4x4xf32> to vector<4x4xf32>
    %425 = vector.extract_strided_slice %424 {offsets = [0, 0], sizes = [4, 1], strides = [1, 1]} : vector<4x4xf32> to vector<4x1xf32>
    %426 = vector.extract_strided_slice %422 {offsets = [0, 0], sizes = [1, 256], strides = [1, 1]} : vector<4x256xf32> to vector<1x256xf32>
    %427 = vector.broadcast %425 : vector<4x1xf32> to vector<4x256xf32>
    %428 = vector.broadcast %426 : vector<1x256xf32> to vector<4x256xf32>
    %429 = arith.mulf %427, %428 : vector<4x256xf32>
    %430 = vector.extract_strided_slice %424 {offsets = [0, 1], sizes = [4, 1], strides = [1, 1]} : vector<4x4xf32> to vector<4x1xf32>
    %431 = vector.extract_strided_slice %422 {offsets = [1, 0], sizes = [1, 256], strides = [1, 1]} : vector<4x256xf32> to vector<1x256xf32>
    %432 = vector.broadcast %430 : vector<4x1xf32> to vector<4x256xf32>
    %433 = vector.broadcast %431 : vector<1x256xf32> to vector<4x256xf32>
    %434 = arith.mulf %432, %433 : vector<4x256xf32>
    %435 = arith.addf %429, %434 : vector<4x256xf32>
    %436 = vector.extract_strided_slice %424 {offsets = [0, 2], sizes = [4, 1], strides = [1, 1]} : vector<4x4xf32> to vector<4x1xf32>
    %437 = vector.extract_strided_slice %422 {offsets = [2, 0], sizes = [1, 256], strides = [1, 1]} : vector<4x256xf32> to vector<1x256xf32>
    %438 = vector.broadcast %436 : vector<4x1xf32> to vector<4x256xf32>
    %439 = vector.broadcast %437 : vector<1x256xf32> to vector<4x256xf32>
    %440 = arith.mulf %438, %439 : vector<4x256xf32>
    %441 = arith.addf %435, %440 : vector<4x256xf32>
    %442 = vector.extract_strided_slice %424 {offsets = [0, 3], sizes = [4, 1], strides = [1, 1]} : vector<4x4xf32> to vector<4x1xf32>
    %443 = vector.extract_strided_slice %422 {offsets = [3, 0], sizes = [1, 256], strides = [1, 1]} : vector<4x256xf32> to vector<1x256xf32>
    %444 = vector.broadcast %442 : vector<4x1xf32> to vector<4x256xf32>
    %445 = vector.broadcast %443 : vector<1x256xf32> to vector<4x256xf32>
    %446 = arith.mulf %444, %445 : vector<4x256xf32>
    %447 = arith.addf %441, %446 : vector<4x256xf32>
    %448 = vector.broadcast %2 : vector<4x1xf32> to vector<4x256xf32>
    %449 = arith.addf %447, %448 : vector<4x256xf32>
    %c17_i32_63 = arith.constant 17 : i32
    %450 = tpu.dynamic_rotate %422 by %c17_i32_63 dim 1 : vector<4x256xf32>, i32 -> vector<4x256xf32>
    %c0_64 = arith.constant 0 : index
    %c0_65 = arith.constant 0 : index
    %451 = vector.load %arg2[%c0_64, %c0_65] : memref<9x256xf32, #tpu.memory_space<vmem>>, vector<1x256xf32>
    %452 = vector.broadcast %451 : vector<1x256xf32> to vector<4x256xf32>
    %453 = arith.mulf %450, %452 : vector<4x256xf32>
    %c0_66 = arith.constant 0 : index
    %c0_67 = arith.constant 0 : index
    %c0_68 = arith.constant 0 : index
    %454 = vector.load %arg5[%c0_66, %c0_67, %c0_68] : memref<9x4x4xf32, #tpu.memory_space<vmem>>, vector<1x4x4xf32>
    %455 = vector.shape_cast %454 : vector<1x4x4xf32> to vector<4x4xf32>
    %456 = vector.extract_strided_slice %455 {offsets = [0, 0], sizes = [4, 1], strides = [1, 1]} : vector<4x4xf32> to vector<4x1xf32>
    %457 = vector.extract_strided_slice %453 {offsets = [0, 0], sizes = [1, 256], strides = [1, 1]} : vector<4x256xf32> to vector<1x256xf32>
    %458 = vector.broadcast %456 : vector<4x1xf32> to vector<4x256xf32>
    %459 = vector.broadcast %457 : vector<1x256xf32> to vector<4x256xf32>
    %460 = arith.mulf %458, %459 : vector<4x256xf32>
    %461 = vector.extract_strided_slice %455 {offsets = [0, 1], sizes = [4, 1], strides = [1, 1]} : vector<4x4xf32> to vector<4x1xf32>
    %462 = vector.extract_strided_slice %453 {offsets = [1, 0], sizes = [1, 256], strides = [1, 1]} : vector<4x256xf32> to vector<1x256xf32>
    %463 = vector.broadcast %461 : vector<4x1xf32> to vector<4x256xf32>
    %464 = vector.broadcast %462 : vector<1x256xf32> to vector<4x256xf32>
    %465 = arith.mulf %463, %464 : vector<4x256xf32>
    %466 = arith.addf %460, %465 : vector<4x256xf32>
    %467 = vector.extract_strided_slice %455 {offsets = [0, 2], sizes = [4, 1], strides = [1, 1]} : vector<4x4xf32> to vector<4x1xf32>
    %468 = vector.extract_strided_slice %453 {offsets = [2, 0], sizes = [1, 256], strides = [1, 1]} : vector<4x256xf32> to vector<1x256xf32>
    %469 = vector.broadcast %467 : vector<4x1xf32> to vector<4x256xf32>
    %470 = vector.broadcast %468 : vector<1x256xf32> to vector<4x256xf32>
    %471 = arith.mulf %469, %470 : vector<4x256xf32>
    %472 = arith.addf %466, %471 : vector<4x256xf32>
    %473 = vector.extract_strided_slice %455 {offsets = [0, 3], sizes = [4, 1], strides = [1, 1]} : vector<4x4xf32> to vector<4x1xf32>
    %474 = vector.extract_strided_slice %453 {offsets = [3, 0], sizes = [1, 256], strides = [1, 1]} : vector<4x256xf32> to vector<1x256xf32>
    %475 = vector.broadcast %473 : vector<4x1xf32> to vector<4x256xf32>
    %476 = vector.broadcast %474 : vector<1x256xf32> to vector<4x256xf32>
    %477 = arith.mulf %475, %476 : vector<4x256xf32>
    %478 = arith.addf %472, %477 : vector<4x256xf32>
    %479 = arith.addf %449, %478 : vector<4x256xf32>
    %c16_i32_69 = arith.constant 16 : i32
    %480 = tpu.dynamic_rotate %422 by %c16_i32_69 dim 1 : vector<4x256xf32>, i32 -> vector<4x256xf32>
    %c1_70 = arith.constant 1 : index
    %c0_71 = arith.constant 0 : index
    %481 = vector.load %arg2[%c1_70, %c0_71] : memref<9x256xf32, #tpu.memory_space<vmem>>, vector<1x256xf32>
    %482 = vector.broadcast %481 : vector<1x256xf32> to vector<4x256xf32>
    %483 = arith.mulf %480, %482 : vector<4x256xf32>
    %c1_72 = arith.constant 1 : index
    %c0_73 = arith.constant 0 : index
    %c0_74 = arith.constant 0 : index
    %484 = vector.load %arg5[%c1_72, %c0_73, %c0_74] : memref<9x4x4xf32, #tpu.memory_space<vmem>>, vector<1x4x4xf32>
    %485 = vector.shape_cast %484 : vector<1x4x4xf32> to vector<4x4xf32>
    %486 = vector.extract_strided_slice %485 {offsets = [0, 0], sizes = [4, 1], strides = [1, 1]} : vector<4x4xf32> to vector<4x1xf32>
    %487 = vector.extract_strided_slice %483 {offsets = [0, 0], sizes = [1, 256], strides = [1, 1]} : vector<4x256xf32> to vector<1x256xf32>
    %488 = vector.broadcast %486 : vector<4x1xf32> to vector<4x256xf32>
    %489 = vector.broadcast %487 : vector<1x256xf32> to vector<4x256xf32>
    %490 = arith.mulf %488, %489 : vector<4x256xf32>
    %491 = vector.extract_strided_slice %485 {offsets = [0, 1], sizes = [4, 1], strides = [1, 1]} : vector<4x4xf32> to vector<4x1xf32>
    %492 = vector.extract_strided_slice %483 {offsets = [1, 0], sizes = [1, 256], strides = [1, 1]} : vector<4x256xf32> to vector<1x256xf32>
    %493 = vector.broadcast %491 : vector<4x1xf32> to vector<4x256xf32>
    %494 = vector.broadcast %492 : vector<1x256xf32> to vector<4x256xf32>
    %495 = arith.mulf %493, %494 : vector<4x256xf32>
    %496 = arith.addf %490, %495 : vector<4x256xf32>
    %497 = vector.extract_strided_slice %485 {offsets = [0, 2], sizes = [4, 1], strides = [1, 1]} : vector<4x4xf32> to vector<4x1xf32>
    %498 = vector.extract_strided_slice %483 {offsets = [2, 0], sizes = [1, 256], strides = [1, 1]} : vector<4x256xf32> to vector<1x256xf32>
    %499 = vector.broadcast %497 : vector<4x1xf32> to vector<4x256xf32>
    %500 = vector.broadcast %498 : vector<1x256xf32> to vector<4x256xf32>
    %501 = arith.mulf %499, %500 : vector<4x256xf32>
    %502 = arith.addf %496, %501 : vector<4x256xf32>
    %503 = vector.extract_strided_slice %485 {offsets = [0, 3], sizes = [4, 1], strides = [1, 1]} : vector<4x4xf32> to vector<4x1xf32>
    %504 = vector.extract_strided_slice %483 {offsets = [3, 0], sizes = [1, 256], strides = [1, 1]} : vector<4x256xf32> to vector<1x256xf32>
    %505 = vector.broadcast %503 : vector<4x1xf32> to vector<4x256xf32>
    %506 = vector.broadcast %504 : vector<1x256xf32> to vector<4x256xf32>
    %507 = arith.mulf %505, %506 : vector<4x256xf32>
    %508 = arith.addf %502, %507 : vector<4x256xf32>
    %509 = arith.addf %479, %508 : vector<4x256xf32>
    %c15_i32_75 = arith.constant 15 : i32
    %510 = tpu.dynamic_rotate %422 by %c15_i32_75 dim 1 : vector<4x256xf32>, i32 -> vector<4x256xf32>
    %c2_76 = arith.constant 2 : index
    %c0_77 = arith.constant 0 : index
    %511 = vector.load %arg2[%c2_76, %c0_77] : memref<9x256xf32, #tpu.memory_space<vmem>>, vector<1x256xf32>
    %512 = vector.broadcast %511 : vector<1x256xf32> to vector<4x256xf32>
    %513 = arith.mulf %510, %512 : vector<4x256xf32>
    %c2_78 = arith.constant 2 : index
    %c0_79 = arith.constant 0 : index
    %c0_80 = arith.constant 0 : index
    %514 = vector.load %arg5[%c2_78, %c0_79, %c0_80] : memref<9x4x4xf32, #tpu.memory_space<vmem>>, vector<1x4x4xf32>
    %515 = vector.shape_cast %514 : vector<1x4x4xf32> to vector<4x4xf32>
    %516 = vector.extract_strided_slice %515 {offsets = [0, 0], sizes = [4, 1], strides = [1, 1]} : vector<4x4xf32> to vector<4x1xf32>
    %517 = vector.extract_strided_slice %513 {offsets = [0, 0], sizes = [1, 256], strides = [1, 1]} : vector<4x256xf32> to vector<1x256xf32>
    %518 = vector.broadcast %516 : vector<4x1xf32> to vector<4x256xf32>
    %519 = vector.broadcast %517 : vector<1x256xf32> to vector<4x256xf32>
    %520 = arith.mulf %518, %519 : vector<4x256xf32>
    %521 = vector.extract_strided_slice %515 {offsets = [0, 1], sizes = [4, 1], strides = [1, 1]} : vector<4x4xf32> to vector<4x1xf32>
    %522 = vector.extract_strided_slice %513 {offsets = [1, 0], sizes = [1, 256], strides = [1, 1]} : vector<4x256xf32> to vector<1x256xf32>
    %523 = vector.broadcast %521 : vector<4x1xf32> to vector<4x256xf32>
    %524 = vector.broadcast %522 : vector<1x256xf32> to vector<4x256xf32>
    %525 = arith.mulf %523, %524 : vector<4x256xf32>
    %526 = arith.addf %520, %525 : vector<4x256xf32>
    %527 = vector.extract_strided_slice %515 {offsets = [0, 2], sizes = [4, 1], strides = [1, 1]} : vector<4x4xf32> to vector<4x1xf32>
    %528 = vector.extract_strided_slice %513 {offsets = [2, 0], sizes = [1, 256], strides = [1, 1]} : vector<4x256xf32> to vector<1x256xf32>
    %529 = vector.broadcast %527 : vector<4x1xf32> to vector<4x256xf32>
    %530 = vector.broadcast %528 : vector<1x256xf32> to vector<4x256xf32>
    %531 = arith.mulf %529, %530 : vector<4x256xf32>
    %532 = arith.addf %526, %531 : vector<4x256xf32>
    %533 = vector.extract_strided_slice %515 {offsets = [0, 3], sizes = [4, 1], strides = [1, 1]} : vector<4x4xf32> to vector<4x1xf32>
    %534 = vector.extract_strided_slice %513 {offsets = [3, 0], sizes = [1, 256], strides = [1, 1]} : vector<4x256xf32> to vector<1x256xf32>
    %535 = vector.broadcast %533 : vector<4x1xf32> to vector<4x256xf32>
    %536 = vector.broadcast %534 : vector<1x256xf32> to vector<4x256xf32>
    %537 = arith.mulf %535, %536 : vector<4x256xf32>
    %538 = arith.addf %532, %537 : vector<4x256xf32>
    %539 = arith.addf %509, %538 : vector<4x256xf32>
    %c1_i32_81 = arith.constant 1 : i32
    %540 = tpu.dynamic_rotate %422 by %c1_i32_81 dim 1 : vector<4x256xf32>, i32 -> vector<4x256xf32>
    %c3_82 = arith.constant 3 : index
    %c0_83 = arith.constant 0 : index
    %541 = vector.load %arg2[%c3_82, %c0_83] : memref<9x256xf32, #tpu.memory_space<vmem>>, vector<1x256xf32>
    %542 = vector.broadcast %541 : vector<1x256xf32> to vector<4x256xf32>
    %543 = arith.mulf %540, %542 : vector<4x256xf32>
    %c3_84 = arith.constant 3 : index
    %c0_85 = arith.constant 0 : index
    %c0_86 = arith.constant 0 : index
    %544 = vector.load %arg5[%c3_84, %c0_85, %c0_86] : memref<9x4x4xf32, #tpu.memory_space<vmem>>, vector<1x4x4xf32>
    %545 = vector.shape_cast %544 : vector<1x4x4xf32> to vector<4x4xf32>
    %546 = vector.extract_strided_slice %545 {offsets = [0, 0], sizes = [4, 1], strides = [1, 1]} : vector<4x4xf32> to vector<4x1xf32>
    %547 = vector.extract_strided_slice %543 {offsets = [0, 0], sizes = [1, 256], strides = [1, 1]} : vector<4x256xf32> to vector<1x256xf32>
    %548 = vector.broadcast %546 : vector<4x1xf32> to vector<4x256xf32>
    %549 = vector.broadcast %547 : vector<1x256xf32> to vector<4x256xf32>
    %550 = arith.mulf %548, %549 : vector<4x256xf32>
    %551 = vector.extract_strided_slice %545 {offsets = [0, 1], sizes = [4, 1], strides = [1, 1]} : vector<4x4xf32> to vector<4x1xf32>
    %552 = vector.extract_strided_slice %543 {offsets = [1, 0], sizes = [1, 256], strides = [1, 1]} : vector<4x256xf32> to vector<1x256xf32>
    %553 = vector.broadcast %551 : vector<4x1xf32> to vector<4x256xf32>
    %554 = vector.broadcast %552 : vector<1x256xf32> to vector<4x256xf32>
    %555 = arith.mulf %553, %554 : vector<4x256xf32>
    %556 = arith.addf %550, %555 : vector<4x256xf32>
    %557 = vector.extract_strided_slice %545 {offsets = [0, 2], sizes = [4, 1], strides = [1, 1]} : vector<4x4xf32> to vector<4x1xf32>
    %558 = vector.extract_strided_slice %543 {offsets = [2, 0], sizes = [1, 256], strides = [1, 1]} : vector<4x256xf32> to vector<1x256xf32>
    %559 = vector.broadcast %557 : vector<4x1xf32> to vector<4x256xf32>
    %560 = vector.broadcast %558 : vector<1x256xf32> to vector<4x256xf32>
    %561 = arith.mulf %559, %560 : vector<4x256xf32>
    %562 = arith.addf %556, %561 : vector<4x256xf32>
    %563 = vector.extract_strided_slice %545 {offsets = [0, 3], sizes = [4, 1], strides = [1, 1]} : vector<4x4xf32> to vector<4x1xf32>
    %564 = vector.extract_strided_slice %543 {offsets = [3, 0], sizes = [1, 256], strides = [1, 1]} : vector<4x256xf32> to vector<1x256xf32>
    %565 = vector.broadcast %563 : vector<4x1xf32> to vector<4x256xf32>
    %566 = vector.broadcast %564 : vector<1x256xf32> to vector<4x256xf32>
    %567 = arith.mulf %565, %566 : vector<4x256xf32>
    %568 = arith.addf %562, %567 : vector<4x256xf32>
    %569 = arith.addf %539, %568 : vector<4x256xf32>
    %c255_i32_87 = arith.constant 255 : i32
    %570 = tpu.dynamic_rotate %422 by %c255_i32_87 dim 1 : vector<4x256xf32>, i32 -> vector<4x256xf32>
    %c5_88 = arith.constant 5 : index
    %c0_89 = arith.constant 0 : index
    %571 = vector.load %arg2[%c5_88, %c0_89] : memref<9x256xf32, #tpu.memory_space<vmem>>, vector<1x256xf32>
    %572 = vector.broadcast %571 : vector<1x256xf32> to vector<4x256xf32>
    %573 = arith.mulf %570, %572 : vector<4x256xf32>
    %c5_90 = arith.constant 5 : index
    %c0_91 = arith.constant 0 : index
    %c0_92 = arith.constant 0 : index
    %574 = vector.load %arg5[%c5_90, %c0_91, %c0_92] : memref<9x4x4xf32, #tpu.memory_space<vmem>>, vector<1x4x4xf32>
    %575 = vector.shape_cast %574 : vector<1x4x4xf32> to vector<4x4xf32>
    %576 = vector.extract_strided_slice %575 {offsets = [0, 0], sizes = [4, 1], strides = [1, 1]} : vector<4x4xf32> to vector<4x1xf32>
    %577 = vector.extract_strided_slice %573 {offsets = [0, 0], sizes = [1, 256], strides = [1, 1]} : vector<4x256xf32> to vector<1x256xf32>
    %578 = vector.broadcast %576 : vector<4x1xf32> to vector<4x256xf32>
    %579 = vector.broadcast %577 : vector<1x256xf32> to vector<4x256xf32>
    %580 = arith.mulf %578, %579 : vector<4x256xf32>
    %581 = vector.extract_strided_slice %575 {offsets = [0, 1], sizes = [4, 1], strides = [1, 1]} : vector<4x4xf32> to vector<4x1xf32>
    %582 = vector.extract_strided_slice %573 {offsets = [1, 0], sizes = [1, 256], strides = [1, 1]} : vector<4x256xf32> to vector<1x256xf32>
    %583 = vector.broadcast %581 : vector<4x1xf32> to vector<4x256xf32>
    %584 = vector.broadcast %582 : vector<1x256xf32> to vector<4x256xf32>
    %585 = arith.mulf %583, %584 : vector<4x256xf32>
    %586 = arith.addf %580, %585 : vector<4x256xf32>
    %587 = vector.extract_strided_slice %575 {offsets = [0, 2], sizes = [4, 1], strides = [1, 1]} : vector<4x4xf32> to vector<4x1xf32>
    %588 = vector.extract_strided_slice %573 {offsets = [2, 0], sizes = [1, 256], strides = [1, 1]} : vector<4x256xf32> to vector<1x256xf32>
    %589 = vector.broadcast %587 : vector<4x1xf32> to vector<4x256xf32>
    %590 = vector.broadcast %588 : vector<1x256xf32> to vector<4x256xf32>
    %591 = arith.mulf %589, %590 : vector<4x256xf32>
    %592 = arith.addf %586, %591 : vector<4x256xf32>
    %593 = vector.extract_strided_slice %575 {offsets = [0, 3], sizes = [4, 1], strides = [1, 1]} : vector<4x4xf32> to vector<4x1xf32>
    %594 = vector.extract_strided_slice %573 {offsets = [3, 0], sizes = [1, 256], strides = [1, 1]} : vector<4x256xf32> to vector<1x256xf32>
    %595 = vector.broadcast %593 : vector<4x1xf32> to vector<4x256xf32>
    %596 = vector.broadcast %594 : vector<1x256xf32> to vector<4x256xf32>
    %597 = arith.mulf %595, %596 : vector<4x256xf32>
    %598 = arith.addf %592, %597 : vector<4x256xf32>
    %599 = arith.addf %569, %598 : vector<4x256xf32>
    %c241_i32_93 = arith.constant 241 : i32
    %600 = tpu.dynamic_rotate %422 by %c241_i32_93 dim 1 : vector<4x256xf32>, i32 -> vector<4x256xf32>
    %c6_94 = arith.constant 6 : index
    %c0_95 = arith.constant 0 : index
    %601 = vector.load %arg2[%c6_94, %c0_95] : memref<9x256xf32, #tpu.memory_space<vmem>>, vector<1x256xf32>
    %602 = vector.broadcast %601 : vector<1x256xf32> to vector<4x256xf32>
    %603 = arith.mulf %600, %602 : vector<4x256xf32>
    %c6_96 = arith.constant 6 : index
    %c0_97 = arith.constant 0 : index
    %c0_98 = arith.constant 0 : index
    %604 = vector.load %arg5[%c6_96, %c0_97, %c0_98] : memref<9x4x4xf32, #tpu.memory_space<vmem>>, vector<1x4x4xf32>
    %605 = vector.shape_cast %604 : vector<1x4x4xf32> to vector<4x4xf32>
    %606 = vector.extract_strided_slice %605 {offsets = [0, 0], sizes = [4, 1], strides = [1, 1]} : vector<4x4xf32> to vector<4x1xf32>
    %607 = vector.extract_strided_slice %603 {offsets = [0, 0], sizes = [1, 256], strides = [1, 1]} : vector<4x256xf32> to vector<1x256xf32>
    %608 = vector.broadcast %606 : vector<4x1xf32> to vector<4x256xf32>
    %609 = vector.broadcast %607 : vector<1x256xf32> to vector<4x256xf32>
    %610 = arith.mulf %608, %609 : vector<4x256xf32>
    %611 = vector.extract_strided_slice %605 {offsets = [0, 1], sizes = [4, 1], strides = [1, 1]} : vector<4x4xf32> to vector<4x1xf32>
    %612 = vector.extract_strided_slice %603 {offsets = [1, 0], sizes = [1, 256], strides = [1, 1]} : vector<4x256xf32> to vector<1x256xf32>
    %613 = vector.broadcast %611 : vector<4x1xf32> to vector<4x256xf32>
    %614 = vector.broadcast %612 : vector<1x256xf32> to vector<4x256xf32>
    %615 = arith.mulf %613, %614 : vector<4x256xf32>
    %616 = arith.addf %610, %615 : vector<4x256xf32>
    %617 = vector.extract_strided_slice %605 {offsets = [0, 2], sizes = [4, 1], strides = [1, 1]} : vector<4x4xf32> to vector<4x1xf32>
    %618 = vector.extract_strided_slice %603 {offsets = [2, 0], sizes = [1, 256], strides = [1, 1]} : vector<4x256xf32> to vector<1x256xf32>
    %619 = vector.broadcast %617 : vector<4x1xf32> to vector<4x256xf32>
    %620 = vector.broadcast %618 : vector<1x256xf32> to vector<4x256xf32>
    %621 = arith.mulf %619, %620 : vector<4x256xf32>
    %622 = arith.addf %616, %621 : vector<4x256xf32>
    %623 = vector.extract_strided_slice %605 {offsets = [0, 3], sizes = [4, 1], strides = [1, 1]} : vector<4x4xf32> to vector<4x1xf32>
    %624 = vector.extract_strided_slice %603 {offsets = [3, 0], sizes = [1, 256], strides = [1, 1]} : vector<4x256xf32> to vector<1x256xf32>
    %625 = vector.broadcast %623 : vector<4x1xf32> to vector<4x256xf32>
    %626 = vector.broadcast %624 : vector<1x256xf32> to vector<4x256xf32>
    %627 = arith.mulf %625, %626 : vector<4x256xf32>
    %628 = arith.addf %622, %627 : vector<4x256xf32>
    %629 = arith.addf %599, %628 : vector<4x256xf32>
    %c240_i32_99 = arith.constant 240 : i32
    %630 = tpu.dynamic_rotate %422 by %c240_i32_99 dim 1 : vector<4x256xf32>, i32 -> vector<4x256xf32>
    %c7_100 = arith.constant 7 : index
    %c0_101 = arith.constant 0 : index
    %631 = vector.load %arg2[%c7_100, %c0_101] : memref<9x256xf32, #tpu.memory_space<vmem>>, vector<1x256xf32>
    %632 = vector.broadcast %631 : vector<1x256xf32> to vector<4x256xf32>
    %633 = arith.mulf %630, %632 : vector<4x256xf32>
    %c7_102 = arith.constant 7 : index
    %c0_103 = arith.constant 0 : index
    %c0_104 = arith.constant 0 : index
    %634 = vector.load %arg5[%c7_102, %c0_103, %c0_104] : memref<9x4x4xf32, #tpu.memory_space<vmem>>, vector<1x4x4xf32>
    %635 = vector.shape_cast %634 : vector<1x4x4xf32> to vector<4x4xf32>
    %636 = vector.extract_strided_slice %635 {offsets = [0, 0], sizes = [4, 1], strides = [1, 1]} : vector<4x4xf32> to vector<4x1xf32>
    %637 = vector.extract_strided_slice %633 {offsets = [0, 0], sizes = [1, 256], strides = [1, 1]} : vector<4x256xf32> to vector<1x256xf32>
    %638 = vector.broadcast %636 : vector<4x1xf32> to vector<4x256xf32>
    %639 = vector.broadcast %637 : vector<1x256xf32> to vector<4x256xf32>
    %640 = arith.mulf %638, %639 : vector<4x256xf32>
    %641 = vector.extract_strided_slice %635 {offsets = [0, 1], sizes = [4, 1], strides = [1, 1]} : vector<4x4xf32> to vector<4x1xf32>
    %642 = vector.extract_strided_slice %633 {offsets = [1, 0], sizes = [1, 256], strides = [1, 1]} : vector<4x256xf32> to vector<1x256xf32>
    %643 = vector.broadcast %641 : vector<4x1xf32> to vector<4x256xf32>
    %644 = vector.broadcast %642 : vector<1x256xf32> to vector<4x256xf32>
    %645 = arith.mulf %643, %644 : vector<4x256xf32>
    %646 = arith.addf %640, %645 : vector<4x256xf32>
    %647 = vector.extract_strided_slice %635 {offsets = [0, 2], sizes = [4, 1], strides = [1, 1]} : vector<4x4xf32> to vector<4x1xf32>
    %648 = vector.extract_strided_slice %633 {offsets = [2, 0], sizes = [1, 256], strides = [1, 1]} : vector<4x256xf32> to vector<1x256xf32>
    %649 = vector.broadcast %647 : vector<4x1xf32> to vector<4x256xf32>
    %650 = vector.broadcast %648 : vector<1x256xf32> to vector<4x256xf32>
    %651 = arith.mulf %649, %650 : vector<4x256xf32>
    %652 = arith.addf %646, %651 : vector<4x256xf32>
    %653 = vector.extract_strided_slice %635 {offsets = [0, 3], sizes = [4, 1], strides = [1, 1]} : vector<4x4xf32> to vector<4x1xf32>
    %654 = vector.extract_strided_slice %633 {offsets = [3, 0], sizes = [1, 256], strides = [1, 1]} : vector<4x256xf32> to vector<1x256xf32>
    %655 = vector.broadcast %653 : vector<4x1xf32> to vector<4x256xf32>
    %656 = vector.broadcast %654 : vector<1x256xf32> to vector<4x256xf32>
    %657 = arith.mulf %655, %656 : vector<4x256xf32>
    %658 = arith.addf %652, %657 : vector<4x256xf32>
    %659 = arith.addf %629, %658 : vector<4x256xf32>
    %c239_i32_105 = arith.constant 239 : i32
    %660 = tpu.dynamic_rotate %422 by %c239_i32_105 dim 1 : vector<4x256xf32>, i32 -> vector<4x256xf32>
    %c8_106 = arith.constant 8 : index
    %c0_107 = arith.constant 0 : index
    %661 = vector.load %arg2[%c8_106, %c0_107] : memref<9x256xf32, #tpu.memory_space<vmem>>, vector<1x256xf32>
    %662 = vector.broadcast %661 : vector<1x256xf32> to vector<4x256xf32>
    %663 = arith.mulf %660, %662 : vector<4x256xf32>
    %c8_108 = arith.constant 8 : index
    %c0_109 = arith.constant 0 : index
    %c0_110 = arith.constant 0 : index
    %664 = vector.load %arg5[%c8_108, %c0_109, %c0_110] : memref<9x4x4xf32, #tpu.memory_space<vmem>>, vector<1x4x4xf32>
    %665 = vector.shape_cast %664 : vector<1x4x4xf32> to vector<4x4xf32>
    %666 = vector.extract_strided_slice %665 {offsets = [0, 0], sizes = [4, 1], strides = [1, 1]} : vector<4x4xf32> to vector<4x1xf32>
    %667 = vector.extract_strided_slice %663 {offsets = [0, 0], sizes = [1, 256], strides = [1, 1]} : vector<4x256xf32> to vector<1x256xf32>
    %668 = vector.broadcast %666 : vector<4x1xf32> to vector<4x256xf32>
    %669 = vector.broadcast %667 : vector<1x256xf32> to vector<4x256xf32>
    %670 = arith.mulf %668, %669 : vector<4x256xf32>
    %671 = vector.extract_strided_slice %665 {offsets = [0, 1], sizes = [4, 1], strides = [1, 1]} : vector<4x4xf32> to vector<4x1xf32>
    %672 = vector.extract_strided_slice %663 {offsets = [1, 0], sizes = [1, 256], strides = [1, 1]} : vector<4x256xf32> to vector<1x256xf32>
    %673 = vector.broadcast %671 : vector<4x1xf32> to vector<4x256xf32>
    %674 = vector.broadcast %672 : vector<1x256xf32> to vector<4x256xf32>
    %675 = arith.mulf %673, %674 : vector<4x256xf32>
    %676 = arith.addf %670, %675 : vector<4x256xf32>
    %677 = vector.extract_strided_slice %665 {offsets = [0, 2], sizes = [4, 1], strides = [1, 1]} : vector<4x4xf32> to vector<4x1xf32>
    %678 = vector.extract_strided_slice %663 {offsets = [2, 0], sizes = [1, 256], strides = [1, 1]} : vector<4x256xf32> to vector<1x256xf32>
    %679 = vector.broadcast %677 : vector<4x1xf32> to vector<4x256xf32>
    %680 = vector.broadcast %678 : vector<1x256xf32> to vector<4x256xf32>
    %681 = arith.mulf %679, %680 : vector<4x256xf32>
    %682 = arith.addf %676, %681 : vector<4x256xf32>
    %683 = vector.extract_strided_slice %665 {offsets = [0, 3], sizes = [4, 1], strides = [1, 1]} : vector<4x4xf32> to vector<4x1xf32>
    %684 = vector.extract_strided_slice %663 {offsets = [3, 0], sizes = [1, 256], strides = [1, 1]} : vector<4x256xf32> to vector<1x256xf32>
    %685 = vector.broadcast %683 : vector<4x1xf32> to vector<4x256xf32>
    %686 = vector.broadcast %684 : vector<1x256xf32> to vector<4x256xf32>
    %687 = arith.mulf %685, %686 : vector<4x256xf32>
    %688 = arith.addf %682, %687 : vector<4x256xf32>
    %689 = arith.addf %659, %688 : vector<4x256xf32>
    %cst_111 = arith.constant 0.000000e+00 : f32
    %690 = vector.broadcast %cst_111 : f32 to vector<4x256xf32>
    %691 = arith.cmpf oge, %689, %690 : vector<4x256xf32>
    %cst_112 = arith.constant 0.00999999977 : f32
    %692 = vector.broadcast %cst_112 : f32 to vector<4x256xf32>
    %693 = arith.mulf %689, %692 : vector<4x256xf32>
    %694 = arith.select %691, %689, %693 : vector<4x256xi1>, vector<4x256xf32>
    %695 = vector.extract_strided_slice %3 {offsets = [0, 0], sizes = [8, 1], strides = [1, 1]} : vector<8x4xf32> to vector<8x1xf32>
    %696 = vector.extract_strided_slice %694 {offsets = [0, 0], sizes = [1, 256], strides = [1, 1]} : vector<4x256xf32> to vector<1x256xf32>
    %697 = vector.broadcast %695 : vector<8x1xf32> to vector<8x256xf32>
    %698 = vector.broadcast %696 : vector<1x256xf32> to vector<8x256xf32>
    %699 = arith.mulf %697, %698 : vector<8x256xf32>
    %700 = vector.extract_strided_slice %3 {offsets = [0, 1], sizes = [8, 1], strides = [1, 1]} : vector<8x4xf32> to vector<8x1xf32>
    %701 = vector.extract_strided_slice %694 {offsets = [1, 0], sizes = [1, 256], strides = [1, 1]} : vector<4x256xf32> to vector<1x256xf32>
    %702 = vector.broadcast %700 : vector<8x1xf32> to vector<8x256xf32>
    %703 = vector.broadcast %701 : vector<1x256xf32> to vector<8x256xf32>
    %704 = arith.mulf %702, %703 : vector<8x256xf32>
    %705 = arith.addf %699, %704 : vector<8x256xf32>
    %706 = vector.extract_strided_slice %3 {offsets = [0, 2], sizes = [8, 1], strides = [1, 1]} : vector<8x4xf32> to vector<8x1xf32>
    %707 = vector.extract_strided_slice %694 {offsets = [2, 0], sizes = [1, 256], strides = [1, 1]} : vector<4x256xf32> to vector<1x256xf32>
    %708 = vector.broadcast %706 : vector<8x1xf32> to vector<8x256xf32>
    %709 = vector.broadcast %707 : vector<1x256xf32> to vector<8x256xf32>
    %710 = arith.mulf %708, %709 : vector<8x256xf32>
    %711 = arith.addf %705, %710 : vector<8x256xf32>
    %712 = vector.extract_strided_slice %3 {offsets = [0, 3], sizes = [8, 1], strides = [1, 1]} : vector<8x4xf32> to vector<8x1xf32>
    %713 = vector.extract_strided_slice %694 {offsets = [3, 0], sizes = [1, 256], strides = [1, 1]} : vector<4x256xf32> to vector<1x256xf32>
    %714 = vector.broadcast %712 : vector<8x1xf32> to vector<8x256xf32>
    %715 = vector.broadcast %713 : vector<1x256xf32> to vector<8x256xf32>
    %716 = arith.mulf %714, %715 : vector<8x256xf32>
    %717 = arith.addf %711, %716 : vector<8x256xf32>
    %718 = vector.broadcast %4 : vector<8x1xf32> to vector<8x256xf32>
    %719 = arith.addf %717, %718 : vector<8x256xf32>
    %cst_113 = arith.constant 0.000000e+00 : f32
    %720 = vector.broadcast %cst_113 : f32 to vector<8x256xf32>
    %721 = arith.cmpf oge, %719, %720 : vector<8x256xf32>
    %cst_114 = arith.constant 0.00999999977 : f32
    %722 = vector.broadcast %cst_114 : f32 to vector<8x256xf32>
    %723 = arith.mulf %719, %722 : vector<8x256xf32>
    %724 = arith.select %721, %719, %723 : vector<8x256xi1>, vector<8x256xf32>
    %725 = arith.addf %724, %368 : vector<8x256xf32>
    %c1_115 = arith.constant 1 : index
    %c0_116 = arith.constant 0 : index
    %c0_117 = arith.constant 0 : index
    %726 = vector.load %arg9[%c1_115, %c0_116, %c0_117] : memref<2x8x256xf32, #tpu.memory_space<vmem>>, vector<1x8x256xf32>
    %727 = vector.shape_cast %726 : vector<1x8x256xf32> to vector<8x256xf32>
    %728 = vector.shape_cast %725 : vector<8x256xf32> to vector<1x8x256xf32>
    tpu.vector_store %arg9[%c1_115, %c0_116, %c0_117], %728 {strides = array<i32>} : memref<2x8x256xf32, #tpu.memory_space<vmem>>, vector<1x8x256xf32>,
    return
  }
  func.func @transform_0(%arg0: i32) -> (i32, i32, i32) {
    %c0_i32 = arith.constant 0 : i32
    %c0_i32_0 = arith.constant 0 : i32
    %c0_i32_1 = arith.constant 0 : i32
    return %arg0, %c0_i32, %c0_i32_0 : i32, i32, i32
  }
  func.func @transform_1(%arg0: i32) -> (i32, i32) {
    %c0_i32 = arith.constant 0 : i32
    %c0_i32_0 = arith.constant 0 : i32
    %c0_i32_1 = arith.constant 0 : i32
    return %c0_i32, %c0_i32_0 : i32, i32
  }
  func.func @transform_2(%arg0: i32) -> (i32, i32) {
    %c0_i32 = arith.constant 0 : i32
    %c0_i32_0 = arith.constant 0 : i32
    %c0_i32_1 = arith.constant 0 : i32
    return %c0_i32, %c0_i32_0 : i32, i32
  }
  func.func @transform_3(%arg0: i32) -> (i32, i32) {
    %c0_i32 = arith.constant 0 : i32
    %c0_i32_0 = arith.constant 0 : i32
    %c0_i32_1 = arith.constant 0 : i32
    return %c0_i32, %c0_i32_0 : i32, i32
  }
  func.func @transform_4(%arg0: i32) -> (i32, i32, i32) {
    %c0_i32 = arith.constant 0 : i32
    %c0_i32_0 = arith.constant 0 : i32
    %c0_i32_1 = arith.constant 0 : i32
    %c0_i32_2 = arith.constant 0 : i32
    return %c0_i32, %c0_i32_0, %c0_i32_1 : i32, i32, i32
  }
  func.func @transform_5(%arg0: i32) -> (i32, i32) {
    %c0_i32 = arith.constant 0 : i32
    %c0_i32_0 = arith.constant 0 : i32
    %c0_i32_1 = arith.constant 0 : i32
    return %c0_i32, %c0_i32_0 : i32, i32
  }
  func.func @transform_6(%arg0: i32) -> (i32, i32) {
    %c0_i32 = arith.constant 0 : i32
    %c0_i32_0 = arith.constant 0 : i32
    %c0_i32_1 = arith.constant 0 : i32
    return %c0_i32, %c0_i32_0 : i32, i32
  }
  func.func @transform_7(%arg0: i32) -> (i32, i32) {
    %c0_i32 = arith.constant 0 : i32
    %c0_i32_0 = arith.constant 0 : i32
    %c0_i32_1 = arith.constant 0 : i32
    return %c0_i32, %c0_i32_0 : i32, i32
  }
  func.func @transform_8(%arg0: i32) -> (i32, i32, i32) {
    %c0_i32 = arith.constant 0 : i32
    %c0_i32_0 = arith.constant 0 : i32
    %c0_i32_1 = arith.constant 0 : i32
    return %arg0, %c0_i32, %c0_i32_0 : i32, i32, i32
  }
}

</mosaic_0001>

<bundles_post_ra>
// kernel: tpu_custom_call.1
= control target key start
LH: loop header
LB: loop body
LE: loop exit
PB: predicated region body
PF: predicated region fallthrough
CT: control target
= control target key end

     0   :  { %v3538_v1 = vmov 2   ;;  %v3534_v2 = vmov 1   ;;  %v3540_v3 = vmov 3   ;;  %v2121_v4 = vmov 5   ;;  %s3524_s0 = inlined_call_operand.vmem [shape: f32[2,8,256], index: 0, kind: input, shape index: {}]   ;;  %s3525_s1 = inlined_call_operand.vmem [shape: f32[9,256], index: 1, kind: input, shape index: {}]   ;;  %s3526_s2 = inlined_call_operand.vmem [shape: f32[4,8], index: 2, kind: input, shape index: {}]   ;;  %s3527_s3 = inlined_call_operand.vmem [shape: f32[4,1], index: 3, kind: input, shape index: {}]   ;;  %s3528_s4 = inlined_call_operand.vmem [shape: f32[9,4,4], index: 4, kind: input, shape index: {}]   ;;  %s3529_s5 = inlined_call_operand.vmem [shape: f32[4,1], index: 5, kind: input, shape index: {}]   ;;  %s3530_s6 = inlined_call_operand.vmem [shape: f32[8,4], index: 6, kind: input, shape index: {}]   ;;  %s3531_s7 = inlined_call_operand.vmem [shape: f32[8,1], index: 7, kind: input, shape index: {}]   ;;  %s3532_s8 = inlined_call_operand.hbm [shape: f32[2,8,256], index: 8, kind: output, shape index: {}]  }
   0x1   :  { %v30_v0 = vld [vmem:[%s3526_s2] sm:$0xf]  ;;  %2038 = vset.pattern.permute.xlu1 %v3538_v1  ;;  %2037 = vset.pattern.permute.xlu0 %v3534_v2 }
   0x2   :  { %69 = vperm.xlu1 %2038, %v30_v0   ;;  %53 = vperm.xlu0 %2037, %v30_v0  }
   0x6   :  { %2039 = vset.pattern.permute.xlu1 %v3540_v3  ;;  %2041 = vset.pattern.permute.xlu0 %v2121_v4 }
   0x7   :  { %13 = vsyncpa [#allocation3], 0  ;;  %85 = vperm.xlu1 %2039, %v30_v0   ;;  %117 = vperm.xlu0 %2041, %v30_v0   ;;  %v2122_v5 = vmov 4   ;;  %v3536_v6 = vmov 0   ;;  %v31_v7 = vld [vmem:[%s3527_s3] sm:$0xf]  ;;  %v3533_v20 = vlaneseq }
   0x8   :  { %v2124_v8 = vmov 6   ;;  %v2194_v9 = vld [vmem:[%s3528_s4] sm:$0xf]  ;;  %v2125_v10 = vmov 7   ;;  %v2200_v11 = vld [vmem:[%s3528_s4 + $0x4] sm:$0xf] }
   0x9   :  { %v2206_v12 = vld [vmem:[%s3528_s4 + $0x10] sm:$0xf]  ;;  %v2211_v13 = vld [vmem:[%s3528_s4 + $0x8] sm:$0xf]  ;;  %v2219_v14 = vld [vmem:[%s3528_s4 + $0xc] sm:$0xf] }
   0xa   :  { %3583 = vst [vmem:[#allocation5_spill] sm:$0xff] %v2206_v12  ;;  %v2227_v15 = vld [vmem:[%s3528_s4 + $0x14] sm:$0xf]  ;;  %v2235_v16 = vld [vmem:[%s3528_s4 + $0x18] sm:$0xf]  ;;  %v43_v21 = vshrl.u32 %v3533_v20, 7 }
   0xb   :  { %2040 = vset.pattern.permute.xlu1 %v2122_v5  ;;  %2042 = vset.pattern.permute.xlu0 %v3536_v6  ;;  %v32_v17 = vld [vmem:[%s3529_s5] sm:$0xf]  ;;  %v2244_v18 = vld [vmem:[%s3528_s4 + $0x1c] sm:$0xf]  ;;  %v2294_v24 = vld [vmem:[%s3524_s0 + $0x8] sm:$0xff]  ;;  %s2126_s11 = smov 17  }
   0xc   :  { %101 = vperm.xlu1 %2040, %v30_v0   ;;  %39 = vperm.xlu0 %2042, %v30_v0   ;;  %3584 = vst [vmem:[#allocation6_spill] sm:$0xff] %v2244_v18  ;;  %v2251_v19 = vld [vmem:[%s3528_s4 + $0x20] sm:$0xf]  ;;  %v2284_v22 = vsub.s32 1, %v43_v21  ;;  %v2299_v25 = vld [vmem:[%s3524_s0 + $0x10] sm:$0xff]  ;;  %v2301_v26 = vsub.s32 2, %v43_v21 }
   0xd   :  { %3585 = vst [vmem:[#allocation7_spill] sm:$0xff] %v2251_v19  ;;  %v2289_v23 = vld [vmem:[%s3524_s0] sm:$0xff]  ;;  %v2303_v27 = vsub.s32 5, %v43_v21  ;;  %v2308_v28 = vld [vmem:[%s3524_s0 + $0x18] sm:$0xff]  ;;  %v2310_v31 = vsub.s32 3, %v43_v21  ;;  %v2318_v35 = vsub.s32 0, %v43_v21 }
   0xe   :  { %3586 = vst [vmem:[#allocation8_spill] sm:$0xff] %v2284_v22  ;;  %3587 = vst [vmem:[#allocation9_spill] sm:$0xff] %v2301_v26  ;;  %v59_v32 = vrot.slane %v2289_v23, %v2284_v22  ;;  %v63_v33 = vrot.slane %v2294_v24, %v2284_v22  ;;  %v1063_v34 = vrot.slane %v2299_v25, %v2284_v22  ;;  %v106_v43 = vsub.s32 4, %v43_v21  ;;  %s2127_s13 = smov 16   ;;  %s2128_s18 = smov 15  }
   0xf   :  { %3588 = vst [vmem:[#allocation10_spill] sm:$0xff] %v2310_v31  ;;  %3589 = vst [vmem:[#allocation11_spill] sm:$0xff] %v2318_v35  ;;  %v1067_v36 = vrot.slane %v2308_v28, %v2284_v22  ;;  %v75_v37 = vrot.slane %v2289_v23, %v2301_v26  ;;  %v1111_v38 = vrot.slane %v2299_v25, %v2303_v27  ;;  %v2340_v47 = vsub.s32 6, %v43_v21  ;;  %s2129_s23 = smov 1   ;;  %s2130_s24 = smov 127  }
  0x10   :  { %2043 = vset.pattern.permute.xlu1 %v2124_v8  ;;  %166 = vperm.xlu0 %2042, %v31_v7   ;;  %v1115_v39 = vrot.slane %v2308_v28, %v2303_v27  ;;  %v79_v40 = vrot.slane %v2294_v24, %v2301_v26  ;;  %v1075_v41 = vrot.slane %v2299_v25, %v2301_v26  ;;  %v2348_v53 = vsub.s32 7, %v43_v21  ;;  %s2131_s25 = smov 113   ;;  %s2132_s26 = smov 112  }
  0x11   :  { %133 = vperm.xlu1 %2043, %v30_v0   ;;  %v1079_v42 = vrot.slane %v2308_v28, %v2301_v26  ;;  %v123_v44 = vrot.slane %v2289_v23, %v2303_v27  ;;  %v127_v45 = vrot.slane %v2294_v24, %v2303_v27  ;;  %v91_v46 = vrot.slane %v2289_v23, %v2310_v31  ;;  %s2133_s5 = smov 111  }
  0x12   :  { %v95_v49 = vrot.slane %v2294_v24, %v2310_v31  ;;  %v1087_v50 = vrot.slane %v2299_v25, %v2310_v31  ;;  %v1091_v51 = vrot.slane %v2308_v28, %v2310_v31  ;;  %v45_v56 = vrot.slane %v2289_v23, %v2318_v35 }
  0x13   :  { %v49_v57 = vrot.slane %v2294_v24, %v2318_v35  ;;  %v1053_v58 = vrot.slane %v2299_v25, %v2318_v35  ;;  %v1057_v59 = vrot.slane %v2308_v28, %v2318_v35  ;;  %v107_v60 = vrot.slane %v2289_v23, %v106_v43 }
  0x14   :  { %275 = vperm.xlu0 %2042, %v2194_v9   ;;  %v111_v61 = vrot.slane %v2294_v24, %v106_v43  ;;  %v1099_v62 = vrot.slane %v2299_v25, %v106_v43  ;;  %v1103_v63 = vrot.slane %v2308_v28, %v106_v43  ;;  %v143_v4 = vrot.slane %v2294_v24, %v2340_v47 }
  0x15   :  { %2044 = vset.pattern.permute.xlu1 %v2125_v10  ;;  %v1123_v5 = vrot.slane %v2299_v25, %v2340_v47  ;;  %v1127_v7 = vrot.slane %v2308_v28, %v2340_v47  ;;  %v155_v8 = vrot.slane %v2289_v23, %v2348_v53  ;;  %v159_v10 = vrot.slane %v2294_v24, %v2348_v53 }
  0x16   :  { %149 = vperm.xlu1 %2044, %v30_v0   ;;  %v139_v0 = vrot.slane %v2289_v23, %v2340_v47 }
  0x18   :  { %364 = vperm.xlu0 %2042, %v2200_v11  }
  0x1a   :  { %2045 = vset.pattern.permute.xlu1 %v3536_v6 }
  0x1b   :  { %181 = vperm.xlu1 %2045, %v2206_v12  }
  0x1c   :  { %453 = vperm.xlu0 %2042, %v2211_v13  }
  0x1f   :  { %2046 = vset.pattern.permute.xlu1 %v3534_v2 }
  0x20   :  { %195 = vperm.xlu1 %2046, %v2206_v12   ;;  %542 = vperm.xlu0 %2042, %v2219_v14  }
  0x24   :  { %2047 = vset.pattern.permute.xlu1 %v3540_v3  ;;  %631 = vperm.xlu0 %2042, %v2227_v15  }
  0x25   :  { %227 = vperm.xlu1 %2047, %v2206_v12  }
  0x28   :  { %720 = vperm.xlu0 %2042, %v2235_v16  }
  0x29   :  { %2048 = vset.pattern.permute.xlu1 %v3536_v6 }
  0x2a   :  { %244 = vperm.xlu1 %2048, %v32_v17  }
  0x2c   :  { %809 = vperm.xlu0 %2042, %v2244_v18  }
  0x2e   :  { %2049 = vset.pattern.permute.xlu1 %v3534_v2 }
  0x2f   :  { %289 = vperm.xlu1 %2049, %v2194_v9  }
  0x30   :  { %898 = vperm.xlu0 %2042, %v2251_v19  }
  0x33   :  { %2050 = vset.pattern.permute.xlu1 %v3538_v1 }
  0x34   :  { %305 = vperm.xlu1 %2050, %v2194_v9  }
  0x38   :  { %2051 = vset.pattern.permute.xlu1 %v3534_v2 }
  0x39   :  { %378 = vperm.xlu1 %2051, %v2200_v11  }
  0x3d   :  { %2052 = vset.pattern.permute.xlu1 %v3538_v1 }
  0x3e   :  { %394 = vperm.xlu1 %2052, %v2200_v11  }
  0x42   :  { %2053 = vset.pattern.permute.xlu1 %v3534_v2 }
  0x43   :  { %467 = vperm.xlu1 %2053, %v2211_v13  }
  0x47   :  { %2054 = vset.pattern.permute.xlu1 %v3538_v1 }
  0x48   :  { %483 = vperm.xlu1 %2054, %v2211_v13  }
  0x4c   :  { %2055 = vset.pattern.permute.xlu1 %v3534_v2 }
  0x4d   :  { %556 = vperm.xlu1 %2055, %v2219_v14  }
  0x51   :  { %2056 = vset.pattern.permute.xlu1 %v3538_v1 }
  0x52   :  { %572 = vperm.xlu1 %2056, %v2219_v14  }
  0x56   :  { %2057 = vset.pattern.permute.xlu1 %v3534_v2 }
  0x57   :  { %645 = vperm.xlu1 %2057, %v2227_v15  }
  0x5b   :  { %2058 = vset.pattern.permute.xlu1 %v3538_v1 }
  0x5c   :  { %661 = vperm.xlu1 %2058, %v2227_v15  }
  0x60   :  { %2059 = vset.pattern.permute.xlu1 %v3534_v2 }
  0x61   :  { %734 = vperm.xlu1 %2059, %v2235_v16  }
  0x65   :  { %2060 = vset.pattern.permute.xlu1 %v3538_v1 }
  0x66   :  { %750 = vperm.xlu1 %2060, %v2235_v16  }
  0x6a   :  { %2061 = vset.pattern.permute.xlu1 %v3534_v2 }
  0x6b   :  { %823 = vperm.xlu1 %2061, %v2244_v18  }
  0x6f   :  { %2062 = vset.pattern.permute.xlu1 %v3538_v1 }
  0x70   :  { %839 = vperm.xlu1 %2062, %v2244_v18  }
  0x74   :  { %2063 = vset.pattern.permute.xlu1 %v3534_v2 }
  0x81   :  { %v54_v29 = vpop.permute.xlu0 %53  ;;  %v70_v30 = vpop.permute.xlu1 %69 }
  0x82   :  { %v64_v17 = vmul.f32 %v59_v32, %v54_v29  ;;  %v65_v21 = vmul.f32 %v63_v33, %v54_v29  ;;  %v1068_v27 = vmul.f32 %v1063_v34, %v54_v29  ;;  %v80_v3 = vmul.f32 %v75_v37, %v70_v30 }
  0x83   :  { %v81_v31 = vmul.f32 %v79_v40, %v70_v30  ;;  %v1080_v26 = vmul.f32 %v1075_v41, %v70_v30  ;;  %v1081_v47 = vmul.f32 %v1079_v42, %v70_v30 }
  0x86   :  { %v118_v48 = vpop.permute.xlu0 %117  ;;  %v86_v52 = vpop.permute.xlu1 %85 }
  0x87   :  { %v2350_v54 = vmul.f32 %v1111_v38, %v118_v48  ;;  %v2352_v55 = vmul.f32 %v1115_v39, %v118_v48  ;;  %v1069_v38 = vmul.f32 %v1067_v36, %v54_v29  ;;  %v96_v19 = vmul.f32 %v91_v46, %v86_v52 }
  0x88   :  { %v97_v24 = vmul.f32 %v95_v49, %v86_v52  ;;  %v1092_v32 = vmul.f32 %v1087_v50, %v86_v52  ;;  %v1093_v33 = vmul.f32 %v1091_v51, %v86_v52 }
  0x8b   :  { %v40_v39 = vpop.permute.xlu0 %39  ;;  %v102_v43 = vpop.permute.xlu1 %101 }
  0x8c   :  { %v50_v20 = vmul.f32 %v45_v56, %v40_v39  ;;  %v51_v2 = vmul.f32 %v49_v57, %v40_v39  ;;  %v1058_v6 = vmul.f32 %v1053_v58, %v40_v39  ;;  %v1059_v1 = vmul.f32 %v1057_v59, %v40_v39  ;;  %v2407_v39 = vld [vmem:[%s3528_s4] sm:$0xf] }
  0x8d   :  { %v112_v57 = vmul.f32 %v107_v60, %v102_v43  ;;  %v113_v58 = vmul.f32 %v111_v61, %v102_v43  ;;  %v1104_v59 = vmul.f32 %v1099_v62, %v102_v43  ;;  %v1105_v37 = vmul.f32 %v1103_v63, %v102_v43 }
  0x8e   :  { %v66_v22 = vadd.f32 %v64_v17, %v50_v20  ;;  %v67_v35 = vadd.f32 %v65_v21, %v51_v2  ;;  %v1070_v23 = vadd.f32 %v1068_v27, %v1058_v6  ;;  %v1071_v12 = vadd.f32 %v1069_v38, %v1059_v1  ;;  %v2399_v38 = vld [vmem:[%s3528_s4 + $0x10] sm:$0xf] }
  0x8f   :  { %v128_v2 = vmul.f32 %v123_v44, %v118_v48  ;;  %v129_v6 = vmul.f32 %v127_v45, %v118_v48  ;;  %v1135_v1 = vrot.slane %v2299_v25, %v2348_v53 }
  0x90   :  { %v82_v34 = vadd.f32 %v80_v3, %v66_v22  ;;  %v83_v29 = vadd.f32 %v81_v31, %v67_v35  ;;  %v1082_v36 = vadd.f32 %v1080_v26, %v1070_v23  ;;  %v1083_v18 = vadd.f32 %v1081_v47, %v1071_v12  ;;  %v134_v56 = vpop.permute.xlu1 %133  ;;  %v2417_v47 = vld [vmem:[%s3528_s4 + $0x4] sm:$0xf] }
  0x91   :  { %v1139_v3 = vrot.slane %v2308_v28, %v2348_v53  ;;  %v144_v35 = vmul.f32 %v139_v0, %v134_v56  ;;  %v145_v42 = vmul.f32 %v143_v4, %v134_v56  ;;  %v1128_v46 = vmul.f32 %v1123_v5, %v134_v56  ;;  %v167_v5 = vpop.permute.xlu0 %166 }
  0x92   :  { %v98_v40 = vadd.f32 %v96_v19, %v82_v34  ;;  %v99_v41 = vadd.f32 %v97_v24, %v83_v29  ;;  %v1094_v30 = vadd.f32 %v1092_v32, %v1082_v36  ;;  %v1095_v20 = vadd.f32 %v1093_v33, %v1083_v18  ;;  %v2427_v24 = vld [vmem:[%s3528_s4 + $0x8] sm:$0xf]  ;;  %v2435_v32 = vld [vmem:[%s3528_s4 + $0xc] sm:$0xf] }
  0x93   :  { %v1129_v49 = vmul.f32 %v1127_v7, %v134_v56  ;;  %v3593_v29 = vmov 3  }
  0x94   :  { %v114_v22 = vadd.f32 %v112_v57, %v98_v40  ;;  %v115_v26 = vadd.f32 %v113_v58, %v99_v41  ;;  %v1106_v12 = vadd.f32 %v1104_v59, %v1094_v30  ;;  %v1107_v31 = vadd.f32 %v1105_v37, %v1095_v20  ;;  %v33_v59 = vld [vmem:[%s3530_s6] sm:$0xff]  ;;  %v2503_v30 = vld [vmem:[%s3528_s4 + $0x14] sm:$0xf] }
  0x95   :  { %v150_v19 = vpop.permute.xlu1 %149  ;;  %v3596_v57 = vmov 2   ;;  %v3597_v37 = vmov 0   ;;  %v3598_v41 = vmov 1  }
  0x96   :  { %v130_v50 = vadd.f32 %v128_v2, %v114_v22  ;;  %v131_v51 = vadd.f32 %v129_v6, %v115_v26  ;;  %v1118_v18 = vadd.f32 %v2350_v54, %v1106_v12  ;;  %v1119_v44 = vadd.f32 %v2352_v55, %v1107_v31  ;;  %v2512_v2 = vld [vmem:[%s3528_s4 + $0x18] sm:$0xf]  ;;  %v2514_v6 = vpop.permute.xlu0 %275  ;;  %v3599_v31 = vld [vmem:[#allocation5_spill] sm:$0xff] }
  0x97   :  { %v160_v45 = vmul.f32 %v155_v8, %v150_v19  ;;  %v161_v25 = vmul.f32 %v159_v10, %v150_v19  ;;  %v1140_v48 = vmul.f32 %v1135_v1, %v150_v19  ;;  %v1141_v52 = vmul.f32 %v1139_v3, %v150_v19  ;;  %v34_v1 = vld [vmem:[%s3531_s7] sm:$0xff]  ;;  %v2523_v3 = vld [vmem:[%s3528_s4 + $0x1c] sm:$0xf] }
  0x98   :  { %v146_v28 = vadd.f32 %v144_v35, %v130_v50  ;;  %v147_v53 = vadd.f32 %v145_v42, %v131_v51  ;;  %v1130_v60 = vadd.f32 %v1128_v46, %v1118_v18  ;;  %v1131_v61 = vadd.f32 %v1129_v49, %v1119_v44 }
  0x9a   :  { %v162_v62 = vadd.f32 %v160_v45, %v146_v28  ;;  %v163_v63 = vadd.f32 %v161_v25, %v147_v53  ;;  %v1142_v0 = vadd.f32 %v1140_v48, %v1130_v60  ;;  %v1143_v4 = vadd.f32 %v1141_v52, %v1131_v61  ;;  %v2409_v43 = vpop.permute.xlu1 %181  ;;  %v2529_v26 = vpop.permute.xlu0 %364  ;;  %v2578_v48 = vld [vmem:[%s3528_s4 + $0x20] sm:$0xf] }
  0x9b   :  { %3603 = vst [vmem:[#allocation15_spill] sm:$0xff] %v2578_v48 }
  0x9c   :  { %v169_v7 = vadd.f32 %v167_v5, %v162_v62  ;;  %v170_v17 = vadd.f32 %v167_v5, %v163_v63  ;;  %v2384_v21 = vadd.f32 %v1142_v0, %v167_v5  ;;  %v2386_v54 = vadd.f32 %v1143_v4, %v167_v5 }
  0x9d   :  { %v3606_v63 = vlaneseq }
  0x9e   :  { %vm171_vm0 = vcmp.ge.f32.partialorder %v169_v7, 0.0  ;;  %vm172_vm1 = vcmp.ge.f32.partialorder %v170_v17, 0.0  ;;  %v173_v55 = vmul.f32 0.01, %v169_v7  ;;  %v174_v8 = vmul.f32 0.01, %v170_v17  ;;  %v2538_v42 = vpop.permute.xlu0 %453 }
  0x9f   :  { %v2422_v23 = vpop.permute.xlu1 %195  ;;  %v1148_v35 = vmul.f32 0.01, %v2384_v21  ;;  %vm1146_vm2 = vcmp.ge.f32.partialorder %v2384_v21, 0.0  ;;  %v1149_v49 = vmul.f32 0.01, %v2386_v54  ;;  %vm1147_vm3 = vcmp.ge.f32.partialorder %v2386_v54, 0.0 }
  0xa0   :  { %v2388_v10 = vsel %vm171_vm0, %v169_v7, %v173_v55  ;;  %v2390_v27 = vsel %vm172_vm1, %v170_v17, %v174_v8  ;;  %v2599_v0 = vand.u32 127, %v3606_v63  ;;  %v258_v7 = vld [vmem:[%s3525_s1] ss:$8 sm:$0x3]  ;;  %v3608_v55 = vld [vmem:[#allocation8_spill] sm:$0xff] }
  0xa1   :  { %3590 = vst [vmem:[#allocation12_spill] sm:$0xff] %v2388_v10  ;;  %3591 = vst [vmem:[#allocation13_spill] sm:$0xff] %v2390_v27  ;;  %251 = vrot.lane.b32.xlu1 %v2390_v27, %s2126_s11  ;;  %249 = vrot.lane.b32.xlu0 %v2388_v10, %s2126_s11  ;;  %v2547_v19 = vsel %vm1146_vm2, %v2384_v21, %v1148_v35  ;;  %v2557_v51 = vsel %vm1147_vm3, %v2386_v54, %v1149_v49  ;;  %v3607_v21 = vld [vmem:[#allocation11_spill] sm:$0xff] }
  0xa2   :  { %v2553_v50 = vpop.permute.xlu0 %542  ;;  %vm255_vm4 = vcmp.lt.s32.totalorder %v2599_v0, 17  ;;  %v263_v54 = vrot.slane %v258_v7, %v3607_v21  ;;  %v267_v8 = vrot.slane %v258_v7, %v3608_v55  ;;  %vm342_vm5 = vcmp.lt.s32.totalorder %v2599_v0, 16 }
  0xa3   :  { %vm431_vm6 = vcmp.lt.s32.totalorder %v2599_v0, 15  ;;  %vm520_vm7 = vcmp.lt.s32.totalorder %v2599_v0, 1  ;;  %vm609_vm8 = vcmp.lt.s32.totalorder %v2599_v0, 127  ;;  %vm698_vm9 = vcmp.lt.s32.totalorder %v2599_v0, 113 }
  0xa4   :  { %v2437_v33 = vpop.permute.xlu1 %227  ;;  %vm787_vm10 = vcmp.lt.s32.totalorder %v2599_v0, 112  ;;  %vm876_vm11 = vcmp.lt.s32.totalorder %v2599_v0, 111 }
  0xa5   :  { %338 = vrot.lane.b32.xlu1 %v2388_v10, %s2127_s13  ;;  %1155 = vperm.xlu0 %2042, %v2399_v38  }
  0xa6   :  { %v2564_v44 = vpop.permute.xlu0 %631 }
  0xa9   :  { %340 = vrot.lane.b32.xlu1 %v2390_v27, %s2127_s13  ;;  %1241 = vperm.xlu0 %2042, %v2407_v39   ;;  %v2444_v34 = vpop.permute.xlu1 %244 }
  0xaa   :  { %3592 = vst [vmem:[#allocation14_spill] sm:$0xff] %v2444_v34  ;;  %v2572_v25 = vpop.permute.xlu0 %720 }
  0xad   :  { %427 = vrot.lane.b32.xlu1 %v2388_v10, %s2128_s18  ;;  %1327 = vperm.xlu0 %2042, %v2417_v47  }
  0xae   :  { %v2451_v36 = vpop.permute.xlu1 %289  ;;  %v2584_v28 = vpop.permute.xlu0 %809 }
  0xaf   :  { %3604 = vst [vmem:[#allocation16_spill] sm:$0xff] %v2584_v28 }
  0xb1   :  { %429 = vrot.lane.b32.xlu1 %v2390_v27, %s2128_s18  ;;  %1413 = vperm.xlu0 %2042, %v2427_v24  }
  0xb2   :  { %v2593_v61 = vpop.permute.xlu0 %898 }
  0xb3   :  { %v2458_v56 = vpop.permute.xlu1 %305  ;;  %3605 = vst [vmem:[#allocation17_spill] sm:$0xff] %v2593_v61  ;;  %v3613_v61 = vld [vmem:[#allocation9_spill] sm:$0xff] }
  0xb5   :  { %516 = vrot.lane.b32.xlu1 %v2388_v10, %s2129_s23  ;;  %1499 = vperm.xlu0 %2042, %v2435_v32  }
  0xb9   :  { %518 = vrot.lane.b32.xlu1 %v2390_v27, %s2129_s23  ;;  %2077 = vset.pattern.permute.xlu0 %v3593_v29 }
  0xba   :  { %321 = vperm.xlu0 %2077, %v2194_v9   ;;  %v2464_v9 = vpop.permute.xlu1 %378 }
  0xbd   :  { %605 = vrot.lane.b32.xlu1 %v2388_v10, %s2130_s24 }
  0xbe   :  { %410 = vperm.xlu0 %2077, %v2200_v11   ;;  %v2471_v11 = vpop.permute.xlu1 %394 }
  0xc1   :  { %607 = vrot.lane.b32.xlu1 %v2390_v27, %s2130_s24 }
  0xc2   :  { %499 = vperm.xlu0 %2077, %v2211_v13   ;;  %v3594_v13 = vld [vmem:[#allocation6_spill] sm:$0xff] }
  0xc5   :  { %694 = vrot.lane.b32.xlu1 %v2388_v10, %s2131_s25 }
  0xc6   :  { %588 = vperm.xlu0 %2077, %v2219_v14   ;;  %v3595_v14 = vld [vmem:[#allocation7_spill] sm:$0xff] }
  0xc9   :  { %696 = vrot.lane.b32.xlu1 %v2390_v27, %s2131_s25 }
  0xca   :  { %677 = vperm.xlu0 %2077, %v2227_v15   ;;  %v2477_v15 = vpop.permute.xlu1 %467 }
  0xcd   :  { %783 = vrot.lane.b32.xlu1 %v2388_v10, %s2132_s26 }
  0xce   :  { %766 = vperm.xlu0 %2077, %v2235_v16   ;;  %v2483_v16 = vpop.permute.xlu1 %483 }
  0xd1   :  { %785 = vrot.lane.b32.xlu1 %v2390_v27, %s2132_s26 }
  0xd2   :  { %855 = vperm.xlu0 %2077, %v3594_v13   ;;  %v2489_v58 = vpop.permute.xlu1 %556 }
  0xd5   :  { %872 = vrot.lane.b32.xlu1 %v2388_v10, %s2133_s5 }
  0xd6   :  { %944 = vperm.xlu0 %2077, %v3595_v14   ;;  %v2496_v40 = vpop.permute.xlu1 %572 }
  0xd9   :  { %874 = vrot.lane.b32.xlu1 %v2390_v27, %s2133_s5 }
  0xda   :  { %1201 = vperm.xlu0 %2077, %v2399_v38   ;;  %v2506_v20 = vpop.permute.xlu1 %645 }
  0xdd   :  { %912 = vperm.xlu1 %2063, %v3595_v14  }
  0xde   :  { %1287 = vperm.xlu0 %2077, %v2407_v39   ;;  %v2526_v22 = vpop.permute.xlu1 %661 }
  0xe1   :  { %2064 = vset.pattern.permute.xlu1 %v3596_v57 }
  0xe2   :  { %928 = vperm.xlu1 %2064, %v3595_v14   ;;  %1373 = vperm.xlu0 %2077, %v2417_v47   ;;  %v2534_v12 = vpop.permute.xlu1 %734 }
  0xe6   :  { %2065 = vset.pattern.permute.xlu1 %v3597_v37  ;;  %1459 = vperm.xlu0 %2077, %v2427_v24   ;;  %v2543_v46 = vpop.permute.xlu1 %750 }
  0xe7   :  { %969 = vperm.xlu1 %2065, %v33_v59   ;;  %3600 = vst [vmem:[#allocation6_spill] sm:$0xff] %v2543_v46 }
  0xea   :  { %1545 = vperm.xlu0 %2077, %v2435_v32   ;;  %v2559_v18 = vpop.permute.xlu1 %823 }
  0xeb   :  { %2066 = vset.pattern.permute.xlu1 %v3598_v41  ;;  %3601 = vst [vmem:[#allocation7_spill] sm:$0xff] %v2559_v18 }
  0xec   :  { %983 = vperm.xlu1 %2066, %v33_v59  }
  0xee   :  { %1631 = vperm.xlu0 %2077, %v2503_v30  }
  0xef   :  { %v2568_v45 = vpop.permute.xlu1 %839 }
  0xf0   :  { %2067 = vset.pattern.permute.xlu1 %v3593_v29  ;;  %3602 = vst [vmem:[#allocation5_spill] sm:$0xff] %v2568_v45 }
  0xf1   :  { %1015 = vperm.xlu1 %2067, %v33_v59  }
  0xf2   :  { %1717 = vperm.xlu0 %2077, %v2512_v2  }
  0xf5   :  { %2068 = vset.pattern.permute.xlu1 %v3597_v37 }
  0xf6   :  { %1032 = vperm.xlu1 %2068, %v34_v1   ;;  %1803 = vperm.xlu0 %2077, %v2523_v3  }
  0xfa   :  { %2069 = vset.pattern.permute.xlu1 %v3598_v41  ;;  %2087 = vset.pattern.permute.xlu0 %v3596_v57 }
  0xfb   :  { %1169 = vperm.xlu1 %2069, %v2399_v38   ;;  %211 = vperm.xlu0 %2087, %v3599_v31  }
  0xff   :  { %2070 = vset.pattern.permute.xlu1 %v3596_v57  ;;  %999 = vperm.xlu0 %2087, %v33_v59  }
 0x100   :  { %1185 = vperm.xlu1 %2070, %v2399_v38  }
 0x103   :  { %1529 = vperm.xlu0 %2087, %v2435_v32  }
 0x104   :  { %1218 = vrot.lane.b32.xlu1 %v2547_v19, %s2126_s11 }
 0x105   :  { %2071 = vset.pattern.permute.xlu1 %v3598_v41 }
 0x107   :  { %1615 = vperm.xlu0 %2087, %v2503_v30  }
 0x108   :  { %1220 = vrot.lane.b32.xlu1 %v2557_v51, %s2126_s11 }
 0x10b   :  { %1701 = vperm.xlu0 %2087, %v2512_v2  }
 0x10c   :  { %1255 = vperm.xlu1 %2071, %v2407_v39  }
 0x10f   :  { %1787 = vperm.xlu0 %2087, %v2523_v3  }
 0x110   :  { %2072 = vset.pattern.permute.xlu1 %v3596_v57 }
 0x111   :  { %1271 = vperm.xlu1 %2072, %v2407_v39  }
 0x113   :  { %v252_v52 = vpop.permute.xlu1 %251  ;;  %1873 = vperm.xlu0 %2087, %v2578_v48   ;;  %v250_v4 = vpop.permute.xlu0 %249 }
 0x114   :  { %v256_v39 = vsel %vm255_vm4, %v250_v4, %v252_v52 }
 0x115   :  { %1304 = vrot.lane.b32.xlu1 %v2547_v19, %s2127_s13  ;;  %v271_v59 = vmul.f32 %v267_v8, %v256_v39 }
 0x116   :  { %2073 = vset.pattern.permute.xlu1 %v3598_v41 }
 0x117   :  { %v2586_v53 = vpop.permute.xlu1 %338  ;;  %2089 = vset.pattern.permute.xlu0 %v3593_v29  ;;  %v285_v49 = vrot.slane %v271_v59, %v3607_v21 }
 0x119   :  { %1306 = vrot.lane.b32.xlu1 %v2557_v51, %s2127_s13  ;;  %v287_v8 = vmul.f32 %v285_v49, %v2514_v6  ;;  %v3614_v49 = vld [vmem:[#allocation10_spill] sm:$0xff] }
 0x11b   :  { %v2591_v60 = vpop.permute.xlu1 %340 }
 0x11d   :  { %1341 = vperm.xlu1 %2073, %v2417_v47  }
 0x11f   :  { %v2596_v62 = vpop.permute.xlu1 %427 }
 0x121   :  { %2074 = vset.pattern.permute.xlu1 %v3596_v57 }
 0x122   :  { %1357 = vperm.xlu1 %2074, %v2417_v47   ;;  %v257_v47 = vsel %vm255_vm4, %v252_v52, %v250_v4  ;;  %v299_v52 = vrot.slane %v271_v59, %v3608_v55 }
 0x123   :  { %v2603_v5 = vpop.permute.xlu1 %429  ;;  %v270_v14 = vmul.f32 %v263_v54, %v257_v47 }
 0x124   :  { %v2609_v17 = vpop.permute.xlu0 %1155  ;;  %v301_v47 = vmul.f32 %v299_v52, %v2451_v36 }
 0x125   :  { %v281_v35 = vrot.slane %v270_v14, %v3607_v21  ;;  %v295_v63 = vrot.slane %v270_v14, %v3608_v55  ;;  %v311_v34 = vrot.slane %v270_v14, %v3613_v61 }
 0x126   :  { %1390 = vrot.lane.b32.xlu1 %v2547_v19, %s2128_s18 }
 0x127   :  { %v2615_v38 = vpop.permute.xlu1 %516  ;;  %2075 = vset.pattern.permute.xlu1 %v3598_v41  ;;  %v286_v54 = vmul.f32 %v281_v35, %v2514_v6  ;;  %v300_v39 = vmul.f32 %v295_v63, %v2451_v36  ;;  %v316_v6 = vmul.f32 %v311_v34, %v2458_v56  ;;  %v327_v36 = vrot.slane %v270_v14, %v3614_v49 }
 0x128   :  { %v2622_v13 = vpop.permute.xlu0 %1241  ;;  %v331_v63 = vrot.slane %v271_v59, %v3614_v49 }
 0x129   :  { %3609 = vst [vmem:[#allocation11_spill] sm:$0xff] %v2622_v13 }
 0x12a   :  { %1392 = vrot.lane.b32.xlu1 %v2557_v51, %s2128_s18 }
 0x12b   :  { %v2626_v1 = vpop.permute.xlu1 %518 }
 0x12c   :  { %v2628_v31 = vpop.permute.xlu0 %1327 }
 0x12d   :  { %3610 = vst [vmem:[#allocation8_spill] sm:$0xff] %v2628_v31 }
 0x12e   :  { %1427 = vperm.xlu1 %2075, %v2427_v24  }
 0x12f   :  { %v2635_v4 = vpop.permute.xlu1 %605 }
 0x130   :  { %v2637_v7 = vpop.permute.xlu0 %1413 }
 0x131   :  { %3611 = vst [vmem:[#allocation18_spill] sm:$0xff] %v2637_v7  ;;  %v315_v7 = vrot.slane %v271_v59, %v3613_v61 }
 0x132   :  { %2076 = vset.pattern.permute.xlu1 %v3596_v57  ;;  %v302_v57 = vadd.f32 %v300_v39, %v286_v54 }
 0x133   :  { %1443 = vperm.xlu1 %2076, %v2427_v24   ;;  %v2645_v31 = vpop.permute.xlu1 %607  ;;  %v303_v24 = vadd.f32 %v301_v47, %v287_v8  ;;  %v317_v35 = vmul.f32 %v315_v7, %v2458_v56  ;;  %v205_v7 = vrot.slane %v2390_v27, %v3608_v55 }
 0x134   :  { %v2647_v13 = vpop.permute.xlu0 %1499  ;;  %v318_v29 = vadd.f32 %v316_v6, %v302_v57  ;;  %v1990_v57 = vld [vmem:[%s3525_s1 + $0x2] ss:$8 sm:$0x3] }
 0x135   :  { %3612 = vst [vmem:[#allocation19_spill] sm:$0xff] %v2647_v13  ;;  %v319_v45 = vadd.f32 %v317_v35, %v303_v24  ;;  %v343_v35 = vsel %vm342_vm5, %v2586_v53, %v2591_v60 }
 0x137   :  { %2078 = vset.pattern.permute.xlu1 %v3598_v41  ;;  %v2657_v52 = vpop.permute.xlu1 %694 }
 0x138   :  { %1513 = vperm.xlu1 %2078, %v2435_v32  }
 0x139   :  { %v322_v13 = vpop.permute.xlu0 %321 }
 0x13a   :  { %v332_v48 = vmul.f32 %v327_v36, %v322_v13  ;;  %v333_v18 = vmul.f32 %v331_v63, %v322_v13 }
 0x13b   :  { %v2668_v56 = vpop.permute.xlu1 %696 }
 0x13c   :  { %1476 = vrot.lane.b32.xlu1 %v2547_v19, %s2129_s23  ;;  %v2661_v54 = vadd.f32 %v332_v48, %v318_v29  ;;  %v2663_v32 = vadd.f32 %v333_v18, %v319_v45  ;;  %v187_v29 = vrot.slane %v2388_v10, %v3607_v21  ;;  %v201_v18 = vrot.slane %v2388_v10, %v3608_v55  ;;  %v1988_v45 = vld [vmem:[%s3525_s1 + $0x1] ss:$8 sm:$0x3] }
 0x13d   :  { %2079 = vset.pattern.permute.xlu1 %v3597_v37  ;;  %v2666_v34 = vpop.permute.xlu0 %410  ;;  %v191_v48 = vrot.slane %v2390_v27, %v3607_v21  ;;  %v351_v39 = vrot.slane %v1988_v45, %v3607_v21  ;;  %v355_v47 = vrot.slane %v1988_v45, %v3608_v55  ;;  %v207_v45 = vmul.f32 %v205_v7, %v2422_v23 }
 0x13e   :  { %3615 = vst [vmem:[#allocation9_spill] sm:$0xff] %v2661_v54  ;;  %3616 = vst [vmem:[#allocation10_spill] sm:$0xff] %v2663_v32  ;;  %v192_v24 = vmul.f32 %v187_v29, %v2409_v43  ;;  %v206_v6 = vmul.f32 %v201_v18, %v2422_v23  ;;  %v233_v29 = vrot.slane %v2388_v10, %v3614_v49 }
 0x13f   :  { %v2675_v13 = vpop.permute.xlu1 %783  ;;  %v193_v63 = vmul.f32 %v191_v48, %v2409_v43  ;;  %v237_v18 = vrot.slane %v2390_v27, %v3614_v49  ;;  %v440_v32 = vrot.slane %v1990_v57, %v3607_v21  ;;  %v2731_v48 = vmul.f32 %v355_v47, %v343_v35 }
 0x140   :  { %1478 = vrot.lane.b32.xlu1 %v2557_v51, %s2129_s23  ;;  %v2727_v43 = vmul.f32 %v233_v29, %v2437_v33  ;;  %v2735_v54 = vadd.f32 %v206_v6, %v192_v24  ;;  %v2760_v6 = vld [vmem:[%s3525_s1 + $0x5] ss:$8 sm:$0x3]  ;;  %v433_v24 = vsel %vm431_vm6, %v2603_v5, %v2596_v62 }
 0x141   :  { %v2672_v14 = vpop.permute.xlu0 %499  ;;  %v2744_v29 = vadd.f32 %v207_v45, %v193_v63  ;;  %v2785_v45 = vld [vmem:[%s3525_s1 + $0x6] ss:$8 sm:$0x3]  ;;  %v374_v47 = vrot.slane %v2731_v48, %v3607_v21  ;;  %v622_v7 = vrot.slane %v2760_v6, %v3608_v55 }
 0x142   :  { %3617 = vst [vmem:[#allocation20_spill] sm:$0xff] %v2672_v14  ;;  %3621 = vst [vmem:[#allocation24_spill] sm:$0xff] %v2727_v43  ;;  %v521_v43 = vsel %vm520_vm7, %v2615_v38, %v2626_v1 }
 0x143   :  { %v2710_v36 = vpop.permute.xlu1 %785  ;;  %3622 = vst [vmem:[#allocation25_spill] sm:$0xff] %v2735_v54  ;;  %3624 = vst [vmem:[#allocation27_spill] sm:$0xff] %v2744_v29  ;;  %v2815_v29 = vld [vmem:[%s3525_s1 + $0x7] ss:$8 sm:$0x3] }
 0x144   :  { %1585 = vperm.xlu1 %2079, %v2503_v30   ;;  %v2845_v54 = vld [vmem:[%s3525_s1] ss:$8 sm:$0x3] }
 0x145   :  { %v2677_v59 = vpop.permute.xlu0 %588 }
 0x146   :  { %3618 = vst [vmem:[#allocation21_spill] sm:$0xff] %v2677_v59 }
 0x147   :  { %v2762_v35 = vpop.permute.xlu1 %872 }
 0x148   :  { %2080 = vset.pattern.permute.xlu1 %v3598_v41  ;;  %3625 = vst [vmem:[#allocation28_spill] sm:$0xff] %v2762_v35 }
 0x149   :  { %1599 = vperm.xlu1 %2080, %v2503_v30   ;;  %v2693_v8 = vpop.permute.xlu0 %677  ;;  %v344_v30 = vsel %vm342_vm5, %v2591_v60, %v2586_v53  ;;  %v444_v53 = vrot.slane %v1990_v57, %v3608_v55  ;;  %v618_v57 = vrot.slane %v2760_v6, %v3607_v21  ;;  %v2820_v6 = vld [vmem:[%s3525_s1 + $0x10] ss:$8 sm:$0x3] }
 0x14a   :  { %3619 = vst [vmem:[#allocation22_spill] sm:$0xff] %v2693_v8  ;;  %v2729_v23 = vmul.f32 %v351_v39, %v344_v30  ;;  %v2738_v8 = vmul.f32 %v237_v18, %v2437_v33  ;;  %v1992_v39 = vld [vmem:[%s3525_s1 + $0x3] ss:$8 sm:$0x3]  ;;  %3627 = vst [vmem:[#allocation30_spill] sm:$0xff] %v2820_v6 }
 0x14b   :  { %v529_v63 = vrot.slane %v1992_v39, %v3607_v21 }
 0x14c   :  { %3623 = vst [vmem:[#allocation26_spill] sm:$0xff] %v2738_v8  ;;  %v370_v18 = vrot.slane %v2729_v23, %v3607_v21  ;;  %v384_v33 = vrot.slane %v2729_v23, %v3608_v55 }
 0x14d   :  { %1562 = vrot.lane.b32.xlu1 %v2547_v19, %s2130_s24  ;;  %v2723_v60 = vpop.permute.xlu0 %766 }
 0x14e   :  { %3620 = vst [vmem:[#allocation23_spill] sm:$0xff] %v2723_v60  ;;  %2081 = vset.pattern.permute.xlu1 %v3597_v37  ;;  %v432_v60 = vsel %vm431_vm6, %v2596_v62, %v2603_v5  ;;  %v388_v62 = vrot.slane %v2731_v48, %v3608_v55  ;;  %v533_v5 = vrot.slane %v1992_v39, %v3608_v55 }
 0x14f   :  { %v2806_v8 = vmul.f32 %v444_v53, %v432_v60  ;;  %v375_v53 = vmul.f32 %v370_v18, %v2529_v26  ;;  %v376_v60 = vmul.f32 %v374_v47, %v2529_v26  ;;  %v404_v39 = vrot.slane %v2731_v48, %v3613_v61  ;;  %v2840_v47 = vpop.permute.xlu1 %874 }
 0x150   :  { %v389_v18 = vmul.f32 %v384_v33, %v2464_v9  ;;  %v390_v26 = vmul.f32 %v388_v62, %v2464_v9  ;;  %3629 = vst [vmem:[#allocation32_spill] sm:$0xff] %v2840_v47  ;;  %v2870_v9 = vmul.f32 %v533_v5, %v521_v43  ;;  %v611_v43 = vsel %vm609_vm8, %v2645_v31, %v2635_v4 }
 0x151   :  { %1564 = vrot.lane.b32.xlu1 %v2557_v51, %s2130_s24  ;;  %v2764_v30 = vpop.permute.xlu0 %855  ;;  %v463_v33 = vrot.slane %v2806_v8, %v3607_v21  ;;  %v477_v10 = vrot.slane %v2806_v8, %v3608_v55  ;;  %v406_v46 = vmul.f32 %v404_v39, %v2471_v11  ;;  %v493_v5 = vrot.slane %v2806_v8, %v3613_v61 }
 0x152   :  { %3626 = vst [vmem:[#allocation29_spill] sm:$0xff] %v2764_v30  ;;  %v2804_v30 = vmul.f32 %v440_v32, %v433_v24  ;;  %v400_v24 = vrot.slane %v2729_v23, %v3613_v61  ;;  %v391_v47 = vadd.f32 %v389_v18, %v375_v53  ;;  %v392_v59 = vadd.f32 %v390_v26, %v376_v60 }
 0x153   :  { %v465_v39 = vmul.f32 %v463_v33, %v2538_v42  ;;  %v479_v53 = vmul.f32 %v477_v10, %v2477_v15  ;;  %v552_v60 = vrot.slane %v2870_v9, %v3607_v21  ;;  %v495_v18 = vmul.f32 %v493_v5, %v2483_v16 }
 0x154   :  { %v473_v62 = vrot.slane %v2804_v30, %v3608_v55  ;;  %v405_v28 = vmul.f32 %v400_v24, %v2471_v11  ;;  %v566_v24 = vrot.slane %v2870_v9, %v3608_v55 }
 0x155   :  { %1671 = vperm.xlu1 %2081, %v2512_v2   ;;  %v2822_v32 = vpop.permute.xlu0 %944  ;;  %v481_v6 = vadd.f32 %v479_v53, %v465_v39 }
 0x156   :  { %3628 = vst [vmem:[#allocation31_spill] sm:$0xff] %v2822_v32  ;;  %v522_v32 = vsel %vm520_vm7, %v2626_v1, %v2615_v38  ;;  %v459_v1 = vrot.slane %v2804_v30, %v3607_v21 }
 0x157   :  { %v2868_v38 = vmul.f32 %v529_v63, %v522_v32  ;;  %v489_v63 = vrot.slane %v2804_v30, %v3613_v61  ;;  %v478_v32 = vmul.f32 %v473_v62, %v2477_v15  ;;  %v2912_v15 = vmul.f32 %v622_v7, %v611_v43 }
 0x158   :  { %v464_v11 = vmul.f32 %v459_v1, %v2538_v42  ;;  %v3630_v1 = vrot.slane %v2547_v19, %v3607_v21  ;;  %v3631_v62 = vrot.slane %v2557_v51, %v3607_v21  ;;  %v2930_v7 = vadd.f32 %v405_v28, %v391_v47 }
 0x159   :  { %2082 = vset.pattern.permute.xlu1 %v3598_v41  ;;  %v2865_v27 = vpop.permute.xlu0 %1201  ;;  %v562_v42 = vrot.slane %v2868_v38, %v3608_v55  ;;  %v494_v26 = vmul.f32 %v489_v63, %v2483_v16  ;;  %v554_v28 = vmul.f32 %v552_v60, %v2553_v50  ;;  %v641_v63 = vrot.slane %v2912_v15, %v3607_v21 }
 0x15a   :  { %1685 = vperm.xlu1 %2082, %v2512_v2   ;;  %v610_v2 = vsel %vm609_vm8, %v2635_v4, %v2645_v31  ;;  %v548_v4 = vrot.slane %v2868_v38, %v3607_v21  ;;  %v2922_v33 = vmul.f32 %v3630_v1, %v2609_v17  ;;  %v480_v35 = vadd.f32 %v478_v32, %v464_v11 }
 0x15b   :  { %v2910_v10 = vmul.f32 %v618_v57, %v610_v2  ;;  %v2928_v57 = vmul.f32 %v3631_v62, %v2609_v17  ;;  %v2932_v2 = vadd.f32 %v406_v46, %v392_v59  ;;  %v567_v46 = vmul.f32 %v562_v42, %v2489_v58 }
 0x15c   :  { %v2878_v14 = vpop.permute.xlu1 %912  ;;  %v553_v17 = vmul.f32 %v548_v4, %v2553_v50  ;;  %v568_v59 = vmul.f32 %v566_v24, %v2489_v58  ;;  %v699_v16 = vsel %vm698_vm9, %v2657_v52, %v2668_v56  ;;  %v700_v50 = vsel %vm698_vm9, %v2668_v56, %v2657_v52 }
 0x15d   :  { %v2899_v31 = vpop.permute.xlu0 %1287  ;;  %v637_v47 = vrot.slane %v2910_v10, %v3607_v21  ;;  %v651_v5 = vrot.slane %v2910_v10, %v3608_v55  ;;  %v655_v58 = vrot.slane %v2912_v15, %v3608_v55  ;;  %v2966_v32 = vadd.f32 %v494_v26, %v480_v35 }
 0x15e   :  { %1648 = vrot.lane.b32.xlu1 %v2547_v19, %s2131_s25  ;;  %v2968_v53 = vadd.f32 %v495_v18, %v481_v6  ;;  %v578_v4 = vrot.slane %v2868_v38, %v3613_v61  ;;  %v582_v52 = vrot.slane %v2870_v9, %v3613_v61  ;;  %v3633_v42 = vrot.slane %v2785_v45, %v3607_v21 }
 0x15f   :  { %2083 = vset.pattern.permute.xlu1 %v3597_v37  ;;  %v3634_v35 = vrot.slane %v2785_v45, %v3608_v55  ;;  %v569_v18 = vadd.f32 %v567_v46, %v553_v17  ;;  %v570_v26 = vadd.f32 %v568_v59, %v554_v28  ;;  %v642_v62 = vmul.f32 %v637_v47, %v2564_v44 }
 0x160   :  { %v2982_v24 = vmul.f32 %v3633_v42, %v699_v16  ;;  %v643_v39 = vmul.f32 %v641_v63, %v2564_v44  ;;  %v667_v11 = vrot.slane %v2910_v10, %v3613_v61  ;;  %v788_v16 = vsel %vm787_vm10, %v2675_v13, %v2710_v36 }
 0x161   :  { %v2934_v43 = vpop.permute.xlu1 %928  ;;  %v2940_v1 = vpop.permute.xlu0 %1373  ;;  %v2987_v6 = vmul.f32 %v3634_v35, %v700_v50  ;;  %v789_v45 = vsel %vm787_vm10, %v2710_v36, %v2675_v13  ;;  %v656_v17 = vmul.f32 %v651_v5, %v2506_v20  ;;  %v657_v44 = vmul.f32 %v655_v58, %v2506_v20 }
 0x162   :  { %1650 = vrot.lane.b32.xlu1 %v2557_v51, %s2131_s25  ;;  %v583_v28 = vmul.f32 %v578_v4, %v2496_v40  ;;  %v584_v46 = vmul.f32 %v582_v52, %v2496_v40  ;;  %v594_v59 = vrot.slane %v2868_v38, %v3614_v49  ;;  %v598_v47 = vrot.slane %v2870_v9, %v3614_v49 }
 0x163   :  { %v726_v13 = vrot.slane %v2982_v24, %v3607_v21  ;;  %v730_v20 = vrot.slane %v2987_v6, %v3607_v21  ;;  %v740_v36 = vrot.slane %v2982_v24, %v3608_v55  ;;  %v744_v40 = vrot.slane %v2987_v6, %v3608_v55 }
 0x164   :  { %v3636_v9 = vrot.slane %v2815_v29, %v3607_v21  ;;  %v3637_v5 = vrot.slane %v2815_v29, %v3608_v55  ;;  %v585_v4 = vadd.f32 %v583_v28, %v569_v18  ;;  %v586_v52 = vadd.f32 %v584_v46, %v570_v26 }
 0x165   :  { %v2977_v60 = vpop.permute.xlu0 %1459  ;;  %v658_v42 = vadd.f32 %v656_v17, %v642_v62  ;;  %v659_v35 = vadd.f32 %v657_v44, %v643_v39  ;;  %v3639_v29 = vrot.slane %v2731_v48, %v3614_v49  ;;  %v756_v18 = vrot.slane %v2982_v24, %v3613_v61 }
 0x166   :  { %v2974_v56 = vpop.permute.xlu1 %969  ;;  %1757 = vperm.xlu1 %2083, %v2523_v3   ;;  %3632 = vst [vmem:[#allocation33_spill] sm:$0xff] %v2977_v60  ;;  %v671_v60 = vrot.slane %v2912_v15, %v3613_v61  ;;  %v3028_v50 = vmul.f32 %v3636_v9, %v788_v16  ;;  %v3033_v58 = vmul.f32 %v3637_v5, %v789_v45 }
 0x167   :  { %v3638_v16 = vrot.slane %v2729_v23, %v3614_v49  ;;  %v422_v45 = vmul.f32 %v3639_v29, %v2666_v34  ;;  %v760_v39 = vrot.slane %v2987_v6, %v3613_v61  ;;  %v745_v23 = vmul.f32 %v740_v36, %v2534_v12  ;;  %v3640_v36 = vld [vmem:[#allocation20_spill] sm:$0xff] }
 0x168   :  { %v819_v48 = vrot.slane %v3033_v58, %v3607_v21  ;;  %v829_v62 = vrot.slane %v3028_v50, %v3608_v55  ;;  %v833_v17 = vrot.slane %v3033_v58, %v3608_v55  ;;  %v683_v28 = vrot.slane %v2910_v10, %v3614_v49 }
 0x169   :  { %v3012_v63 = vpop.permute.xlu0 %1545  ;;  %v421_v9 = vmul.f32 %v3638_v16, %v2666_v34  ;;  %v815_v34 = vrot.slane %v3028_v50, %v3607_v21  ;;  %v687_v46 = vrot.slane %v2912_v15, %v3614_v49 }
 0x16a   :  { %2084 = vset.pattern.permute.xlu1 %v3598_v41  ;;  %3635 = vst [vmem:[#allocation34_spill] sm:$0xff] %v3012_v63  ;;  %v672_v63 = vmul.f32 %v667_v11, %v2526_v22  ;;  %v732_v11 = vmul.f32 %v730_v20, %v2572_v25  ;;  %v3077_v20 = vadd.f32 %v422_v45, %v2932_v2  ;;  %v3645_v2 = vld [vmem:[#allocation16_spill] sm:$0xff]  ;;  %v3647_v45 = vld [vmem:[#allocation21_spill] sm:$0xff] }
 0x16b   :  { %v3022_v38 = vpop.permute.xlu1 %983  ;;  %1771 = vperm.xlu1 %2084, %v2523_v3   ;;  %v673_v3 = vmul.f32 %v671_v60, %v2526_v22  ;;  %v731_v22 = vmul.f32 %v726_v13, %v2572_v25  ;;  %v746_v60 = vmul.f32 %v744_v40, %v2534_v12  ;;  %v3074_v13 = vadd.f32 %v421_v9, %v2930_v7  ;;  %v3646_v9 = vld [vmem:[#allocation7_spill] sm:$0xff] }
 0x16c   :  { %v674_v12 = vadd.f32 %v672_v63, %v658_v42  ;;  %v3641_v40 = vrot.slane %v2804_v30, %v3614_v49  ;;  %v820_v16 = vmul.f32 %v815_v34, %v3645_v2  ;;  %v821_v30 = vmul.f32 %v819_v48, %v3645_v2  ;;  %v3649_v48 = vld [vmem:[#allocation22_spill] sm:$0xff]  ;;  %v3653_v2 = vld [vmem:[#allocation5_spill] sm:$0xff] }
 0x16d   :  { %v3050_v26 = vpop.permute.xlu0 %1631  ;;  %v675_v44 = vadd.f32 %v673_v3, %v659_v35  ;;  %v747_v42 = vadd.f32 %v745_v23, %v731_v22  ;;  %v748_v15 = vadd.f32 %v746_v60, %v732_v11  ;;  %v3644_v35 = vld [vmem:[#allocation6_spill] sm:$0xff]  ;;  %v834_v29 = vmul.f32 %v829_v62, %v3646_v9 }
 0x16e   :  { %v510_v5 = vmul.f32 %v3641_v40, %v3640_v36  ;;  %v761_v7 = vmul.f32 %v756_v18, %v3644_v35  ;;  %v762_v3 = vmul.f32 %v760_v39, %v3644_v35  ;;  %v600_v22 = vmul.f32 %v598_v47, %v3647_v45  ;;  %v3650_v40 = vld [vmem:[#allocation32_spill] sm:$0xff] }
 0x16f   :  { %1734 = vrot.lane.b32.xlu1 %v2547_v19, %s2132_s26  ;;  %v845_v18 = vrot.slane %v3028_v50, %v3613_v61  ;;  %v849_v39 = vrot.slane %v3033_v58, %v3613_v61  ;;  %v772_v34 = vrot.slane %v2982_v24, %v3614_v49  ;;  %v688_v62 = vmul.f32 %v683_v28, %v3649_v48  ;;  %v3652_v24 = vld [vmem:[#allocation15_spill] sm:$0xff] }
 0x170   :  { %v3066_v25 = vpop.permute.xlu1 %1015  ;;  %2085 = vset.pattern.permute.xlu1 %v3597_v37  ;;  %v3642_v37 = vrot.slane %v2806_v8, %v3614_v49  ;;  %v835_v8 = vmul.f32 %v833_v17, %v3646_v9  ;;  %v3106_v23 = vadd.f32 %v510_v5, %v2966_v32  ;;  %v689_v17 = vmul.f32 %v687_v46, %v3649_v48  ;;  %v3654_v48 = vld [vmem:[#allocation30_spill] sm:$0xff] }
 0x171   :  { %v3087_v10 = vpop.permute.xlu0 %1717  ;;  %v3128_v5 = vadd.f32 %v761_v7, %v747_v42  ;;  %v3134_v46 = vadd.f32 %v600_v22, %v586_v52  ;;  %v850_v9 = vmul.f32 %v845_v18, %v3653_v2  ;;  %v3656_v42 = vrot.slane %v3654_v48, %v3608_v55 }
 0x172   :  { %v511_v63 = vmul.f32 %v3642_v37, %v3640_v36  ;;  %3643 = vst [vmem:[#allocation20_spill] sm:$0xff] %v3087_v10  ;;  %v599_v36 = vmul.f32 %v594_v59, %v3647_v45  ;;  %v776_v59 = vrot.slane %v2987_v6, %v3614_v49  ;;  %v3651_v37 = vld [vmem:[#allocation28_spill] sm:$0xff]  ;;  %v3130_v6 = vadd.f32 %v762_v3, %v748_v15 }
 0x173   :  { %1736 = vrot.lane.b32.xlu1 %v2557_v51, %s2132_s26  ;;  %v877_v32 = vsel %vm876_vm11, %v3651_v37, %v3650_v40  ;;  %v837_v28 = vadd.f32 %v835_v8, %v821_v30  ;;  %v851_v45 = vmul.f32 %v849_v39, %v3653_v2  ;;  %v865_v52 = vrot.slane %v3033_v58, %v3614_v49  ;;  %v3659_v39 = vld [vmem:[#allocation12_spill] sm:$0xff]  ;;  %v3664_v2 = vld [vmem:[#allocation25_spill] sm:$0xff] }
 0x174   :  { %v3109_v60 = vadd.f32 %v511_v63, %v2968_v53  ;;  %v878_v53 = vsel %vm876_vm11, %v3650_v40, %v3651_v37  ;;  %v836_v63 = vadd.f32 %v834_v29, %v820_v16  ;;  %v3132_v35 = vadd.f32 %v599_v36, %v585_v4 }
 0x175   :  { %v3103_v11 = vpop.permute.xlu1 %1032  ;;  %v3115_v47 = vpop.permute.xlu0 %1803  ;;  %v3146_v15 = vmul.f32 %v3656_v42, %v878_v53  ;;  %v861_v4 = vrot.slane %v3028_v50, %v3614_v49  ;;  %v3152_v3 = vadd.f32 %v688_v62, %v674_v12  ;;  %v3154_v16 = vadd.f32 %v689_v17, %v675_v44  ;;  %v3663_v17 = vld [vmem:[#allocation23_spill] sm:$0xff] }
 0x176   :  { %3648 = vst [vmem:[#allocation6_spill] sm:$0xff] %v3115_v47  ;;  %v3655_v47 = vrot.slane %v3654_v48, %v3607_v21  ;;  %v3657_v30 = vrot.slane %v2547_v19, %v3608_v55  ;;  %v3658_v8 = vrot.slane %v2557_v51, %v3608_v55  ;;  %v852_v50 = vadd.f32 %v850_v9, %v836_v63 }
 0x177   :  { %1843 = vperm.xlu1 %2085, %v3652_v24   ;;  %v853_v18 = vadd.f32 %v851_v45, %v837_v28  ;;  %v3660_v58 = vrot.slane %v3659_v39, %v3613_v61  ;;  %v777_v37 = vmul.f32 %v772_v34, %v3663_v17  ;;  %v908_v28 = vrot.slane %v3146_v15, %v3607_v21  ;;  %v3665_v45 = vld [vmem:[#allocation27_spill] sm:$0xff] }
 0x178   :  { %v3141_v40 = vmul.f32 %v3655_v47, %v877_v32  ;;  %v3661_v47 = vld [vmem:[#allocation13_spill] sm:$0xff]  ;;  %v778_v32 = vmul.f32 %v776_v59, %v3663_v17  ;;  %v922_v34 = vrot.slane %v3146_v15, %v3608_v55  ;;  %v3669_v39 = vrot.slane %v2557_v51, %v3613_v61 }
 0x179   :  { %v3662_v44 = vrot.slane %v3661_v47, %v3613_v61 }
 0x17a   :  { %v1170_v7 = vpop.permute.xlu1 %1169  ;;  %v212_v22 = vpop.permute.xlu0 %211  ;;  %v904_v63 = vrot.slane %v3141_v40, %v3607_v21  ;;  %v918_v42 = vrot.slane %v3141_v40, %v3608_v55 }
 0x17b   :  { %v1180_v29 = vmul.f32 %v3657_v30, %v1170_v7  ;;  %v1181_v36 = vmul.f32 %v3658_v8, %v1170_v7  ;;  %2086 = vset.pattern.permute.xlu1 %v3598_v41  ;;  %v222_v12 = vmul.f32 %v3660_v58, %v212_v22  ;;  %v223_v62 = vmul.f32 %v3662_v44, %v212_v22  ;;  %v3666_v7 = vld [vmem:[#allocation24_spill] sm:$0xff] }
 0x17c   :  { %1857 = vperm.xlu1 %2086, %v3652_v24   ;;  %v3671_v44 = vrot.slane %v2557_v51, %v3614_v49  ;;  %v923_v17 = vmul.f32 %v918_v42, %v2878_v14  ;;  %v3675_v42 = vld [vmem:[#allocation9_spill] sm:$0xff] }
 0x17d   :  { %v1182_v53 = vadd.f32 %v1180_v29, %v2922_v33  ;;  %v1183_v41 = vadd.f32 %v1181_v36, %v2928_v57  ;;  %v224_v9 = vadd.f32 %v222_v12, %v3664_v2  ;;  %v225_v48 = vadd.f32 %v223_v62, %v3665_v45  ;;  %v3667_v29 = vld [vmem:[#allocation26_spill] sm:$0xff] }
 0x17e   :  { %v934_v33 = vrot.slane %v3141_v40, %v3613_v61  ;;  %v938_v57 = vrot.slane %v3146_v15, %v3613_v61  ;;  %v3668_v36 = vrot.slane %v2547_v19, %v3613_v61  ;;  %v3670_v12 = vrot.slane %v2547_v19, %v3614_v49  ;;  %v3673_v45 = vld [vmem:[#allocation14_spill] sm:$0xff] }
 0x17f   :  { %v1186_v59 = vpop.permute.xlu1 %1185  ;;  %v240_v30 = vadd.f32 %v3666_v7, %v224_v9  ;;  %v241_v8 = vadd.f32 %v3667_v29, %v225_v48  ;;  %v1213_v62 = vmul.f32 %v3671_v44, %v2865_v27  ;;  %v924_v2 = vmul.f32 %v922_v34, %v2878_v14  ;;  %v3676_v14 = vld [vmem:[#allocation10_spill] sm:$0xff] }
 0x180   :  { %v1196_v22 = vmul.f32 %v3668_v36, %v1186_v59  ;;  %v1197_v58 = vmul.f32 %v3669_v39, %v1186_v59  ;;  %1820 = vrot.lane.b32.xlu1 %v2547_v19, %s2133_s5  ;;  %v1212_v47 = vmul.f32 %v3670_v12, %v2865_v27  ;;  %v3672_v9 = vmov 3   ;;  %v3674_v36 = vld [vmem:[#allocation17_spill] sm:$0xff] }
 0x181   :  { %2088 = vset.pattern.permute.xlu1 %v3672_v9  ;;  %v247_v48 = vadd.f32 %v3673_v45, %v240_v30  ;;  %v248_v59 = vadd.f32 %v3673_v45, %v241_v8  ;;  %v909_v19 = vmul.f32 %v904_v63, %v3674_v36  ;;  %v910_v39 = vmul.f32 %v908_v28, %v3674_v36 }
 0x182   :  { %v1198_v7 = vadd.f32 %v1196_v22, %v1182_v53  ;;  %v1199_v29 = vadd.f32 %v1197_v58, %v1183_v41  ;;  %v939_v12 = vmul.f32 %v934_v33, %v2934_v43  ;;  %v940_v27 = vmul.f32 %v938_v57, %v2934_v43  ;;  %v3677_v53 = vld [vmem:[#allocation29_spill] sm:$0xff] }
 0x183   :  { %v1219_v44 = vpop.permute.xlu1 %1218  ;;  %v336_v10 = vadd.f32 %v3675_v42, %v247_v48  ;;  %v337_v34 = vadd.f32 %v3676_v14, %v248_v59  ;;  %v866_v41 = vmul.f32 %v861_v4, %v3677_v53  ;;  %v867_v63 = vmul.f32 %v865_v52, %v3677_v53 }
 0x184   :  { %v3217_v9 = vadd.f32 %v1212_v47, %v1198_v7  ;;  %v3219_v30 = vadd.f32 %v1213_v62, %v1199_v29  ;;  %1822 = vrot.lane.b32.xlu1 %v2557_v51, %s2133_s5  ;;  %v925_v28 = vadd.f32 %v923_v17, %v909_v19  ;;  %v926_v33 = vadd.f32 %v924_v2, %v910_v39  ;;  %v3681_v39 = vld [vmem:[#allocation11_spill] sm:$0xff] }
 0x185   :  { %v950_v43 = vrot.slane %v3141_v40, %v3614_v49  ;;  %v954_v57 = vrot.slane %v3146_v15, %v3614_v49  ;;  %v425_v8 = vadd.f32 %v3074_v13, %v336_v10  ;;  %v426_v22 = vadd.f32 %v3077_v20, %v337_v34 }
 0x186   :  { %v779_v58 = vadd.f32 %v777_v37, %v3128_v5  ;;  %v780_v51 = vadd.f32 %v778_v32, %v3130_v6  ;;  %v941_v47 = vadd.f32 %v939_v12, %v925_v28  ;;  %v942_v4 = vadd.f32 %v940_v27, %v926_v33  ;;  %v3680_v37 = vld [vmem:[#allocation31_spill] sm:$0xff] }
 0x187   :  { %v1221_v62 = vpop.permute.xlu1 %1220  ;;  %v514_v52 = vadd.f32 %v3106_v23, %v425_v8  ;;  %v515_v17 = vadd.f32 %v3109_v60, %v426_v22  ;;  %v868_v13 = vadd.f32 %v866_v41, %v852_v50  ;;  %v869_v20 = vadd.f32 %v867_v63, %v853_v18 }
 0x188   :  { %v1222_v40 = vsel %vm255_vm4, %v1219_v44, %v1221_v62  ;;  %v1223_v15 = vsel %vm255_vm4, %v1221_v62, %v1219_v44  ;;  %1889 = vperm.xlu1 %2088, %v3652_v24   ;;  %v3678_v10 = vrot.slane %v2845_v54, %v3607_v21  ;;  %v3679_v6 = vrot.slane %v2845_v54, %v3608_v55  ;;  %v2005_v62 = vld [vmem:[%s3525_s1 + $0x1] ss:$8 sm:$0x3] }
 0x189   :  { %v955_v60 = vmul.f32 %v950_v43, %v3680_v37  ;;  %v956_v32 = vmul.f32 %v954_v57, %v3680_v37  ;;  %v603_v2 = vadd.f32 %v3132_v35, %v514_v52  ;;  %v604_v48 = vadd.f32 %v3134_v46, %v515_v17 }
 0x18a   :  { %v1236_v5 = vmul.f32 %v3678_v10, %v1223_v15  ;;  %v1237_v23 = vmul.f32 %v3679_v6, %v1222_v40  ;;  %v1217_v15 = vadd.f32 %v3219_v30, %v3673_v45  ;;  %v1315_v6 = vrot.slane %v2005_v62, %v3607_v21 }
 0x18b   :  { %v1256_v7 = vpop.permute.xlu1 %1255  ;;  %v957_v29 = vadd.f32 %v955_v60, %v941_v47  ;;  %v958_v54 = vadd.f32 %v956_v32, %v942_v4  ;;  %v692_v36 = vadd.f32 %v3152_v3, %v603_v2  ;;  %v693_v19 = vadd.f32 %v3154_v16, %v604_v48 }
 0x18c   :  { %v1247_v24 = vrot.slane %v1236_v5, %v3607_v21  ;;  %v1251_v50 = vrot.slane %v1237_v23, %v3607_v21  ;;  %v1261_v18 = vrot.slane %v1236_v5, %v3608_v55  ;;  %v1265_v59 = vrot.slane %v1237_v23, %v3608_v55 }
 0x18d   :  { %v781_v44 = vadd.f32 %v779_v58, %v692_v36  ;;  %v782_v42 = vadd.f32 %v780_v51, %v693_v19  ;;  %v1293_v14 = vrot.slane %v1236_v5, %v3614_v49  ;;  %v1297_v34 = vrot.slane %v1237_v23, %v3614_v49 }
 0x18e   :  { %v1252_v12 = vmul.f32 %v1247_v24, %v3681_v39  ;;  %v1253_v35 = vmul.f32 %v1251_v50, %v3681_v39  ;;  %v1266_v46 = vmul.f32 %v1261_v18, %v1256_v7  ;;  %v1267_v27 = vmul.f32 %v1265_v59, %v1256_v7  ;;  %v3283_v24 = vpop.permute.xlu0 %999 }
 0x18f   :  { %v1277_v63 = vrot.slane %v1236_v5, %v3613_v61  ;;  %v1281_v3 = vrot.slane %v1237_v23, %v3613_v61  ;;  %v1298_v16 = vmul.f32 %v1293_v14, %v2899_v31  ;;  %v1299_v33 = vmul.f32 %v1297_v34, %v2899_v31 }
 0x190   :  { %v1268_v53 = vadd.f32 %v1266_v46, %v1252_v12  ;;  %v1269_v41 = vadd.f32 %v1267_v27, %v1253_v35  ;;  %v1272_v28 = vpop.permute.xlu1 %1271  ;;  %v870_v43 = vadd.f32 %v868_v13, %v781_v44  ;;  %v871_v57 = vadd.f32 %v869_v20, %v782_v42 }
 0x191   :  { %v1282_v8 = vmul.f32 %v1277_v63, %v1272_v28  ;;  %v1283_v22 = vmul.f32 %v1281_v3, %v1272_v28  ;;  %v1216_v31 = vadd.f32 %v3217_v9, %v3673_v45  ;;  %v1319_v23 = vrot.slane %v2005_v62, %v3608_v55 }
 0x192   :  { %v959_v58 = vadd.f32 %v957_v29, %v870_v43  ;;  %v960_v51 = vadd.f32 %v958_v54, %v871_v57 }
 0x193   :  { %v1284_v47 = vadd.f32 %v1282_v8, %v1268_v53  ;;  %v1285_v4 = vadd.f32 %v1283_v22, %v1269_v41 }
 0x194   :  { %v1305_v52 = vpop.permute.xlu1 %1304  ;;  %vm961_vm12 = vcmp.ge.f32.partialorder %v959_v58, 0.0  ;;  %vm962_vm13 = vcmp.ge.f32.partialorder %v960_v51, 0.0  ;;  %v963_v17 = vmul.f32 0.01, %v959_v58  ;;  %v964_v40 = vmul.f32 0.01, %v960_v51 }
 0x195   :  { %v1300_v13 = vadd.f32 %v1298_v16, %v1284_v47  ;;  %v1301_v20 = vadd.f32 %v1299_v33, %v1285_v4 }
 0x196   :  { %v965_v10 = vsel %vm961_vm12, %v959_v58, %v963_v17  ;;  %v966_v5 = vsel %vm962_vm13, %v960_v51, %v964_v40  ;;  %v3682_v58 = vld [vmem:[#allocation8_spill] sm:$0xff] }
 0x197   :  { %v3273_v37 = vadd.f32 %v1300_v13, %v1216_v31  ;;  %v3275_v60 = vadd.f32 %v1301_v20, %v1217_v15  ;;  %v975_v32 = vrot.slane %v965_v10, %v3607_v21  ;;  %v979_v2 = vrot.slane %v966_v5, %v3607_v21 }
 0x198   :  { %v989_v9 = vrot.slane %v965_v10, %v3608_v55  ;;  %v993_v45 = vrot.slane %v966_v5, %v3608_v55  ;;  %v1005_v30 = vrot.slane %v965_v10, %v3613_v61  ;;  %v1009_v48 = vrot.slane %v966_v5, %v3613_v61  ;;  %v1307_v50 = vpop.permute.xlu1 %1306 }
 0x199   :  { %v980_v18 = vmul.f32 %v975_v32, %v2974_v56  ;;  %v981_v59 = vmul.f32 %v979_v2, %v2974_v56  ;;  %v1021_v7 = vrot.slane %v965_v10, %v3614_v49  ;;  %v1025_v29 = vrot.slane %v966_v5, %v3614_v49  ;;  %v2007_v32 = vld [vmem:[%s3525_s1 + $0x2] ss:$8 sm:$0x3] }
 0x19a   :  { %v994_v54 = vmul.f32 %v989_v9, %v3022_v38  ;;  %v995_v36 = vmul.f32 %v993_v45, %v3022_v38  ;;  %v1010_v19 = vmul.f32 %v1005_v30, %v3283_v24  ;;  %v1011_v39 = vmul.f32 %v1009_v48, %v3283_v24 }
 0x19b   :  { %v1308_v12 = vsel %vm342_vm5, %v1305_v52, %v1307_v50  ;;  %v1309_v35 = vsel %vm342_vm5, %v1307_v50, %v1305_v52  ;;  %v1026_v34 = vmul.f32 %v1021_v7, %v3066_v25  ;;  %v1027_v53 = vmul.f32 %v1025_v29, %v3066_v25 }
 0x19c   :  { %v996_v46 = vadd.f32 %v994_v54, %v980_v18  ;;  %v997_v27 = vadd.f32 %v995_v36, %v981_v59  ;;  %v1322_v44 = vmul.f32 %v1315_v6, %v1309_v35  ;;  %v1323_v42 = vmul.f32 %v1319_v23, %v1308_v12  ;;  %v1342_v14 = vpop.permute.xlu1 %1341 }
 0x19d   :  { %v1401_v59 = vrot.slane %v2007_v32, %v3607_v21  ;;  %v1405_v7 = vrot.slane %v2007_v32, %v3608_v55 }
 0x19e   :  { %v1012_v41 = vadd.f32 %v1010_v19, %v996_v46  ;;  %v1013_v63 = vadd.f32 %v1011_v39, %v997_v27  ;;  %v1333_v3 = vrot.slane %v1322_v44, %v3607_v21  ;;  %v1337_v28 = vrot.slane %v1323_v42, %v3607_v21  ;;  %v2091_v19 = vld [vmem:[%s3524_s0 + $0x8] sm:$0xff] }
 0x19f   :  { %v1347_v16 = vrot.slane %v1322_v44, %v3608_v55  ;;  %v1351_v33 = vrot.slane %v1323_v42, %v3608_v55  ;;  %v1363_v43 = vrot.slane %v1322_v44, %v3613_v61  ;;  %v1367_v57 = vrot.slane %v1323_v42, %v3613_v61 }
 0x1a0   :  { %v1028_v8 = vadd.f32 %v1026_v34, %v1012_v41  ;;  %v1029_v22 = vadd.f32 %v1027_v53, %v1013_v63  ;;  %v1338_v51 = vmul.f32 %v1333_v3, %v3682_v58  ;;  %v1339_v47 = vmul.f32 %v1337_v28, %v3682_v58  ;;  %v3683_v63 = vld [vmem:[#allocation18_spill] sm:$0xff] }
 0x1a1   :  { %v1352_v4 = vmul.f32 %v1347_v16, %v1342_v14  ;;  %v1353_v62 = vmul.f32 %v1351_v33, %v1342_v14  ;;  %v1379_v52 = vrot.slane %v1322_v44, %v3614_v49  ;;  %v1383_v17 = vrot.slane %v1323_v42, %v3614_v49  ;;  %v1358_v40 = vpop.permute.xlu1 %1357 }
 0x1a2   :  { %v1035_v31 = vadd.f32 %v3103_v11, %v1028_v8  ;;  %v1036_v15 = vadd.f32 %v3103_v11, %v1029_v22  ;;  %v1368_v13 = vmul.f32 %v1363_v43, %v1358_v40  ;;  %v1369_v20 = vmul.f32 %v1367_v57, %v1358_v40  ;;  %v3684_v40 = vld [vmem:[#allocation33_spill] sm:$0xff] }
 0x1a3   :  { %v1354_v10 = vadd.f32 %v1352_v4, %v1338_v51  ;;  %v1355_v5 = vadd.f32 %v1353_v62, %v1339_v47  ;;  %v1384_v6 = vmul.f32 %v1379_v52, %v2940_v1  ;;  %v1385_v23 = vmul.f32 %v1383_v17, %v2940_v1  ;;  %v2090_v1 = vld [vmem:[%s3524_s0] sm:$0xff] }
 0x1a4   :  { %vm1037_vm14 = vcmp.ge.f32.partialorder %v1035_v31, 0.0  ;;  %vm1038_vm15 = vcmp.ge.f32.partialorder %v1036_v15, 0.0  ;;  %v1039_v2 = vmul.f32 0.01, %v1035_v31  ;;  %v1040_v9 = vmul.f32 0.01, %v1036_v15 }
 0x1a5   :  { %v1370_v45 = vadd.f32 %v1368_v13, %v1354_v10  ;;  %v1371_v30 = vadd.f32 %v1369_v20, %v1355_v5  ;;  %v1391_v48 = vpop.permute.xlu1 %1390 }
 0x1a6   :  { %v1041_v50 = vsel %vm1037_vm14, %v1035_v31, %v1039_v2  ;;  %v1042_v18 = vsel %vm1038_vm15, %v1036_v15, %v1040_v9 }
 0x1a7   :  { %v1386_v29 = vadd.f32 %v1384_v6, %v1370_v45  ;;  %v1387_v54 = vadd.f32 %v1385_v23, %v1371_v30  ;;  %v1043_v36 = vadd.f32 %v2090_v1, %v1041_v50  ;;  %v1044_v39 = vadd.f32 %v2091_v19, %v1042_v18  ;;  %v2009_v23 = vld [vmem:[%s3525_s1 + $0x3] ss:$8 sm:$0x3] }
 0x1a8   :  { %v1487_v2 = vrot.slane %v2009_v23, %v3607_v21  ;;  %v1491_v9 = vrot.slane %v2009_v23, %v3608_v55 }
 0x1a9   :  { %v1388_v12 = vadd.f32 %v1386_v29, %v3273_v37  ;;  %v1389_v35 = vadd.f32 %v1387_v54, %v3275_v60  ;;  %v1393_v46 = vpop.permute.xlu1 %1392  ;;  %1045 = vst [vmem:[#allocation2] sm:$0xff] %v1043_v36  ;;  %1046 = vst [vmem:[#allocation2 + $0x8] sm:$0xff] %v1044_v39 }
 0x1aa   :  { %v1394_v27 = vsel %vm431_vm6, %v1391_v48, %v1393_v46  ;;  %v1395_v44 = vsel %vm431_vm6, %v1393_v46, %v1391_v48  ;;  %v3685_v46 = vld [vmem:[#allocation19_spill] sm:$0xff] }
 0x1ab   :  { %v1408_v42 = vmul.f32 %v1401_v59, %v1395_v44  ;;  %v1409_v14 = vmul.f32 %v1405_v7, %v1394_v27 }
 0x1ad   :  { %v1419_v34 = vrot.slane %v1408_v42, %v3607_v21  ;;  %v1423_v53 = vrot.slane %v1409_v14, %v3607_v21  ;;  %v1433_v41 = vrot.slane %v1408_v42, %v3608_v55  ;;  %v1437_v37 = vrot.slane %v1409_v14, %v3608_v55  ;;  %v1428_v60 = vpop.permute.xlu1 %1427 }
 0x1ae   :  { %v1449_v43 = vrot.slane %v1408_v42, %v3613_v61  ;;  %v1453_v57 = vrot.slane %v1409_v14, %v3613_v61  ;;  %v1465_v58 = vrot.slane %v1408_v42, %v3614_v49  ;;  %v1469_v51 = vrot.slane %v1409_v14, %v3614_v49 }
 0x1af   :  { %v1424_v3 = vmul.f32 %v1419_v34, %v3683_v63  ;;  %v1425_v28 = vmul.f32 %v1423_v53, %v3683_v63  ;;  %v1438_v16 = vmul.f32 %v1433_v41, %v1428_v60  ;;  %v1439_v33 = vmul.f32 %v1437_v37, %v1428_v60  ;;  %v3686_v63 = vld [vmem:[#allocation34_spill] sm:$0xff] }
 0x1b0   :  { %v1470_v31 = vmul.f32 %v1465_v58, %v3684_v40  ;;  %v1471_v15 = vmul.f32 %v1469_v51, %v3684_v40 }
 0x1b1   :  { %v1440_v8 = vadd.f32 %v1438_v16, %v1424_v3  ;;  %v1441_v22 = vadd.f32 %v1439_v33, %v1425_v28 }
 0x1b2   :  { %v1444_v47 = vpop.permute.xlu1 %1443 }
 0x1b3   :  { %v1454_v4 = vmul.f32 %v1449_v43, %v1444_v47  ;;  %v1455_v62 = vmul.f32 %v1453_v57, %v1444_v47 }
 0x1b5   :  { %v1456_v52 = vadd.f32 %v1454_v4, %v1440_v8  ;;  %v1457_v17 = vadd.f32 %v1455_v62, %v1441_v22 }
 0x1b7   :  { %v1472_v13 = vadd.f32 %v1470_v31, %v1456_v52  ;;  %v1473_v20 = vadd.f32 %v1471_v15, %v1457_v17  ;;  %v1514_v10 = vpop.permute.xlu1 %1513  ;;  %v2011_v17 = vld [vmem:[%s3525_s1 + $0x5] ss:$8 sm:$0x3] }
 0x1b8   :  { %v1573_v31 = vrot.slane %v2011_v17, %v3607_v21  ;;  %v1577_v15 = vrot.slane %v2011_v17, %v3608_v55 }
 0x1b9   :  { %v1474_v5 = vadd.f32 %v1472_v13, %v1388_v12  ;;  %v1475_v6 = vadd.f32 %v1473_v20, %v1389_v35  ;;  %v1530_v35 = vpop.permute.xlu0 %1529 }
 0x1bb   :  { %v1477_v32 = vpop.permute.xlu1 %1476 }
 0x1bf   :  { %v1479_v45 = vpop.permute.xlu1 %1478 }
 0x1c0   :  { %v1480_v30 = vsel %vm520_vm7, %v1477_v32, %v1479_v45  ;;  %v1481_v48 = vsel %vm520_vm7, %v1479_v45, %v1477_v32 }
 0x1c1   :  { %v1494_v50 = vmul.f32 %v1487_v2, %v1481_v48  ;;  %v1495_v18 = vmul.f32 %v1491_v9, %v1480_v30  ;;  %v2015_v48 = vld [vmem:[%s3525_s1 + $0x7] ss:$8 sm:$0x3] }
 0x1c3   :  { %v1586_v59 = vpop.permute.xlu1 %1585  ;;  %v1505_v7 = vrot.slane %v1494_v50, %v3607_v21  ;;  %v1509_v29 = vrot.slane %v1495_v18, %v3607_v21  ;;  %v1519_v54 = vrot.slane %v1494_v50, %v3608_v55  ;;  %v1523_v1 = vrot.slane %v1495_v18, %v3608_v55 }
 0x1c4   :  { %v1535_v36 = vrot.slane %v1494_v50, %v3613_v61  ;;  %v1539_v19 = vrot.slane %v1495_v18, %v3613_v61  ;;  %v1551_v39 = vrot.slane %v1494_v50, %v3614_v49  ;;  %v1555_v12 = vrot.slane %v1495_v18, %v3614_v49 }
 0x1c5   :  { %v1510_v27 = vmul.f32 %v1505_v7, %v3685_v46  ;;  %v1511_v44 = vmul.f32 %v1509_v29, %v3685_v46  ;;  %v1524_v42 = vmul.f32 %v1519_v54, %v1514_v10  ;;  %v1525_v14 = vmul.f32 %v1523_v1, %v1514_v10  ;;  %v2013_v10 = vld [vmem:[%s3525_s1 + $0x6] ss:$8 sm:$0x3] }
 0x1c6   :  { %v1540_v41 = vmul.f32 %v1535_v36, %v1530_v35  ;;  %v1541_v37 = vmul.f32 %v1539_v19, %v1530_v35  ;;  %v1556_v3 = vmul.f32 %v1551_v39, %v3686_v63  ;;  %v1557_v28 = vmul.f32 %v1555_v12, %v3686_v63 }
 0x1c7   :  { %v1526_v34 = vadd.f32 %v1524_v42, %v1510_v27  ;;  %v1527_v53 = vadd.f32 %v1525_v14, %v1511_v44  ;;  %v1659_v32 = vrot.slane %v2013_v10, %v3607_v21  ;;  %v1663_v2 = vrot.slane %v2013_v10, %v3608_v55 }
 0x1c8   :  { %v1600_v60 = vpop.permute.xlu1 %1599  ;;  %v1745_v36 = vrot.slane %v2015_v48, %v3607_v21  ;;  %v1749_v19 = vrot.slane %v2015_v48, %v3608_v55 }
 0x1c9   :  { %v1542_v16 = vadd.f32 %v1540_v41, %v1526_v34  ;;  %v1543_v33 = vadd.f32 %v1541_v37, %v1527_v53 }
 0x1cb   :  { %v1558_v43 = vadd.f32 %v1556_v3, %v1542_v16  ;;  %v1559_v57 = vadd.f32 %v1557_v28, %v1543_v33  ;;  %v1616_v33 = vpop.permute.xlu0 %1615 }
 0x1cc   :  { %v1563_v8 = vpop.permute.xlu1 %1562 }
 0x1cd   :  { %v3363_v22 = vadd.f32 %v1558_v43, %v1474_v5  ;;  %v3365_v58 = vadd.f32 %v1559_v57, %v1475_v6 }
 0x1d0   :  { %v1565_v51 = vpop.permute.xlu1 %1564 }
 0x1d1   :  { %v1566_v13 = vsel %vm609_vm8, %v1563_v8, %v1565_v51  ;;  %v1567_v20 = vsel %vm609_vm8, %v1565_v51, %v1563_v8 }
 0x1d2   :  { %v3381_v6 = vmul.f32 %v1573_v31, %v1566_v13  ;;  %v3383_v23 = vmul.f32 %v1577_v15, %v1567_v20 }
 0x1d4   :  { %v1672_v47 = vpop.permute.xlu1 %1671  ;;  %v1591_v50 = vrot.slane %v3381_v6, %v3607_v21  ;;  %v1595_v18 = vrot.slane %v3383_v23, %v3607_v21  ;;  %v1605_v7 = vrot.slane %v3381_v6, %v3608_v55  ;;  %v1609_v29 = vrot.slane %v3383_v23, %v3608_v55 }
 0x1d5   :  { %v1637_v10 = vrot.slane %v3381_v6, %v3614_v49 }
 0x1d6   :  { %v1596_v46 = vmul.f32 %v1591_v50, %v1586_v59  ;;  %v1597_v27 = vmul.f32 %v1595_v18, %v1586_v59  ;;  %v1610_v44 = vmul.f32 %v1605_v7, %v1600_v60  ;;  %v1611_v42 = vmul.f32 %v1609_v29, %v1600_v60  ;;  %v2017_v50 = vld [vmem:[%s3525_s1 + $0x10] ss:$8 sm:$0x3]  ;;  %s2134_s1 = smov [#allocation2]  }
 0x1d7   :  { %v1621_v59 = vrot.slane %v3381_v6, %v3613_v61  ;;  %v1625_v60 = vrot.slane %v3383_v23, %v3613_v61  ;;  %s1976_s22 = sshll.u32 %s2134_s1, 4  ;;  %s1977_s22 = int_to_ptr.vmem [resolvable:$true] %s1976_s22 }
 0x1d8   :  { %v1612_v28 = vadd.f32 %v1610_v44, %v1596_v46  ;;  %v1613_v16 = vadd.f32 %v1611_v42, %v1597_v27  ;;  %v1831_v27 = vrot.slane %v2017_v50, %v3607_v21  ;;  %s2094_s2 = scalar_lea.vmem %s1977_s22, 512  ;;  %p2099_p1 = scmp.lt.s32.totalorder %s1977_s22, %s1977_s22 }
 0x1d9   :  { %v1686_v4 = vpop.permute.xlu1 %1685  ;;  %v1626_v15 = vmul.f32 %v1621_v59, %v1616_v33  ;;  %v1627_v13 = vmul.f32 %v1625_v60, %v1616_v33  ;;  %v3687_v60 = vld [vmem:[#allocation20_spill] sm:$0xff]  ;;  %p2095_p0 = scmp.ne.s32.totalorder %s1977_s22, %s2094_s2  ;;  %p2100_p2 = scmp.lt.s32.totalorder %s2094_s2, %s2094_s2 }
 0x1db   :  { %p2101_p3 = por %p2100_p2, %p2099_p1 }
 0x1dd   :  { %v1649_v62 = vpop.permute.xlu1 %1648  ;;  %p2102_p4 = pnand %p2101_p3, %p2095_p0 }
 0x1e1   :  { %v1651_v52 = vpop.permute.xlu1 %1650 }
 0x1e2   :  { %v1652_v9 = vsel %vm698_vm9, %v1649_v62, %v1651_v52  ;;  %v1653_v45 = vsel %vm698_vm9, %v1651_v52, %v1649_v62 }
 0x1e3   :  { %v3402_v54 = vmul.f32 %v1659_v32, %v1652_v9  ;;  %v3404_v1 = vmul.f32 %v1663_v2, %v1653_v45  ;;  %v1641_v32 = vrot.slane %v3383_v23, %v3614_v49  ;;  %v1702_v2 = vpop.permute.xlu0 %1701  ;;  %v1628_v9 = vadd.f32 %v1626_v15, %v1612_v28  ;;  %v3688_v15 = vld [vmem:[#allocation6_spill] sm:$0xff] }
 0x1e4   :  { %v1629_v45 = vadd.f32 %v1627_v13, %v1613_v16 }
 0x1e5   :  { %v3370_v40 = vpop.permute.xlu1 %1757  ;;  %v1677_v14 = vrot.slane %v3402_v54, %v3607_v21  ;;  %v1681_v34 = vrot.slane %v3404_v1, %v3607_v21  ;;  %v1691_v53 = vrot.slane %v3402_v54, %v3608_v55  ;;  %v1695_v41 = vrot.slane %v3404_v1, %v3608_v55 }
 0x1e6   :  { %v1707_v20 = vrot.slane %v3402_v54, %v3613_v61  ;;  %v1723_v6 = vrot.slane %v3402_v54, %v3614_v49  ;;  %v1727_v23 = vrot.slane %v3404_v1, %v3614_v49  ;;  %v1643_v54 = vmul.f32 %v1641_v32, %v3050_v26 }
 0x1e7   :  { %v1682_v43 = vmul.f32 %v1677_v14, %v1672_v47  ;;  %v1683_v57 = vmul.f32 %v1681_v34, %v1672_v47  ;;  %v1696_v8 = vmul.f32 %v1691_v53, %v1686_v4  ;;  %v1697_v51 = vmul.f32 %v1695_v41, %v1686_v4  ;;  %v1788_v33 = vpop.permute.xlu0 %1787 }
 0x1e8   :  { %v1711_v47 = vrot.slane %v3404_v1, %v3613_v61  ;;  %v1645_v59 = vadd.f32 %v1643_v54, %v1629_v45  ;;  %v1728_v28 = vmul.f32 %v1723_v6, %v3687_v60  ;;  %v1729_v16 = vmul.f32 %v1727_v23, %v3687_v60 }
 0x1e9   :  { %v1699_v48 = vadd.f32 %v1697_v51, %v1683_v57 }
 0x1ea   :  { %v1772_v5 = vpop.permute.xlu1 %1771 }
 0x1eb   :  { %v1874_v6 = vpop.permute.xlu0 %1873 }
 0x1ee   :  { %v1735_v30 = vpop.permute.xlu1 %1734 }
 0x1f2   :  { %v1737_v39 = vpop.permute.xlu1 %1736 }
 0x1f3   :  { %v1738_v12 = vsel %vm787_vm10, %v1735_v30, %v1737_v39  ;;  %v1739_v35 = vsel %vm787_vm10, %v1737_v39, %v1735_v30  ;;  %v1698_v30 = vadd.f32 %v1696_v8, %v1682_v43  ;;  %v1713_v39 = vmul.f32 %v1711_v47, %v1702_v2 }
 0x1f4   :  { %v3420_v37 = vmul.f32 %v1745_v36, %v1738_v12  ;;  %v3422_v63 = vmul.f32 %v1749_v19, %v1739_v35  ;;  %v1712_v19 = vmul.f32 %v1707_v20, %v1702_v2 }
 0x1f5   :  { %v1715_v42 = vadd.f32 %v1713_v39, %v1699_v48 }
 0x1f6   :  { %v3424_v3 = vpop.permute.xlu1 %1843  ;;  %v1763_v62 = vrot.slane %v3420_v37, %v3607_v21  ;;  %v1767_v52 = vrot.slane %v3422_v63, %v3607_v21  ;;  %v1777_v17 = vrot.slane %v3420_v37, %v3608_v55  ;;  %v1781_v31 = vrot.slane %v3422_v63, %v3608_v55 }
 0x1f7   :  { %v1793_v35 = vrot.slane %v3420_v37, %v3613_v61  ;;  %v1797_v46 = vrot.slane %v3422_v63, %v3613_v61  ;;  %v1714_v44 = vadd.f32 %v1712_v19, %v1698_v30  ;;  %v1809_v1 = vrot.slane %v3420_v37, %v3614_v49 }
 0x1f8   :  { %v1768_v18 = vmul.f32 %v1763_v62, %v3370_v40  ;;  %v1769_v7 = vmul.f32 %v1767_v52, %v3370_v40  ;;  %v1782_v29 = vmul.f32 %v1777_v17, %v1772_v5  ;;  %v1783_v36 = vmul.f32 %v1781_v31, %v1772_v5 }
 0x1f9   :  { %v1835_v40 = vrot.slane %v2017_v50, %v3608_v55  ;;  %v1642_v5 = vmul.f32 %v1637_v10, %v3050_v26  ;;  %v1813_v14 = vrot.slane %v3422_v63, %v3614_v49  ;;  %v1798_v37 = vmul.f32 %v1793_v35, %v1788_v33 }
 0x1fa   :  { %v1784_v34 = vadd.f32 %v1782_v29, %v1768_v18  ;;  %v1785_v53 = vadd.f32 %v1783_v36, %v1769_v7  ;;  %v1799_v8 = vmul.f32 %v1797_v46, %v1788_v33  ;;  %v1730_v51 = vadd.f32 %v1728_v28, %v1714_v44 }
 0x1fb   :  { %v1858_v4 = vpop.permute.xlu1 %1857  ;;  %v1644_v41 = vadd.f32 %v1642_v5, %v1628_v9  ;;  %v1731_v63 = vadd.f32 %v1729_v16, %v1715_v42  ;;  %v1814_v13 = vmul.f32 %v1809_v1, %v3688_v15  ;;  %v1815_v20 = vmul.f32 %v1813_v14, %v3688_v15 }
 0x1fc   :  { %v1800_v17 = vadd.f32 %v1798_v37, %v1784_v34  ;;  %v1801_v31 = vadd.f32 %v1799_v8, %v1785_v53  ;;  %v1647_v36 = vadd.f32 %v1645_v59, %v3365_v58 }
 0x1fd   :  { %v1646_v29 = vadd.f32 %v1644_v41, %v3363_v22 }
 0x1fe   :  { %v1816_v19 = vadd.f32 %v1814_v13, %v1800_v17  ;;  %v1817_v39 = vadd.f32 %v1815_v20, %v1801_v31  ;;  %v1733_v5 = vadd.f32 %v1731_v63, %v1647_v36 }
 0x1ff   :  { %v1821_v12 = vpop.permute.xlu1 %1820 }
 0x203   :  { %v1823_v43 = vpop.permute.xlu1 %1822 }
 0x204   :  { %v1824_v26 = vsel %vm876_vm11, %v1821_v12, %v1823_v43  ;;  %v1825_v57 = vsel %vm876_vm11, %v1823_v43, %v1821_v12 }
 0x205   :  { %v1838_v62 = vmul.f32 %v1831_v27, %v1824_v26  ;;  %v1839_v52 = vmul.f32 %v1835_v40, %v1825_v57  ;;  %v1732_v40 = vadd.f32 %v1730_v51, %v1646_v29 }
 0x207   :  { %v1849_v47 = vrot.slane %v1838_v62, %v3607_v21  ;;  %v1853_v10 = vrot.slane %v1839_v52, %v3607_v21  ;;  %v1863_v32 = vrot.slane %v1838_v62, %v3608_v55  ;;  %v1867_v0 = vrot.slane %v1839_v52, %v3608_v55  ;;  %v1890_v23 = vpop.permute.xlu1 %1889 }
 0x208   :  { %v1879_v2 = vrot.slane %v1838_v62, %v3613_v61  ;;  %v1883_v9 = vrot.slane %v1839_v52, %v3613_v61  ;;  %v1895_v45 = vrot.slane %v1838_v62, %v3614_v49  ;;  %v1899_v30 = vrot.slane %v1839_v52, %v3614_v49 }
 0x209   :  { %v1854_v48 = vmul.f32 %v1849_v47, %v3424_v3  ;;  %v1855_v50 = vmul.f32 %v1853_v10, %v3424_v3  ;;  %v1868_v18 = vmul.f32 %v1863_v32, %v1858_v4  ;;  %v1869_v7 = vmul.f32 %v1867_v0, %v1858_v4 }
 0x20a   :  { %v1884_v46 = vmul.f32 %v1879_v2, %v1874_v6  ;;  %v1885_v27 = vmul.f32 %v1883_v9, %v1874_v6  ;;  %v1900_v42 = vmul.f32 %v1895_v45, %v1890_v23  ;;  %v1901_v3 = vmul.f32 %v1899_v30, %v1890_v23  ;;  %v2092_v2 = vld [vmem:[%s3524_s0 + $0x10] sm:$0xff] }
 0x20b   :  { %v1870_v12 = vadd.f32 %v1868_v18, %v1854_v48  ;;  %v1871_v35 = vadd.f32 %v1869_v7, %v1855_v50  ;;  %v1818_v1 = vadd.f32 %v1816_v19, %v1732_v40  ;;  %v1819_v4 = vadd.f32 %v1817_v39, %v1733_v5 }
 0x20d   :  { %v1886_v54 = vadd.f32 %v1884_v46, %v1870_v12  ;;  %v1887_v44 = vadd.f32 %v1885_v27, %v1871_v35 }
 0x20f   :  { %v1902_v14 = vadd.f32 %v1900_v42, %v1886_v54  ;;  %v1903_v22 = vadd.f32 %v1901_v3, %v1887_v44 }
 0x211   :  { %v1904_v34 = vadd.f32 %v1902_v14, %v1818_v1  ;;  %v1905_v58 = vadd.f32 %v1903_v22, %v1819_v4 }
 0x213   :  { %vm1906_vm0 = vcmp.ge.f32.partialorder %v1904_v34, 0.0  ;;  %vm1907_vm1 = vcmp.ge.f32.partialorder %v1905_v58, 0.0  ;;  %v1908_v53 = vmul.f32 0.01, %v1904_v34  ;;  %v1909_v41 = vmul.f32 0.01, %v1905_v58 }
 0x215   :  { %v1910_v59 = vsel %vm1906_vm0, %v1904_v34, %v1908_v53  ;;  %v1911_v60 = vsel %vm1907_vm1, %v1905_v58, %v1909_v41 }
 0x216   :  { %v1915_v28 = vrot.slane %v1910_v59, %v3607_v21  ;;  %v1919_v16 = vrot.slane %v1911_v60, %v3607_v21  ;;  %v1925_v33 = vrot.slane %v1910_v59, %v3608_v55  ;;  %v1929_v43 = vrot.slane %v1911_v60, %v3608_v55 }
 0x217   :  { %v1937_v26 = vrot.slane %v1910_v59, %v3613_v61  ;;  %v1941_v57 = vrot.slane %v1911_v60, %v3613_v61  ;;  %v1949_v37 = vrot.slane %v1910_v59, %v3614_v49  ;;  %v1953_v8 = vrot.slane %v1911_v60, %v3614_v49 }
 0x218   :  { %v1920_v51 = vmul.f32 %v1915_v28, %v2974_v56  ;;  %v1921_v63 = vmul.f32 %v1919_v16, %v2974_v56  ;;  %v1930_v62 = vmul.f32 %v1925_v33, %v3022_v38  ;;  %v1931_v21 = vmul.f32 %v1929_v43, %v3022_v38 }
 0x219   :  { %v1942_v55 = vmul.f32 %v1937_v26, %v3283_v24  ;;  %v1943_v31 = vmul.f32 %v1941_v57, %v3283_v24  ;;  %v1954_v13 = vmul.f32 %v1949_v37, %v3066_v25  ;;  %v1955_v49 = vmul.f32 %v1953_v8, %v3066_v25  ;;  %v2093_v25 = vld [vmem:[%s3524_s0 + $0x18] sm:$0xff] }
 0x21a   :  { %v1932_v52 = vadd.f32 %v1930_v62, %v1920_v51  ;;  %v1933_v17 = vadd.f32 %v1931_v21, %v1921_v63 }
 0x21c   :  { %v1944_v15 = vadd.f32 %v1942_v55, %v1932_v52  ;;  %v1945_v61 = vadd.f32 %v1943_v31, %v1933_v17 }
 0x21e   :  { %v1956_v20 = vadd.f32 %v1954_v13, %v1944_v15  ;;  %v1957_v47 = vadd.f32 %v1955_v49, %v1945_v61 }
 0x220   :  { %v1958_v56 = vadd.f32 %v1956_v20, %v3103_v11  ;;  %v1959_v10 = vadd.f32 %v1957_v47, %v3103_v11 }
 0x222   :  { %vm1960_vm2 = vcmp.ge.f32.partialorder %v1958_v56, 0.0  ;;  %vm1961_vm3 = vcmp.ge.f32.partialorder %v1959_v10, 0.0  ;;  %v1962_v38 = vmul.f32 0.01, %v1958_v56  ;;  %v1963_v32 = vmul.f32 0.01, %v1959_v10 }
 0x224   :  { %v1964_v0 = vsel %vm1960_vm2, %v1958_v56, %v1962_v38  ;;  %v1965_v24 = vsel %vm1961_vm3, %v1959_v10, %v1963_v32 }
 0x225   :  { %v1966_v9 = vadd.f32 %v2092_v2, %v1964_v0  ;;  %v1967_v45 = vadd.f32 %v2093_v25, %v1965_v24 }
 0x227   :  { %1969 = vst [vmem:[#allocation2 + $0x10] sm:$0xff] %v1966_v9  ;;  %1970 = vst [vmem:[#allocation2 + $0x18] sm:$0xff] %v1967_v45 }
 0x228   :  { %2105 = shalt.err (!%p2102_p4)
}
 0x229   :  { %s2106_s30 = scalar_lea.hbm %s3532_s8, 512 }
 0x22a   :  { %p2107_p5 = scmp.ne.s32.totalorder %s3532_s8, %s2106_s30  ;;  %p2110_p6 = scmp.lt.u32.totalorder %s2106_s30, %s3532_s8 }
 0x22c   :  { %p2112_p7 = pnand %p2110_p6, %p2107_p5 }
 0x22e   :  { %2115 = shalt.err (!%p2112_p7)
}
 0x22f   :  { %s2135_s9 = smov 256  }
 0x230   :  { %1982 = dma.vmem_to_hbm [thread:$0]  %s1977_s22, 512, %s3532_s8, [#allocation3], %s2135_s9, %s2135_s9, %s2127_s13  }
 0x231   :  { %2116 = dma.done.wait [#allocation3], 512  }
 0x232   :  { %2117 = vsyncadd [#allocation3], 4294966784 }
 0x233   :  { %1986 = vsyncpa [#allocation3], 1 }

</bundles_post_ra>
